<compile_context>
chip_gen: v5e
topology: v5e:2x2
jax: 0.10.0
libtpu: 0.0.40
codegen_flags: <defaults>
</compile_context>

<pallas_src>
import math

import jax
import jax.numpy as jnp
from jax.experimental import pallas as pl
from jax.experimental.pallas import tpu as pltpu


# --------------------------------------------------------------------------
# small helpers
# --------------------------------------------------------------------------
def _round_up(x, m):
    return ((x + m - 1) // m) * m


def _pad2(x, shape):
    return jnp.pad(x, [(0, s - d) for d, s in zip(x.shape, shape)])


def _pad_gate_cols(w, H, Hp):
    """Pad each H-wide gate block (PyTorch i|f|g|o order, last axis) to Hp."""
    if Hp == H:
        return w
    parts = [jnp.pad(w[:, k * H:(k + 1) * H], ((0, 0), (0, Hp - H)))
             for k in range(4)]
    return jnp.concatenate(parts, axis=1)


def _prep_lstm_params(lstm_params, H, Hp):
    """Pad to lane-aligned widths, fuse [wih1; whh1], cast MXU operands to bf16."""
    wih0_t, whh0_t, b0, wih1_t, whh1_t, b1 = lstm_params
    wih0 = _pad_gate_cols(wih0_t, H, Hp).astype(jnp.bfloat16)                 # (E, 4Hp)
    whh0 = _pad2(_pad_gate_cols(whh0_t, H, Hp), (Hp, 4 * Hp)).astype(jnp.bfloat16)
    b0p = _pad_gate_cols(b0, H, Hp)                                           # (1, 4Hp) f32
    wih1 = _pad2(_pad_gate_cols(wih1_t, H, Hp), (Hp, 4 * Hp))
    whh1 = _pad2(_pad_gate_cols(whh1_t, H, Hp), (Hp, 4 * Hp))
    w_l1 = jnp.concatenate([wih1, whh1], axis=0).astype(jnp.bfloat16)         # (2Hp, 4Hp)
    b1p = _pad_gate_cols(b1, H, Hp)                                           # (1, 4Hp) f32
    return wih0, whh0, b0p, w_l1, b1p


def _lstm_gates(gates, c_prev, Hp):
    """PyTorch gate order i,f,g,o; all slices are 128-lane aligned (Hp % 128 == 0)."""
    i = jax.nn.sigmoid(gates[:, 0 * Hp:1 * Hp])
    f = jax.nn.sigmoid(gates[:, 1 * Hp:2 * Hp])
    g = jnp.tanh(gates[:, 2 * Hp:3 * Hp])
    o = jax.nn.sigmoid(gates[:, 3 * Hp:4 * Hp])
    c_new = f * c_prev + i * g
    h_new = o * jnp.tanh(c_new)
    return h_new, c_new


def _lstm2_step(xp_row, carry, whh0_ref, w_l1_ref, b1_b, Hp):
    """One time step of the fused 2-layer LSTM.  h in bf16, c in f32."""
    f32, bf16 = jnp.float32, jnp.bfloat16
    h0, c0, h1, c1 = carry
    g0 = xp_row + jnp.dot(h0, whh0_ref[...], preferred_element_type=f32)
    h0f, c0 = _lstm_gates(g0, c0, Hp)
    h0 = h0f.astype(bf16)
    # Fused layer-1: one K=2Hp dot on [h0_new | h1_prev].
    g1 = jnp.dot(jnp.concatenate([h0, h1], axis=1), w_l1_ref[...],
                 preferred_element_type=f32) + b1_b
    h1f, c1 = _lstm_gates(g1, c1, Hp)
    return (h0, c0, h1f.astype(bf16), c1), h1f


# --------------------------------------------------------------------------
# Pallas kernels
# --------------------------------------------------------------------------
def _make_encoder_kernel(*, T, Bp, Hp):
    f32, bf16 = jnp.float32, jnp.bfloat16

    def kernel(x_ref, wih0, whh0, b0, w_l1, b1,
               w1a, w1b, w1c, w1d, b1n, w3, b3n,
               h_ref, c_ref, neck_ref, deco_ref,
               xp_scr):
        # Hoisted layer-0 input projection (+ folded bias): one big MXU matmul
        # instead of T tiny ones on the serial recurrent path.
        xp_scr[...] = jnp.dot(x_ref[...], wih0[...],
                              preferred_element_type=f32) + b0[...]

        # Hoist the (1,4Hp)->(Bp,4Hp) bias broadcast out of the serial loop.
        b1_b = jnp.broadcast_to(b1[...], (Bp, 4 * Hp))

        def step(t, carry):
            off = pl.multiple_of(t * Bp, Bp)
            new_carry, _ = _lstm2_step(xp_scr[pl.ds(off, Bp), :], carry,
                                       whh0, w_l1, b1_b, Hp)
            return new_carry

        init = (jnp.zeros((Bp, Hp), bf16), jnp.zeros((Bp, Hp), f32),
                jnp.zeros((Bp, Hp), bf16), jnp.zeros((Bp, Hp), f32))
        h0, c0, h1, c1 = jax.lax.fori_loop(0, T, step, init,
                                           unroll=max(1, min(T, 8)))

        h_ref[0] = h0.astype(f32)
        h_ref[1] = h1.astype(f32)
        c_ref[0] = c0
        c_ref[1] = c1

        # Fused bottleneck: inco @ W1 decomposed over its four H-wide row
        # blocks (inco == [h0 | c0 | h1 | c1]) so no unaligned lane slicing or
        # concatenation is needed inside the kernel.
        acc = (jnp.dot(h0, w1a[...], preferred_element_type=f32)
               + jnp.dot(c0.astype(bf16), w1b[...], preferred_element_type=f32)
               + jnp.dot(h1, w1c[...], preferred_element_type=f32)
               + jnp.dot(c1.astype(bf16), w1d[...], preferred_element_type=f32)
               + b1n[...])
        neck = jnp.tanh(acc)
        neck_ref[...] = neck
        deco_ref[...] = jnp.dot(neck.astype(bf16), w3[...],
                                preferred_element_type=f32) + b3n[...]
    return kernel


def _make_decoder_kernel(*, T, Bp, Hp):
    f32, bf16 = jnp.float32, jnp.bfloat16

    def kernel(x_ref, wih0, whh0, b0, w_l1, b1,
               hin_ref, cin_ref, wout, bout,
               preds_ref, xp_scr, y_scr):
        # Hoisted layer-0 input projection (+ folded bias).
        xp_scr[...] = jnp.dot(x_ref[...], wih0[...],
                              preferred_element_type=f32) + b0[...]

        b1_b = jnp.broadcast_to(b1[...], (Bp, 4 * Hp))

        def step(t, carry):
            off = pl.multiple_of(t * Bp, Bp)
            new_carry, h1f = _lstm2_step(xp_scr[pl.ds(off, Bp), :], carry,
                                         whh0, w_l1, b1_b, Hp)
            y_scr[pl.ds(off, Bp), :] = h1f
            return new_carry

        init = (hin_ref[0].astype(bf16), cin_ref[0],
                hin_ref[1].astype(bf16), cin_ref[1])
        _ = jax.lax.fori_loop(0, T, step, init, unroll=max(1, min(T, 8)))

        # Fused vocab projection: one lane-dense (T*Bp, Hp) @ (Hp, Vp) matmul.
        preds_ref[...] = jnp.dot(y_scr[...].astype(bf16), wout[...],
                                 preferred_element_type=f32) + bout[...]
    return kernel


# --------------------------------------------------------------------------
# pallas_call wrappers (grid-less: whole problem VMEM-resident, no
# double-buffering of invariant weights / activations)
# --------------------------------------------------------------------------
def _vmem_spec():
    return pl.BlockSpec(memory_space=pltpu.MemorySpace.VMEM)


def _vmem_budget(args, out_shapes, scratch_nbytes):
    total = int(scratch_nbytes)
    for a in args:
        total += int(a.size) * jnp.dtype(a.dtype).itemsize
    for s in out_shapes:
        total += math.prod(s.shape) * jnp.dtype(s.dtype).itemsize
    # 2x headroom for compiler-internal copies / relayouts, capped well below
    # physical VMEM on every generation that matters at these sizes.
    return int(min(max(2 * total + (2 << 20), 4 << 20), 64 << 20))


def encoder_bottleneck(x_flat, enc_w, bott_w, *, T, Bp, Hp, Fp):
    wih0, whh0, b0, w_l1, b1 = enc_w
    w1a, w1b, w1c, w1d, b1n, w3, b3n = bott_w
    kernel = _make_encoder_kernel(T=T, Bp=Bp, Hp=Hp)

    args = (x_flat, wih0, whh0, b0, w_l1, b1,
            w1a, w1b, w1c, w1d, b1n, w3, b3n)
    out_shape = (jax.ShapeDtypeStruct((2, Bp, Hp), jnp.float32),   # h_T
                 jax.ShapeDtypeStruct((2, Bp, Hp), jnp.float32),   # c_T
                 jax.ShapeDtypeStruct((Bp, Fp), jnp.float32),      # neck
                 jax.ShapeDtypeStruct((Bp, Fp), jnp.float32))      # deco
    scratch_nbytes = T * Bp * 4 * Hp * 4
    return pl.pallas_call(
        kernel,
        out_shape=out_shape,
        in_specs=[_vmem_spec() for _ in args],
        out_specs=tuple(_vmem_spec() for _ in out_shape),
        scratch_shapes=[pltpu.VMEM((T * Bp, 4 * Hp), jnp.float32)],  # hoisted x-proj
        compiler_params=pltpu.CompilerParams(
            vmem_limit_bytes=_vmem_budget(args, out_shape, scratch_nbytes)),
    )(*args)


def decoder_project(dec_x, dec_w, hdec, cdec, wout, bout, *, T, Bp, Hp, Vp):
    wih0, whh0, b0, w_l1, b1 = dec_w
    kernel = _make_decoder_kernel(T=T, Bp=Bp, Hp=Hp)

    args = (dec_x, wih0, whh0, b0, w_l1, b1, hdec, cdec, wout, bout)
    out_shape = (jax.ShapeDtypeStruct((T * Bp, Vp), jnp.float32),)
    scratch_nbytes = T * Bp * 4 * Hp * 4 + T * Bp * Hp * 4
    return pl.pallas_call(
        kernel,
        out_shape=out_shape[0],
        in_specs=[_vmem_spec() for _ in args],
        out_specs=_vmem_spec(),
        scratch_shapes=[pltpu.VMEM((T * Bp, 4 * Hp), jnp.float32),   # hoisted x-proj
                        pltpu.VMEM((T * Bp, Hp), jnp.float32)],      # top-layer outputs
        compiler_params=pltpu.CompilerParams(
            vmem_limit_bytes=_vmem_budget(args, out_shape, scratch_nbytes)),
    )(*args)


# --------------------------------------------------------------------------
# Parameters (deterministic synthetic init, logical / unpadded shapes)
# --------------------------------------------------------------------------
def init_params(key, vocab_size, E, H):
    V = vocab_size + 1
    keys = jax.random.split(key, 16)

    def unif(k, shape, bound):
        return jax.random.uniform(k, shape, jnp.float32, -bound, bound)

    s = 1.0 / (H ** 0.5)
    emb = 0.1 * jax.random.normal(keys[0], (V, E), jnp.float32)
    emb = emb.at[0].set(0.0)   # padding_idx=0 (stand-in for frozen GloVe table)

    def lstm2(k, in_dim):
        k0, k1 = jax.random.split(k)

        def layer(kk, idim):
            ka, kb, kc, kd = jax.random.split(kk, 4)
            wih = unif(ka, (4 * H, idim), s)
            whh = unif(kb, (4 * H, H), s)
            bih = unif(kc, (4 * H,), s)
            bhh = unif(kd, (4 * H,), s)
            return (jnp.transpose(wih), jnp.transpose(whh),
                    (bih + bhh).reshape(1, 4 * H))

        wih0_t, whh0_t, b0 = layer(k0, in_dim)
        wih1_t, whh1_t, b1 = layer(k1, H)
        return (wih0_t, whh0_t, b0, wih1_t, whh1_t, b1)

    enc = lstm2(keys[1], E)
    dec = lstm2(keys[2], E)

    bound = (6.0 / (8.0 * H)) ** 0.5
    w1 = unif(keys[3], (4 * H, 4 * H), bound)
    b1 = unif(keys[4], (4 * H,), 1.0 / (4 * H) ** 0.5)
    w3 = unif(keys[5], (4 * H, 4 * H), bound)
    b3 = unif(keys[6], (4 * H,), 1.0 / (4 * H) ** 0.5)

    wout = unif(keys[7], (V, H), 1.0 / H ** 0.5)
    bout = unif(keys[8], (V,), 1.0 / H ** 0.5)

    return dict(
        emb=emb, H=H,
        enc=enc, dec=dec,
        w1t=jnp.transpose(w1), b1=b1.reshape(1, 4 * H),
        w3t=jnp.transpose(w3), b3=b3.reshape(1, 4 * H),
        wout_t=jnp.transpose(wout), bout=bout.reshape(1, V),
    )


# --------------------------------------------------------------------------
# Seq2Seq forward (glue in plain JAX, hot loops in Pallas)
# --------------------------------------------------------------------------
def seq2seq_forward(params, target_qries, lengths_qry, teacher_forcing_ratio=1.0):
    del lengths_qry, teacher_forcing_ratio   # lengths unused in the torch forward
    bf16 = jnp.bfloat16
    emb = params["emb"]
    H = params["H"]
    V, E = emb.shape

    src = jnp.transpose(target_qries)        # (T, B)  == permute(1, 0)
    T, B = src.shape

    Hp = _round_up(H, 128)                   # lane-dense hidden width
    Fp = _round_up(4 * H, 128)               # lane-dense bottleneck width
    Vp = _round_up(V, 128)                   # lane-dense vocab width
    Bp = _round_up(B, 8)                     # full f32 sublane fill

    # Pad the batch (rows are independent; extra rows sliced away at the end).
    src_p = jnp.pad(src, ((0, 0), (0, Bp - B)))

    # Zero-padded, bf16-cast parameters for the kernels (padding preserves math).
    enc_w = _prep_lstm_params(params["enc"], H, Hp)
    dec_w = _prep_lstm_params(params["dec"], H, Hp)
    w1t = params["w1t"]
    bott_w = (
        _pad2(w1t[0 * H:1 * H], (Hp, Fp)).astype(bf16),   # inco block: enc h, layer 0
        _pad2(w1t[1 * H:2 * H], (Hp, Fp)).astype(bf16),   #             enc c, layer 0
        _pad2(w1t[2 * H:3 * H], (Hp, Fp)).astype(bf16),   #             enc h, layer 1
        _pad2(w1t[3 * H:4 * H], (Hp, Fp)).astype(bf16),   #             enc c, layer 1
        _pad2(params["b1"], (1, Fp)),
        _pad2(params["w3t"], (Fp, Fp)).astype(bf16),
        _pad2(params["b3"], (1, Fp)),
    )
    wout = _pad2(params["wout_t"], (Hp, Vp)).astype(bf16)
    bout = _pad2(params["bout"], (1, Vp))

    # ---- Encoder + fused bottleneck (1st pallas_call) ----
    enc_x = jnp.take(emb, src_p, axis=0).reshape(T * Bp, E).astype(bf16)
    hT, cT, neck_p, deco_p = encoder_bottleneck(
        enc_x, enc_w, bott_w, T=T, Bp=Bp, Hp=Hp, Fp=Fp)

    # Returned tensors (real rows / lanes only); layout glue stays in XLA.
    nh = jnp.transpose(hT[:, :B, :H], (1, 0, 2))
    nc = jnp.transpose(cT[:, :B, :H], (1, 0, 2))
    inco = jnp.concatenate([nh, nc], axis=2).reshape(B, 4 * H)
    neck = neck_p[:B, :4 * H]
    deco = deco_p[:B, :4 * H]

    # Decoder initial state from deco (once-per-call layout shuffle in XLA).
    ta = deco_p[:, :4 * H].reshape(Bp, 4, H)
    hidden = jnp.transpose(ta[:, 0:2], (1, 0, 2))     # (2, Bp, H)
    cell = jnp.transpose(ta[:, 2:4], (1, 0, 2))       # (2, Bp, H)
    hdec = jnp.pad(hidden, ((0, 0), (0, 0), (0, Hp - H)))
    cdec = jnp.pad(cell, ((0, 0), (0, 0), (0, Hp - H)))

    # ---- Decoder (always teacher-forced) + fused vocab projection ----
    start = jnp.full((1, Bp, E), 1.0 / 100.0, jnp.float32)    # t == 0 branch
    dec_emb = jnp.take(emb, src_p[:-1], axis=0)               # trg[t-1] for t >= 1
    dec_x = jnp.concatenate([start, dec_emb], axis=0).reshape(T * Bp, E).astype(bf16)
    preds_p = decoder_project(dec_x, dec_w, hdec, cdec, wout, bout,
                              T=T, Bp=Bp, Hp=Hp, Vp=Vp)

    outputs = preds_p.reshape(T, Bp, Vp)[:, :B, :V]           # (max_len, batch, vocab+1)
    return outputs, neck, inco, deco


# --------------------------------------------------------------------------
# Pure-JAX f32 reference (for correctness check)
# --------------------------------------------------------------------------
def _ref_lstm2_seq(x_seq, lstm_params, h0, c0):
    wih0_t, whh0_t, b0, wih1_t, whh1_t, b1 = lstm_params
    H = h0.shape[-1]

    def cell(x, h, c, wih_t, whh_t, b):
        g = x @ wih_t + h @ whh_t + b
        i = jax.nn.sigmoid(g[:, :H])
        f = jax.nn.sigmoid(g[:, H:2 * H])
        gg = jnp.tanh(g[:, 2 * H:3 * H])
        o = jax.nn.sigmoid(g[:, 3 * H:])
        c2 = f * c + i * gg
        return o * jnp.tanh(c2), c2

    def step(carry, x):
        h, c = carry
        h0n, c0n = cell(x, h[0], c[0], wih0_t, whh0_t, b0)
        h1n, c1n = cell(h0n, h[1], c[1], wih1_t, whh1_t, b1)
        return (jnp.stack([h0n, h1n]), jnp.stack([c0n, c1n])), h1n

    (hT, cT), ys = jax.lax.scan(step, (h0, c0), x_seq)
    return ys, hT, cT


def _ref_forward(params, target_qries):
    emb = params["emb"]
    H = params["H"]
    V, E = emb.shape
    src = jnp.transpose(target_qries)
    T, B = src.shape
    enc_x = jnp.take(emb, src, axis=0)
    z = jnp.zeros((2, B, H), jnp.float32)
    _, hT, cT = _ref_lstm2_seq(enc_x, params["enc"], z, z)
    inco = jnp.concatenate([jnp.transpose(hT, (1, 0, 2)),
                            jnp.transpose(cT, (1, 0, 2))], axis=2).reshape(B, 4 * H)
    neck = jnp.tanh(inco @ params["w1t"] + params["b1"])
    deco = neck @ params["w3t"] + params["b3"]
    ta = deco.reshape(B, 4, H)
    hidden = jnp.transpose(ta[:, 0:2], (1, 0, 2))
    cell = jnp.transpose(ta[:, 2:4], (1, 0, 2))
    dec_x = jnp.concatenate([jnp.full((1, B, E), 0.01, jnp.float32),
                             jnp.take(emb, src[:-1], axis=0)], axis=0)
    y_dec, _, _ = _ref_lstm2_seq(dec_x, params["dec"], hidden, cell)
    outputs = (y_dec.reshape(T * B, H) @ params["wout_t"]
               + params["bout"]).reshape(T, B, V)
    return outputs, neck, inco, deco


# --------------------------------------------------------------------------
if __name__ == "__main__":
    vocab_size, wordembed_size, hidden_size = 32, 16, 32
    batch, seq_len = 2, 8

    key = jax.random.PRNGKey(0)
    pkey, dkey = jax.random.split(key)
    params = init_params(pkey, vocab_size, wordembed_size, hidden_size)

    target_qries = jax.random.randint(dkey, (batch, seq_len), 0,
                                      vocab_size + 1, jnp.int32)
    lengths_qry = jnp.full((batch,), seq_len, jnp.int32)

    outputs, neck, inco, deco = seq2seq_forward(params, target_qries, lengths_qry)
    jax.block_until_ready((outputs, neck, inco, deco))

    assert outputs.shape == (seq_len, batch, vocab_size + 1)
    assert neck.shape == (batch, 4 * hidden_size)
    assert inco.shape == (batch, 4 * hidden_size)
    assert deco.shape == (batch, 4 * hidden_size)

    # Compare against the pure-f32 reference.  Kernel uses bf16 MXU operands
    # (f32 accumulation), so the tolerance is relaxed accordingly.
    r_out, r_neck, r_inco, r_deco = _ref_forward(params, target_qries)
    for a, b in ((outputs, r_out), (neck, r_neck), (inco, r_inco), (deco, r_deco)):
        assert jnp.allclose(a, b, rtol=3e-2, atol=3e-2), "mismatch vs reference"

    print("KERNEL_OK")
</pallas_src>

<mosaic_0001>
module attributes {stable_mosaic.version = 11 : i64} {
  func.func @kernel(%arg0: memref<64x16xbf16, #tpu.memory_space<vmem>>, %arg1: memref<16x512xbf16, #tpu.memory_space<vmem>>, %arg2: memref<128x512xbf16, #tpu.memory_space<vmem>>, %arg3: memref<1x512xf32, #tpu.memory_space<vmem>>, %arg4: memref<256x512xbf16, #tpu.memory_space<vmem>>, %arg5: memref<1x512xf32, #tpu.memory_space<vmem>>, %arg6: memref<128x128xbf16, #tpu.memory_space<vmem>>, %arg7: memref<128x128xbf16, #tpu.memory_space<vmem>>, %arg8: memref<128x128xbf16, #tpu.memory_space<vmem>>, %arg9: memref<128x128xbf16, #tpu.memory_space<vmem>>, %arg10: memref<1x128xf32, #tpu.memory_space<vmem>>, %arg11: memref<128x128xbf16, #tpu.memory_space<vmem>>, %arg12: memref<1x128xf32, #tpu.memory_space<vmem>>, %arg13: memref<2x8x128xf32, #tpu.memory_space<vmem>>, %arg14: memref<2x8x128xf32, #tpu.memory_space<vmem>>, %arg15: memref<8x128xf32, #tpu.memory_space<vmem>>, %arg16: memref<8x128xf32, #tpu.memory_space<vmem>>, %arg17: memref<64x512xf32, #tpu.memory_space<vmem>>) attributes {dimension_semantics = [], scalar_prefetch = 0 : i64, scratch_operands = 1 : i64, tpu.core_type = #tpu.core_type<tc>} {
    %c0 = arith.constant 0 : index
    %c0_0 = arith.constant 0 : index
    %0 = vector.load %arg0[%c0, %c0_0] : memref<64x16xbf16, #tpu.memory_space<vmem>>, vector<64x16xbf16>
    %c0_1 = arith.constant 0 : index
    %c0_2 = arith.constant 0 : index
    %1 = vector.load %arg1[%c0_1, %c0_2] : memref<16x512xbf16, #tpu.memory_space<vmem>>, vector<16x512xbf16>
    %cst = arith.constant dense<0.000000e+00> : vector<64x512xf32>
    %2 = tpu.matmul %0, %1, %cst {dimension_numbers = #tpu.dot_dimension_numbers<[1], [0], [0], [1], [0, 0, 1, 1], [], []>} : vector<64x16xbf16>, vector<16x512xbf16>, vector<64x512xf32> -> vector<64x512xf32>
    %c0_3 = arith.constant 0 : index
    %c0_4 = arith.constant 0 : index
    %3 = vector.load %arg3[%c0_3, %c0_4] : memref<1x512xf32, #tpu.memory_space<vmem>>, vector<1x512xf32>
    %4 = vector.broadcast %3 : vector<1x512xf32> to vector<64x512xf32>
    %5 = arith.addf %2, %4 : vector<64x512xf32>
    %c0_5 = arith.constant 0 : index
    %c0_6 = arith.constant 0 : index
    %6 = vector.load %arg17[%c0_5, %c0_6] : memref<64x512xf32, #tpu.memory_space<vmem>>, vector<64x512xf32>
    tpu.vector_store %arg17[%c0_5, %c0_6], %5 {strides = array<i32>} : memref<64x512xf32, #tpu.memory_space<vmem>>, vector<64x512xf32>,
    %c0_7 = arith.constant 0 : index
    %c0_8 = arith.constant 0 : index
    %7 = vector.load %arg5[%c0_7, %c0_8] : memref<1x512xf32, #tpu.memory_space<vmem>>, vector<1x512xf32>
    %8 = vector.shape_cast %7 : vector<1x512xf32> to vector<1x512xf32>
    %9 = vector.broadcast %8 : vector<1x512xf32> to vector<8x512xf32>
    %cst_9 = arith.constant 0.000000e+00 : bf16
    %10 = vector.broadcast %cst_9 : bf16 to vector<8x128xbf16>
    %cst_10 = arith.constant 0.000000e+00 : f32
    %11 = vector.broadcast %cst_10 : f32 to vector<8x128xf32>
    %cst_11 = arith.constant 0.000000e+00 : bf16
    %12 = vector.broadcast %cst_11 : bf16 to vector<8x128xbf16>
    %cst_12 = arith.constant 0.000000e+00 : f32
    %13 = vector.broadcast %cst_12 : f32 to vector<8x128xf32>
    %c0_i32 = arith.constant 0 : i32
    %c8_i32 = arith.constant 8 : i32
    %14 = arith.muli %c0_i32, %c8_i32 : i32
    %15 = tpu.assume_multiple %14, 8 : i32
    %16 = arith.index_cast %15 : i32 to index
    %c0_13 = arith.constant 0 : index
    %17 = vector.load %arg17[%16, %c0_13] : memref<64x512xf32, #tpu.memory_space<vmem>>, vector<8x512xf32>
    %c0_14 = arith.constant 0 : index
    %c0_15 = arith.constant 0 : index
    %18 = vector.load %arg2[%c0_14, %c0_15] : memref<128x512xbf16, #tpu.memory_space<vmem>>, vector<128x512xbf16>
    %cst_16 = arith.constant dense<0.000000e+00> : vector<8x512xf32>
    %19 = tpu.matmul %10, %18, %cst_16 {dimension_numbers = #tpu.dot_dimension_numbers<[1], [0], [0], [1], [0, 0, 1, 1], [], []>} : vector<8x128xbf16>, vector<128x512xbf16>, vector<8x512xf32> -> vector<8x512xf32>
    %20 = arith.addf %17, %19 : vector<8x512xf32>
    %21 = vector.extract_strided_slice %20 {offsets = [0, 0], sizes = [8, 128], strides = [1, 1]} : vector<8x512xf32> to vector<8x128xf32>
    %22 = arith.negf %21 : vector<8x128xf32>
    %23 = math.exp %22 : vector<8x128xf32>
    %cst_17 = arith.constant 1.000000e+00 : f32
    %24 = vector.broadcast %cst_17 : f32 to vector<8x128xf32>
    %25 = arith.addf %24, %23 : vector<8x128xf32>
    %26 = arith.divf %24, %25 : vector<8x128xf32>
    %27 = vector.extract_strided_slice %20 {offsets = [0, 128], sizes = [8, 128], strides = [1, 1]} : vector<8x512xf32> to vector<8x128xf32>
    %28 = arith.negf %27 : vector<8x128xf32>
    %29 = math.exp %28 : vector<8x128xf32>
    %cst_18 = arith.constant 1.000000e+00 : f32
    %30 = vector.broadcast %cst_18 : f32 to vector<8x128xf32>
    %31 = arith.addf %30, %29 : vector<8x128xf32>
    %32 = arith.divf %30, %31 : vector<8x128xf32>
    %33 = vector.extract_strided_slice %20 {offsets = [0, 256], sizes = [8, 128], strides = [1, 1]} : vector<8x512xf32> to vector<8x128xf32>
    %34 = math.tanh %33 : vector<8x128xf32>
    %35 = vector.extract_strided_slice %20 {offsets = [0, 384], sizes = [8, 128], strides = [1, 1]} : vector<8x512xf32> to vector<8x128xf32>
    %36 = arith.negf %35 : vector<8x128xf32>
    %37 = math.exp %36 : vector<8x128xf32>
    %cst_19 = arith.constant 1.000000e+00 : f32
    %38 = vector.broadcast %cst_19 : f32 to vector<8x128xf32>
    %39 = arith.addf %38, %37 : vector<8x128xf32>
    %40 = arith.divf %38, %39 : vector<8x128xf32>
    %41 = arith.mulf %32, %11 : vector<8x128xf32>
    %42 = arith.mulf %26, %34 : vector<8x128xf32>
    %43 = arith.addf %41, %42 : vector<8x128xf32>
    %44 = math.tanh %43 : vector<8x128xf32>
    %45 = arith.mulf %40, %44 : vector<8x128xf32>
    %46 = arith.truncf %45 : vector<8x128xf32> to vector<8x128xbf16>
    %47 = tpu.concatenate %46, %12 in 1 : vector<8x128xbf16>, vector<8x128xbf16> -> vector<8x256xbf16>
    %c0_20 = arith.constant 0 : index
    %c0_21 = arith.constant 0 : index
    %48 = vector.load %arg4[%c0_20, %c0_21] : memref<256x512xbf16, #tpu.memory_space<vmem>>, vector<256x512xbf16>
    %cst_22 = arith.constant dense<0.000000e+00> : vector<8x512xf32>
    %49 = tpu.matmul %47, %48, %cst_22 {dimension_numbers = #tpu.dot_dimension_numbers<[1], [0], [0], [1], [0, 0, 1, 1], [], []>} : vector<8x256xbf16>, vector<256x512xbf16>, vector<8x512xf32> -> vector<8x512xf32>
    %50 = arith.addf %49, %9 : vector<8x512xf32>
    %51 = vector.extract_strided_slice %50 {offsets = [0, 0], sizes = [8, 128], strides = [1, 1]} : vector<8x512xf32> to vector<8x128xf32>
    %52 = arith.negf %51 : vector<8x128xf32>
    %53 = math.exp %52 : vector<8x128xf32>
    %cst_23 = arith.constant 1.000000e+00 : f32
    %54 = vector.broadcast %cst_23 : f32 to vector<8x128xf32>
    %55 = arith.addf %54, %53 : vector<8x128xf32>
    %56 = arith.divf %54, %55 : vector<8x128xf32>
    %57 = vector.extract_strided_slice %50 {offsets = [0, 128], sizes = [8, 128], strides = [1, 1]} : vector<8x512xf32> to vector<8x128xf32>
    %58 = arith.negf %57 : vector<8x128xf32>
    %59 = math.exp %58 : vector<8x128xf32>
    %cst_24 = arith.constant 1.000000e+00 : f32
    %60 = vector.broadcast %cst_24 : f32 to vector<8x128xf32>
    %61 = arith.addf %60, %59 : vector<8x128xf32>
    %62 = arith.divf %60, %61 : vector<8x128xf32>
    %63 = vector.extract_strided_slice %50 {offsets = [0, 256], sizes = [8, 128], strides = [1, 1]} : vector<8x512xf32> to vector<8x128xf32>
    %64 = math.tanh %63 : vector<8x128xf32>
    %65 = vector.extract_strided_slice %50 {offsets = [0, 384], sizes = [8, 128], strides = [1, 1]} : vector<8x512xf32> to vector<8x128xf32>
    %66 = arith.negf %65 : vector<8x128xf32>
    %67 = math.exp %66 : vector<8x128xf32>
    %cst_25 = arith.constant 1.000000e+00 : f32
    %68 = vector.broadcast %cst_25 : f32 to vector<8x128xf32>
    %69 = arith.addf %68, %67 : vector<8x128xf32>
    %70 = arith.divf %68, %69 : vector<8x128xf32>
    %71 = arith.mulf %62, %13 : vector<8x128xf32>
    %72 = arith.mulf %56, %64 : vector<8x128xf32>
    %73 = arith.addf %71, %72 : vector<8x128xf32>
    %74 = math.tanh %73 : vector<8x128xf32>
    %75 = arith.mulf %70, %74 : vector<8x128xf32>
    %76 = arith.truncf %75 : vector<8x128xf32> to vector<8x128xbf16>
    %c1_i32 = arith.constant 1 : i32
    %c8_i32_26 = arith.constant 8 : i32
    %77 = arith.muli %c1_i32, %c8_i32_26 : i32
    %78 = tpu.assume_multiple %77, 8 : i32
    %79 = arith.index_cast %78 : i32 to index
    %c0_27 = arith.constant 0 : index
    %80 = vector.load %arg17[%79, %c0_27] : memref<64x512xf32, #tpu.memory_space<vmem>>, vector<8x512xf32>
    %c0_28 = arith.constant 0 : index
    %c0_29 = arith.constant 0 : index
    %81 = vector.load %arg2[%c0_28, %c0_29] : memref<128x512xbf16, #tpu.memory_space<vmem>>, vector<128x512xbf16>
    %cst_30 = arith.constant dense<0.000000e+00> : vector<8x512xf32>
    %82 = tpu.matmul %46, %81, %cst_30 {dimension_numbers = #tpu.dot_dimension_numbers<[1], [0], [0], [1], [0, 0, 1, 1], [], []>} : vector<8x128xbf16>, vector<128x512xbf16>, vector<8x512xf32> -> vector<8x512xf32>
    %83 = arith.addf %80, %82 : vector<8x512xf32>
    %84 = vector.extract_strided_slice %83 {offsets = [0, 0], sizes = [8, 128], strides = [1, 1]} : vector<8x512xf32> to vector<8x128xf32>
    %85 = arith.negf %84 : vector<8x128xf32>
    %86 = math.exp %85 : vector<8x128xf32>
    %cst_31 = arith.constant 1.000000e+00 : f32
    %87 = vector.broadcast %cst_31 : f32 to vector<8x128xf32>
    %88 = arith.addf %87, %86 : vector<8x128xf32>
    %89 = arith.divf %87, %88 : vector<8x128xf32>
    %90 = vector.extract_strided_slice %83 {offsets = [0, 128], sizes = [8, 128], strides = [1, 1]} : vector<8x512xf32> to vector<8x128xf32>
    %91 = arith.negf %90 : vector<8x128xf32>
    %92 = math.exp %91 : vector<8x128xf32>
    %cst_32 = arith.constant 1.000000e+00 : f32
    %93 = vector.broadcast %cst_32 : f32 to vector<8x128xf32>
    %94 = arith.addf %93, %92 : vector<8x128xf32>
    %95 = arith.divf %93, %94 : vector<8x128xf32>
    %96 = vector.extract_strided_slice %83 {offsets = [0, 256], sizes = [8, 128], strides = [1, 1]} : vector<8x512xf32> to vector<8x128xf32>
    %97 = math.tanh %96 : vector<8x128xf32>
    %98 = vector.extract_strided_slice %83 {offsets = [0, 384], sizes = [8, 128], strides = [1, 1]} : vector<8x512xf32> to vector<8x128xf32>
    %99 = arith.negf %98 : vector<8x128xf32>
    %100 = math.exp %99 : vector<8x128xf32>
    %cst_33 = arith.constant 1.000000e+00 : f32
    %101 = vector.broadcast %cst_33 : f32 to vector<8x128xf32>
    %102 = arith.addf %101, %100 : vector<8x128xf32>
    %103 = arith.divf %101, %102 : vector<8x128xf32>
    %104 = arith.mulf %95, %43 : vector<8x128xf32>
    %105 = arith.mulf %89, %97 : vector<8x128xf32>
    %106 = arith.addf %104, %105 : vector<8x128xf32>
    %107 = math.tanh %106 : vector<8x128xf32>
    %108 = arith.mulf %103, %107 : vector<8x128xf32>
    %109 = arith.truncf %108 : vector<8x128xf32> to vector<8x128xbf16>
    %110 = tpu.concatenate %109, %76 in 1 : vector<8x128xbf16>, vector<8x128xbf16> -> vector<8x256xbf16>
    %c0_34 = arith.constant 0 : index
    %c0_35 = arith.constant 0 : index
    %111 = vector.load %arg4[%c0_34, %c0_35] : memref<256x512xbf16, #tpu.memory_space<vmem>>, vector<256x512xbf16>
    %cst_36 = arith.constant dense<0.000000e+00> : vector<8x512xf32>
    %112 = tpu.matmul %110, %111, %cst_36 {dimension_numbers = #tpu.dot_dimension_numbers<[1], [0], [0], [1], [0, 0, 1, 1], [], []>} : vector<8x256xbf16>, vector<256x512xbf16>, vector<8x512xf32> -> vector<8x512xf32>
    %113 = arith.addf %112, %9 : vector<8x512xf32>
    %114 = vector.extract_strided_slice %113 {offsets = [0, 0], sizes = [8, 128], strides = [1, 1]} : vector<8x512xf32> to vector<8x128xf32>
    %115 = arith.negf %114 : vector<8x128xf32>
    %116 = math.exp %115 : vector<8x128xf32>
    %cst_37 = arith.constant 1.000000e+00 : f32
    %117 = vector.broadcast %cst_37 : f32 to vector<8x128xf32>
    %118 = arith.addf %117, %116 : vector<8x128xf32>
    %119 = arith.divf %117, %118 : vector<8x128xf32>
    %120 = vector.extract_strided_slice %113 {offsets = [0, 128], sizes = [8, 128], strides = [1, 1]} : vector<8x512xf32> to vector<8x128xf32>
    %121 = arith.negf %120 : vector<8x128xf32>
    %122 = math.exp %121 : vector<8x128xf32>
    %cst_38 = arith.constant 1.000000e+00 : f32
    %123 = vector.broadcast %cst_38 : f32 to vector<8x128xf32>
    %124 = arith.addf %123, %122 : vector<8x128xf32>
    %125 = arith.divf %123, %124 : vector<8x128xf32>
    %126 = vector.extract_strided_slice %113 {offsets = [0, 256], sizes = [8, 128], strides = [1, 1]} : vector<8x512xf32> to vector<8x128xf32>
    %127 = math.tanh %126 : vector<8x128xf32>
    %128 = vector.extract_strided_slice %113 {offsets = [0, 384], sizes = [8, 128], strides = [1, 1]} : vector<8x512xf32> to vector<8x128xf32>
    %129 = arith.negf %128 : vector<8x128xf32>
    %130 = math.exp %129 : vector<8x128xf32>
    %cst_39 = arith.constant 1.000000e+00 : f32
    %131 = vector.broadcast %cst_39 : f32 to vector<8x128xf32>
    %132 = arith.addf %131, %130 : vector<8x128xf32>
    %133 = arith.divf %131, %132 : vector<8x128xf32>
    %134 = arith.mulf %125, %73 : vector<8x128xf32>
    %135 = arith.mulf %119, %127 : vector<8x128xf32>
    %136 = arith.addf %134, %135 : vector<8x128xf32>
    %137 = math.tanh %136 : vector<8x128xf32>
    %138 = arith.mulf %133, %137 : vector<8x128xf32>
    %139 = arith.truncf %138 : vector<8x128xf32> to vector<8x128xbf16>
    %c2_i32 = arith.constant 2 : i32
    %c8_i32_40 = arith.constant 8 : i32
    %140 = arith.muli %c2_i32, %c8_i32_40 : i32
    %141 = tpu.assume_multiple %140, 8 : i32
    %142 = arith.index_cast %141 : i32 to index
    %c0_41 = arith.constant 0 : index
    %143 = vector.load %arg17[%142, %c0_41] : memref<64x512xf32, #tpu.memory_space<vmem>>, vector<8x512xf32>
    %c0_42 = arith.constant 0 : index
    %c0_43 = arith.constant 0 : index
    %144 = vector.load %arg2[%c0_42, %c0_43] : memref<128x512xbf16, #tpu.memory_space<vmem>>, vector<128x512xbf16>
    %cst_44 = arith.constant dense<0.000000e+00> : vector<8x512xf32>
    %145 = tpu.matmul %109, %144, %cst_44 {dimension_numbers = #tpu.dot_dimension_numbers<[1], [0], [0], [1], [0, 0, 1, 1], [], []>} : vector<8x128xbf16>, vector<128x512xbf16>, vector<8x512xf32> -> vector<8x512xf32>
    %146 = arith.addf %143, %145 : vector<8x512xf32>
    %147 = vector.extract_strided_slice %146 {offsets = [0, 0], sizes = [8, 128], strides = [1, 1]} : vector<8x512xf32> to vector<8x128xf32>
    %148 = arith.negf %147 : vector<8x128xf32>
    %149 = math.exp %148 : vector<8x128xf32>
    %cst_45 = arith.constant 1.000000e+00 : f32
    %150 = vector.broadcast %cst_45 : f32 to vector<8x128xf32>
    %151 = arith.addf %150, %149 : vector<8x128xf32>
    %152 = arith.divf %150, %151 : vector<8x128xf32>
    %153 = vector.extract_strided_slice %146 {offsets = [0, 128], sizes = [8, 128], strides = [1, 1]} : vector<8x512xf32> to vector<8x128xf32>
    %154 = arith.negf %153 : vector<8x128xf32>
    %155 = math.exp %154 : vector<8x128xf32>
    %cst_46 = arith.constant 1.000000e+00 : f32
    %156 = vector.broadcast %cst_46 : f32 to vector<8x128xf32>
    %157 = arith.addf %156, %155 : vector<8x128xf32>
    %158 = arith.divf %156, %157 : vector<8x128xf32>
    %159 = vector.extract_strided_slice %146 {offsets = [0, 256], sizes = [8, 128], strides = [1, 1]} : vector<8x512xf32> to vector<8x128xf32>
    %160 = math.tanh %159 : vector<8x128xf32>
    %161 = vector.extract_strided_slice %146 {offsets = [0, 384], sizes = [8, 128], strides = [1, 1]} : vector<8x512xf32> to vector<8x128xf32>
    %162 = arith.negf %161 : vector<8x128xf32>
    %163 = math.exp %162 : vector<8x128xf32>
    %cst_47 = arith.constant 1.000000e+00 : f32
    %164 = vector.broadcast %cst_47 : f32 to vector<8x128xf32>
    %165 = arith.addf %164, %163 : vector<8x128xf32>
    %166 = arith.divf %164, %165 : vector<8x128xf32>
    %167 = arith.mulf %158, %106 : vector<8x128xf32>
    %168 = arith.mulf %152, %160 : vector<8x128xf32>
    %169 = arith.addf %167, %168 : vector<8x128xf32>
    %170 = math.tanh %169 : vector<8x128xf32>
    %171 = arith.mulf %166, %170 : vector<8x128xf32>
    %172 = arith.truncf %171 : vector<8x128xf32> to vector<8x128xbf16>
    %173 = tpu.concatenate %172, %139 in 1 : vector<8x128xbf16>, vector<8x128xbf16> -> vector<8x256xbf16>
    %c0_48 = arith.constant 0 : index
    %c0_49 = arith.constant 0 : index
    %174 = vector.load %arg4[%c0_48, %c0_49] : memref<256x512xbf16, #tpu.memory_space<vmem>>, vector<256x512xbf16>
    %cst_50 = arith.constant dense<0.000000e+00> : vector<8x512xf32>
    %175 = tpu.matmul %173, %174, %cst_50 {dimension_numbers = #tpu.dot_dimension_numbers<[1], [0], [0], [1], [0, 0, 1, 1], [], []>} : vector<8x256xbf16>, vector<256x512xbf16>, vector<8x512xf32> -> vector<8x512xf32>
    %176 = arith.addf %175, %9 : vector<8x512xf32>
    %177 = vector.extract_strided_slice %176 {offsets = [0, 0], sizes = [8, 128], strides = [1, 1]} : vector<8x512xf32> to vector<8x128xf32>
    %178 = arith.negf %177 : vector<8x128xf32>
    %179 = math.exp %178 : vector<8x128xf32>
    %cst_51 = arith.constant 1.000000e+00 : f32
    %180 = vector.broadcast %cst_51 : f32 to vector<8x128xf32>
    %181 = arith.addf %180, %179 : vector<8x128xf32>
    %182 = arith.divf %180, %181 : vector<8x128xf32>
    %183 = vector.extract_strided_slice %176 {offsets = [0, 128], sizes = [8, 128], strides = [1, 1]} : vector<8x512xf32> to vector<8x128xf32>
    %184 = arith.negf %183 : vector<8x128xf32>
    %185 = math.exp %184 : vector<8x128xf32>
    %cst_52 = arith.constant 1.000000e+00 : f32
    %186 = vector.broadcast %cst_52 : f32 to vector<8x128xf32>
    %187 = arith.addf %186, %185 : vector<8x128xf32>
    %188 = arith.divf %186, %187 : vector<8x128xf32>
    %189 = vector.extract_strided_slice %176 {offsets = [0, 256], sizes = [8, 128], strides = [1, 1]} : vector<8x512xf32> to vector<8x128xf32>
    %190 = math.tanh %189 : vector<8x128xf32>
    %191 = vector.extract_strided_slice %176 {offsets = [0, 384], sizes = [8, 128], strides = [1, 1]} : vector<8x512xf32> to vector<8x128xf32>
    %192 = arith.negf %191 : vector<8x128xf32>
    %193 = math.exp %192 : vector<8x128xf32>
    %cst_53 = arith.constant 1.000000e+00 : f32
    %194 = vector.broadcast %cst_53 : f32 to vector<8x128xf32>
    %195 = arith.addf %194, %193 : vector<8x128xf32>
    %196 = arith.divf %194, %195 : vector<8x128xf32>
    %197 = arith.mulf %188, %136 : vector<8x128xf32>
    %198 = arith.mulf %182, %190 : vector<8x128xf32>
    %199 = arith.addf %197, %198 : vector<8x128xf32>
    %200 = math.tanh %199 : vector<8x128xf32>
    %201 = arith.mulf %196, %200 : vector<8x128xf32>
    %202 = arith.truncf %201 : vector<8x128xf32> to vector<8x128xbf16>
    %c3_i32 = arith.constant 3 : i32
    %c8_i32_54 = arith.constant 8 : i32
    %203 = arith.muli %c3_i32, %c8_i32_54 : i32
    %204 = tpu.assume_multiple %203, 8 : i32
    %205 = arith.index_cast %204 : i32 to index
    %c0_55 = arith.constant 0 : index
    %206 = vector.load %arg17[%205, %c0_55] : memref<64x512xf32, #tpu.memory_space<vmem>>, vector<8x512xf32>
    %c0_56 = arith.constant 0 : index
    %c0_57 = arith.constant 0 : index
    %207 = vector.load %arg2[%c0_56, %c0_57] : memref<128x512xbf16, #tpu.memory_space<vmem>>, vector<128x512xbf16>
    %cst_58 = arith.constant dense<0.000000e+00> : vector<8x512xf32>
    %208 = tpu.matmul %172, %207, %cst_58 {dimension_numbers = #tpu.dot_dimension_numbers<[1], [0], [0], [1], [0, 0, 1, 1], [], []>} : vector<8x128xbf16>, vector<128x512xbf16>, vector<8x512xf32> -> vector<8x512xf32>
    %209 = arith.addf %206, %208 : vector<8x512xf32>
    %210 = vector.extract_strided_slice %209 {offsets = [0, 0], sizes = [8, 128], strides = [1, 1]} : vector<8x512xf32> to vector<8x128xf32>
    %211 = arith.negf %210 : vector<8x128xf32>
    %212 = math.exp %211 : vector<8x128xf32>
    %cst_59 = arith.constant 1.000000e+00 : f32
    %213 = vector.broadcast %cst_59 : f32 to vector<8x128xf32>
    %214 = arith.addf %213, %212 : vector<8x128xf32>
    %215 = arith.divf %213, %214 : vector<8x128xf32>
    %216 = vector.extract_strided_slice %209 {offsets = [0, 128], sizes = [8, 128], strides = [1, 1]} : vector<8x512xf32> to vector<8x128xf32>
    %217 = arith.negf %216 : vector<8x128xf32>
    %218 = math.exp %217 : vector<8x128xf32>
    %cst_60 = arith.constant 1.000000e+00 : f32
    %219 = vector.broadcast %cst_60 : f32 to vector<8x128xf32>
    %220 = arith.addf %219, %218 : vector<8x128xf32>
    %221 = arith.divf %219, %220 : vector<8x128xf32>
    %222 = vector.extract_strided_slice %209 {offsets = [0, 256], sizes = [8, 128], strides = [1, 1]} : vector<8x512xf32> to vector<8x128xf32>
    %223 = math.tanh %222 : vector<8x128xf32>
    %224 = vector.extract_strided_slice %209 {offsets = [0, 384], sizes = [8, 128], strides = [1, 1]} : vector<8x512xf32> to vector<8x128xf32>
    %225 = arith.negf %224 : vector<8x128xf32>
    %226 = math.exp %225 : vector<8x128xf32>
    %cst_61 = arith.constant 1.000000e+00 : f32
    %227 = vector.broadcast %cst_61 : f32 to vector<8x128xf32>
    %228 = arith.addf %227, %226 : vector<8x128xf32>
    %229 = arith.divf %227, %228 : vector<8x128xf32>
    %230 = arith.mulf %221, %169 : vector<8x128xf32>
    %231 = arith.mulf %215, %223 : vector<8x128xf32>
    %232 = arith.addf %230, %231 : vector<8x128xf32>
    %233 = math.tanh %232 : vector<8x128xf32>
    %234 = arith.mulf %229, %233 : vector<8x128xf32>
    %235 = arith.truncf %234 : vector<8x128xf32> to vector<8x128xbf16>
    %236 = tpu.concatenate %235, %202 in 1 : vector<8x128xbf16>, vector<8x128xbf16> -> vector<8x256xbf16>
    %c0_62 = arith.constant 0 : index
    %c0_63 = arith.constant 0 : index
    %237 = vector.load %arg4[%c0_62, %c0_63] : memref<256x512xbf16, #tpu.memory_space<vmem>>, vector<256x512xbf16>
    %cst_64 = arith.constant dense<0.000000e+00> : vector<8x512xf32>
    %238 = tpu.matmul %236, %237, %cst_64 {dimension_numbers = #tpu.dot_dimension_numbers<[1], [0], [0], [1], [0, 0, 1, 1], [], []>} : vector<8x256xbf16>, vector<256x512xbf16>, vector<8x512xf32> -> vector<8x512xf32>
    %239 = arith.addf %238, %9 : vector<8x512xf32>
    %240 = vector.extract_strided_slice %239 {offsets = [0, 0], sizes = [8, 128], strides = [1, 1]} : vector<8x512xf32> to vector<8x128xf32>
    %241 = arith.negf %240 : vector<8x128xf32>
    %242 = math.exp %241 : vector<8x128xf32>
    %cst_65 = arith.constant 1.000000e+00 : f32
    %243 = vector.broadcast %cst_65 : f32 to vector<8x128xf32>
    %244 = arith.addf %243, %242 : vector<8x128xf32>
    %245 = arith.divf %243, %244 : vector<8x128xf32>
    %246 = vector.extract_strided_slice %239 {offsets = [0, 128], sizes = [8, 128], strides = [1, 1]} : vector<8x512xf32> to vector<8x128xf32>
    %247 = arith.negf %246 : vector<8x128xf32>
    %248 = math.exp %247 : vector<8x128xf32>
    %cst_66 = arith.constant 1.000000e+00 : f32
    %249 = vector.broadcast %cst_66 : f32 to vector<8x128xf32>
    %250 = arith.addf %249, %248 : vector<8x128xf32>
    %251 = arith.divf %249, %250 : vector<8x128xf32>
    %252 = vector.extract_strided_slice %239 {offsets = [0, 256], sizes = [8, 128], strides = [1, 1]} : vector<8x512xf32> to vector<8x128xf32>
    %253 = math.tanh %252 : vector<8x128xf32>
    %254 = vector.extract_strided_slice %239 {offsets = [0, 384], sizes = [8, 128], strides = [1, 1]} : vector<8x512xf32> to vector<8x128xf32>
    %255 = arith.negf %254 : vector<8x128xf32>
    %256 = math.exp %255 : vector<8x128xf32>
    %cst_67 = arith.constant 1.000000e+00 : f32
    %257 = vector.broadcast %cst_67 : f32 to vector<8x128xf32>
    %258 = arith.addf %257, %256 : vector<8x128xf32>
    %259 = arith.divf %257, %258 : vector<8x128xf32>
    %260 = arith.mulf %251, %199 : vector<8x128xf32>
    %261 = arith.mulf %245, %253 : vector<8x128xf32>
    %262 = arith.addf %260, %261 : vector<8x128xf32>
    %263 = math.tanh %262 : vector<8x128xf32>
    %264 = arith.mulf %259, %263 : vector<8x128xf32>
    %265 = arith.truncf %264 : vector<8x128xf32> to vector<8x128xbf16>
    %c4_i32 = arith.constant 4 : i32
    %c8_i32_68 = arith.constant 8 : i32
    %266 = arith.muli %c4_i32, %c8_i32_68 : i32
    %267 = tpu.assume_multiple %266, 8 : i32
    %268 = arith.index_cast %267 : i32 to index
    %c0_69 = arith.constant 0 : index
    %269 = vector.load %arg17[%268, %c0_69] : memref<64x512xf32, #tpu.memory_space<vmem>>, vector<8x512xf32>
    %c0_70 = arith.constant 0 : index
    %c0_71 = arith.constant 0 : index
    %270 = vector.load %arg2[%c0_70, %c0_71] : memref<128x512xbf16, #tpu.memory_space<vmem>>, vector<128x512xbf16>
    %cst_72 = arith.constant dense<0.000000e+00> : vector<8x512xf32>
    %271 = tpu.matmul %235, %270, %cst_72 {dimension_numbers = #tpu.dot_dimension_numbers<[1], [0], [0], [1], [0, 0, 1, 1], [], []>} : vector<8x128xbf16>, vector<128x512xbf16>, vector<8x512xf32> -> vector<8x512xf32>
    %272 = arith.addf %269, %271 : vector<8x512xf32>
    %273 = vector.extract_strided_slice %272 {offsets = [0, 0], sizes = [8, 128], strides = [1, 1]} : vector<8x512xf32> to vector<8x128xf32>
    %274 = arith.negf %273 : vector<8x128xf32>
    %275 = math.exp %274 : vector<8x128xf32>
    %cst_73 = arith.constant 1.000000e+00 : f32
    %276 = vector.broadcast %cst_73 : f32 to vector<8x128xf32>
    %277 = arith.addf %276, %275 : vector<8x128xf32>
    %278 = arith.divf %276, %277 : vector<8x128xf32>
    %279 = vector.extract_strided_slice %272 {offsets = [0, 128], sizes = [8, 128], strides = [1, 1]} : vector<8x512xf32> to vector<8x128xf32>
    %280 = arith.negf %279 : vector<8x128xf32>
    %281 = math.exp %280 : vector<8x128xf32>
    %cst_74 = arith.constant 1.000000e+00 : f32
    %282 = vector.broadcast %cst_74 : f32 to vector<8x128xf32>
    %283 = arith.addf %282, %281 : vector<8x128xf32>
    %284 = arith.divf %282, %283 : vector<8x128xf32>
    %285 = vector.extract_strided_slice %272 {offsets = [0, 256], sizes = [8, 128], strides = [1, 1]} : vector<8x512xf32> to vector<8x128xf32>
    %286 = math.tanh %285 : vector<8x128xf32>
    %287 = vector.extract_strided_slice %272 {offsets = [0, 384], sizes = [8, 128], strides = [1, 1]} : vector<8x512xf32> to vector<8x128xf32>
    %288 = arith.negf %287 : vector<8x128xf32>
    %289 = math.exp %288 : vector<8x128xf32>
    %cst_75 = arith.constant 1.000000e+00 : f32
    %290 = vector.broadcast %cst_75 : f32 to vector<8x128xf32>
    %291 = arith.addf %290, %289 : vector<8x128xf32>
    %292 = arith.divf %290, %291 : vector<8x128xf32>
    %293 = arith.mulf %284, %232 : vector<8x128xf32>
    %294 = arith.mulf %278, %286 : vector<8x128xf32>
    %295 = arith.addf %293, %294 : vector<8x128xf32>
    %296 = math.tanh %295 : vector<8x128xf32>
    %297 = arith.mulf %292, %296 : vector<8x128xf32>
    %298 = arith.truncf %297 : vector<8x128xf32> to vector<8x128xbf16>
    %299 = tpu.concatenate %298, %265 in 1 : vector<8x128xbf16>, vector<8x128xbf16> -> vector<8x256xbf16>
    %c0_76 = arith.constant 0 : index
    %c0_77 = arith.constant 0 : index
    %300 = vector.load %arg4[%c0_76, %c0_77] : memref<256x512xbf16, #tpu.memory_space<vmem>>, vector<256x512xbf16>
    %cst_78 = arith.constant dense<0.000000e+00> : vector<8x512xf32>
    %301 = tpu.matmul %299, %300, %cst_78 {dimension_numbers = #tpu.dot_dimension_numbers<[1], [0], [0], [1], [0, 0, 1, 1], [], []>} : vector<8x256xbf16>, vector<256x512xbf16>, vector<8x512xf32> -> vector<8x512xf32>
    %302 = arith.addf %301, %9 : vector<8x512xf32>
    %303 = vector.extract_strided_slice %302 {offsets = [0, 0], sizes = [8, 128], strides = [1, 1]} : vector<8x512xf32> to vector<8x128xf32>
    %304 = arith.negf %303 : vector<8x128xf32>
    %305 = math.exp %304 : vector<8x128xf32>
    %cst_79 = arith.constant 1.000000e+00 : f32
    %306 = vector.broadcast %cst_79 : f32 to vector<8x128xf32>
    %307 = arith.addf %306, %305 : vector<8x128xf32>
    %308 = arith.divf %306, %307 : vector<8x128xf32>
    %309 = vector.extract_strided_slice %302 {offsets = [0, 128], sizes = [8, 128], strides = [1, 1]} : vector<8x512xf32> to vector<8x128xf32>
    %310 = arith.negf %309 : vector<8x128xf32>
    %311 = math.exp %310 : vector<8x128xf32>
    %cst_80 = arith.constant 1.000000e+00 : f32
    %312 = vector.broadcast %cst_80 : f32 to vector<8x128xf32>
    %313 = arith.addf %312, %311 : vector<8x128xf32>
    %314 = arith.divf %312, %313 : vector<8x128xf32>
    %315 = vector.extract_strided_slice %302 {offsets = [0, 256], sizes = [8, 128], strides = [1, 1]} : vector<8x512xf32> to vector<8x128xf32>
    %316 = math.tanh %315 : vector<8x128xf32>
    %317 = vector.extract_strided_slice %302 {offsets = [0, 384], sizes = [8, 128], strides = [1, 1]} : vector<8x512xf32> to vector<8x128xf32>
    %318 = arith.negf %317 : vector<8x128xf32>
    %319 = math.exp %318 : vector<8x128xf32>
    %cst_81 = arith.constant 1.000000e+00 : f32
    %320 = vector.broadcast %cst_81 : f32 to vector<8x128xf32>
    %321 = arith.addf %320, %319 : vector<8x128xf32>
    %322 = arith.divf %320, %321 : vector<8x128xf32>
    %323 = arith.mulf %314, %262 : vector<8x128xf32>
    %324 = arith.mulf %308, %316 : vector<8x128xf32>
    %325 = arith.addf %323, %324 : vector<8x128xf32>
    %326 = math.tanh %325 : vector<8x128xf32>
    %327 = arith.mulf %322, %326 : vector<8x128xf32>
    %328 = arith.truncf %327 : vector<8x128xf32> to vector<8x128xbf16>
    %c5_i32 = arith.constant 5 : i32
    %c8_i32_82 = arith.constant 8 : i32
    %329 = arith.muli %c5_i32, %c8_i32_82 : i32
    %330 = tpu.assume_multiple %329, 8 : i32
    %331 = arith.index_cast %330 : i32 to index
    %c0_83 = arith.constant 0 : index
    %332 = vector.load %arg17[%331, %c0_83] : memref<64x512xf32, #tpu.memory_space<vmem>>, vector<8x512xf32>
    %c0_84 = arith.constant 0 : index
    %c0_85 = arith.constant 0 : index
    %333 = vector.load %arg2[%c0_84, %c0_85] : memref<128x512xbf16, #tpu.memory_space<vmem>>, vector<128x512xbf16>
    %cst_86 = arith.constant dense<0.000000e+00> : vector<8x512xf32>
    %334 = tpu.matmul %298, %333, %cst_86 {dimension_numbers = #tpu.dot_dimension_numbers<[1], [0], [0], [1], [0, 0, 1, 1], [], []>} : vector<8x128xbf16>, vector<128x512xbf16>, vector<8x512xf32> -> vector<8x512xf32>
    %335 = arith.addf %332, %334 : vector<8x512xf32>
    %336 = vector.extract_strided_slice %335 {offsets = [0, 0], sizes = [8, 128], strides = [1, 1]} : vector<8x512xf32> to vector<8x128xf32>
    %337 = arith.negf %336 : vector<8x128xf32>
    %338 = math.exp %337 : vector<8x128xf32>
    %cst_87 = arith.constant 1.000000e+00 : f32
    %339 = vector.broadcast %cst_87 : f32 to vector<8x128xf32>
    %340 = arith.addf %339, %338 : vector<8x128xf32>
    %341 = arith.divf %339, %340 : vector<8x128xf32>
    %342 = vector.extract_strided_slice %335 {offsets = [0, 128], sizes = [8, 128], strides = [1, 1]} : vector<8x512xf32> to vector<8x128xf32>
    %343 = arith.negf %342 : vector<8x128xf32>
    %344 = math.exp %343 : vector<8x128xf32>
    %cst_88 = arith.constant 1.000000e+00 : f32
    %345 = vector.broadcast %cst_88 : f32 to vector<8x128xf32>
    %346 = arith.addf %345, %344 : vector<8x128xf32>
    %347 = arith.divf %345, %346 : vector<8x128xf32>
    %348 = vector.extract_strided_slice %335 {offsets = [0, 256], sizes = [8, 128], strides = [1, 1]} : vector<8x512xf32> to vector<8x128xf32>
    %349 = math.tanh %348 : vector<8x128xf32>
    %350 = vector.extract_strided_slice %335 {offsets = [0, 384], sizes = [8, 128], strides = [1, 1]} : vector<8x512xf32> to vector<8x128xf32>
    %351 = arith.negf %350 : vector<8x128xf32>
    %352 = math.exp %351 : vector<8x128xf32>
    %cst_89 = arith.constant 1.000000e+00 : f32
    %353 = vector.broadcast %cst_89 : f32 to vector<8x128xf32>
    %354 = arith.addf %353, %352 : vector<8x128xf32>
    %355 = arith.divf %353, %354 : vector<8x128xf32>
    %356 = arith.mulf %347, %295 : vector<8x128xf32>
    %357 = arith.mulf %341, %349 : vector<8x128xf32>
    %358 = arith.addf %356, %357 : vector<8x128xf32>
    %359 = math.tanh %358 : vector<8x128xf32>
    %360 = arith.mulf %355, %359 : vector<8x128xf32>
    %361 = arith.truncf %360 : vector<8x128xf32> to vector<8x128xbf16>
    %362 = tpu.concatenate %361, %328 in 1 : vector<8x128xbf16>, vector<8x128xbf16> -> vector<8x256xbf16>
    %c0_90 = arith.constant 0 : index
    %c0_91 = arith.constant 0 : index
    %363 = vector.load %arg4[%c0_90, %c0_91] : memref<256x512xbf16, #tpu.memory_space<vmem>>, vector<256x512xbf16>
    %cst_92 = arith.constant dense<0.000000e+00> : vector<8x512xf32>
    %364 = tpu.matmul %362, %363, %cst_92 {dimension_numbers = #tpu.dot_dimension_numbers<[1], [0], [0], [1], [0, 0, 1, 1], [], []>} : vector<8x256xbf16>, vector<256x512xbf16>, vector<8x512xf32> -> vector<8x512xf32>
    %365 = arith.addf %364, %9 : vector<8x512xf32>
    %366 = vector.extract_strided_slice %365 {offsets = [0, 0], sizes = [8, 128], strides = [1, 1]} : vector<8x512xf32> to vector<8x128xf32>
    %367 = arith.negf %366 : vector<8x128xf32>
    %368 = math.exp %367 : vector<8x128xf32>
    %cst_93 = arith.constant 1.000000e+00 : f32
    %369 = vector.broadcast %cst_93 : f32 to vector<8x128xf32>
    %370 = arith.addf %369, %368 : vector<8x128xf32>
    %371 = arith.divf %369, %370 : vector<8x128xf32>
    %372 = vector.extract_strided_slice %365 {offsets = [0, 128], sizes = [8, 128], strides = [1, 1]} : vector<8x512xf32> to vector<8x128xf32>
    %373 = arith.negf %372 : vector<8x128xf32>
    %374 = math.exp %373 : vector<8x128xf32>
    %cst_94 = arith.constant 1.000000e+00 : f32
    %375 = vector.broadcast %cst_94 : f32 to vector<8x128xf32>
    %376 = arith.addf %375, %374 : vector<8x128xf32>
    %377 = arith.divf %375, %376 : vector<8x128xf32>
    %378 = vector.extract_strided_slice %365 {offsets = [0, 256], sizes = [8, 128], strides = [1, 1]} : vector<8x512xf32> to vector<8x128xf32>
    %379 = math.tanh %378 : vector<8x128xf32>
    %380 = vector.extract_strided_slice %365 {offsets = [0, 384], sizes = [8, 128], strides = [1, 1]} : vector<8x512xf32> to vector<8x128xf32>
    %381 = arith.negf %380 : vector<8x128xf32>
    %382 = math.exp %381 : vector<8x128xf32>
    %cst_95 = arith.constant 1.000000e+00 : f32
    %383 = vector.broadcast %cst_95 : f32 to vector<8x128xf32>
    %384 = arith.addf %383, %382 : vector<8x128xf32>
    %385 = arith.divf %383, %384 : vector<8x128xf32>
    %386 = arith.mulf %377, %325 : vector<8x128xf32>
    %387 = arith.mulf %371, %379 : vector<8x128xf32>
    %388 = arith.addf %386, %387 : vector<8x128xf32>
    %389 = math.tanh %388 : vector<8x128xf32>
    %390 = arith.mulf %385, %389 : vector<8x128xf32>
    %391 = arith.truncf %390 : vector<8x128xf32> to vector<8x128xbf16>
    %c6_i32 = arith.constant 6 : i32
    %c8_i32_96 = arith.constant 8 : i32
    %392 = arith.muli %c6_i32, %c8_i32_96 : i32
    %393 = tpu.assume_multiple %392, 8 : i32
    %394 = arith.index_cast %393 : i32 to index
    %c0_97 = arith.constant 0 : index
    %395 = vector.load %arg17[%394, %c0_97] : memref<64x512xf32, #tpu.memory_space<vmem>>, vector<8x512xf32>
    %c0_98 = arith.constant 0 : index
    %c0_99 = arith.constant 0 : index
    %396 = vector.load %arg2[%c0_98, %c0_99] : memref<128x512xbf16, #tpu.memory_space<vmem>>, vector<128x512xbf16>
    %cst_100 = arith.constant dense<0.000000e+00> : vector<8x512xf32>
    %397 = tpu.matmul %361, %396, %cst_100 {dimension_numbers = #tpu.dot_dimension_numbers<[1], [0], [0], [1], [0, 0, 1, 1], [], []>} : vector<8x128xbf16>, vector<128x512xbf16>, vector<8x512xf32> -> vector<8x512xf32>
    %398 = arith.addf %395, %397 : vector<8x512xf32>
    %399 = vector.extract_strided_slice %398 {offsets = [0, 0], sizes = [8, 128], strides = [1, 1]} : vector<8x512xf32> to vector<8x128xf32>
    %400 = arith.negf %399 : vector<8x128xf32>
    %401 = math.exp %400 : vector<8x128xf32>
    %cst_101 = arith.constant 1.000000e+00 : f32
    %402 = vector.broadcast %cst_101 : f32 to vector<8x128xf32>
    %403 = arith.addf %402, %401 : vector<8x128xf32>
    %404 = arith.divf %402, %403 : vector<8x128xf32>
    %405 = vector.extract_strided_slice %398 {offsets = [0, 128], sizes = [8, 128], strides = [1, 1]} : vector<8x512xf32> to vector<8x128xf32>
    %406 = arith.negf %405 : vector<8x128xf32>
    %407 = math.exp %406 : vector<8x128xf32>
    %cst_102 = arith.constant 1.000000e+00 : f32
    %408 = vector.broadcast %cst_102 : f32 to vector<8x128xf32>
    %409 = arith.addf %408, %407 : vector<8x128xf32>
    %410 = arith.divf %408, %409 : vector<8x128xf32>
    %411 = vector.extract_strided_slice %398 {offsets = [0, 256], sizes = [8, 128], strides = [1, 1]} : vector<8x512xf32> to vector<8x128xf32>
    %412 = math.tanh %411 : vector<8x128xf32>
    %413 = vector.extract_strided_slice %398 {offsets = [0, 384], sizes = [8, 128], strides = [1, 1]} : vector<8x512xf32> to vector<8x128xf32>
    %414 = arith.negf %413 : vector<8x128xf32>
    %415 = math.exp %414 : vector<8x128xf32>
    %cst_103 = arith.constant 1.000000e+00 : f32
    %416 = vector.broadcast %cst_103 : f32 to vector<8x128xf32>
    %417 = arith.addf %416, %415 : vector<8x128xf32>
    %418 = arith.divf %416, %417 : vector<8x128xf32>
    %419 = arith.mulf %410, %358 : vector<8x128xf32>
    %420 = arith.mulf %404, %412 : vector<8x128xf32>
    %421 = arith.addf %419, %420 : vector<8x128xf32>
    %422 = math.tanh %421 : vector<8x128xf32>
    %423 = arith.mulf %418, %422 : vector<8x128xf32>
    %424 = arith.truncf %423 : vector<8x128xf32> to vector<8x128xbf16>
    %425 = tpu.concatenate %424, %391 in 1 : vector<8x128xbf16>, vector<8x128xbf16> -> vector<8x256xbf16>
    %c0_104 = arith.constant 0 : index
    %c0_105 = arith.constant 0 : index
    %426 = vector.load %arg4[%c0_104, %c0_105] : memref<256x512xbf16, #tpu.memory_space<vmem>>, vector<256x512xbf16>
    %cst_106 = arith.constant dense<0.000000e+00> : vector<8x512xf32>
    %427 = tpu.matmul %425, %426, %cst_106 {dimension_numbers = #tpu.dot_dimension_numbers<[1], [0], [0], [1], [0, 0, 1, 1], [], []>} : vector<8x256xbf16>, vector<256x512xbf16>, vector<8x512xf32> -> vector<8x512xf32>
    %428 = arith.addf %427, %9 : vector<8x512xf32>
    %429 = vector.extract_strided_slice %428 {offsets = [0, 0], sizes = [8, 128], strides = [1, 1]} : vector<8x512xf32> to vector<8x128xf32>
    %430 = arith.negf %429 : vector<8x128xf32>
    %431 = math.exp %430 : vector<8x128xf32>
    %cst_107 = arith.constant 1.000000e+00 : f32
    %432 = vector.broadcast %cst_107 : f32 to vector<8x128xf32>
    %433 = arith.addf %432, %431 : vector<8x128xf32>
    %434 = arith.divf %432, %433 : vector<8x128xf32>
    %435 = vector.extract_strided_slice %428 {offsets = [0, 128], sizes = [8, 128], strides = [1, 1]} : vector<8x512xf32> to vector<8x128xf32>
    %436 = arith.negf %435 : vector<8x128xf32>
    %437 = math.exp %436 : vector<8x128xf32>
    %cst_108 = arith.constant 1.000000e+00 : f32
    %438 = vector.broadcast %cst_108 : f32 to vector<8x128xf32>
    %439 = arith.addf %438, %437 : vector<8x128xf32>
    %440 = arith.divf %438, %439 : vector<8x128xf32>
    %441 = vector.extract_strided_slice %428 {offsets = [0, 256], sizes = [8, 128], strides = [1, 1]} : vector<8x512xf32> to vector<8x128xf32>
    %442 = math.tanh %441 : vector<8x128xf32>
    %443 = vector.extract_strided_slice %428 {offsets = [0, 384], sizes = [8, 128], strides = [1, 1]} : vector<8x512xf32> to vector<8x128xf32>
    %444 = arith.negf %443 : vector<8x128xf32>
    %445 = math.exp %444 : vector<8x128xf32>
    %cst_109 = arith.constant 1.000000e+00 : f32
    %446 = vector.broadcast %cst_109 : f32 to vector<8x128xf32>
    %447 = arith.addf %446, %445 : vector<8x128xf32>
    %448 = arith.divf %446, %447 : vector<8x128xf32>
    %449 = arith.mulf %440, %388 : vector<8x128xf32>
    %450 = arith.mulf %434, %442 : vector<8x128xf32>
    %451 = arith.addf %449, %450 : vector<8x128xf32>
    %452 = math.tanh %451 : vector<8x128xf32>
    %453 = arith.mulf %448, %452 : vector<8x128xf32>
    %454 = arith.truncf %453 : vector<8x128xf32> to vector<8x128xbf16>
    %c7_i32 = arith.constant 7 : i32
    %c8_i32_110 = arith.constant 8 : i32
    %455 = arith.muli %c7_i32, %c8_i32_110 : i32
    %456 = tpu.assume_multiple %455, 8 : i32
    %457 = arith.index_cast %456 : i32 to index
    %c0_111 = arith.constant 0 : index
    %458 = vector.load %arg17[%457, %c0_111] : memref<64x512xf32, #tpu.memory_space<vmem>>, vector<8x512xf32>
    %c0_112 = arith.constant 0 : index
    %c0_113 = arith.constant 0 : index
    %459 = vector.load %arg2[%c0_112, %c0_113] : memref<128x512xbf16, #tpu.memory_space<vmem>>, vector<128x512xbf16>
    %cst_114 = arith.constant dense<0.000000e+00> : vector<8x512xf32>
    %460 = tpu.matmul %424, %459, %cst_114 {dimension_numbers = #tpu.dot_dimension_numbers<[1], [0], [0], [1], [0, 0, 1, 1], [], []>} : vector<8x128xbf16>, vector<128x512xbf16>, vector<8x512xf32> -> vector<8x512xf32>
    %461 = arith.addf %458, %460 : vector<8x512xf32>
    %462 = vector.extract_strided_slice %461 {offsets = [0, 0], sizes = [8, 128], strides = [1, 1]} : vector<8x512xf32> to vector<8x128xf32>
    %463 = arith.negf %462 : vector<8x128xf32>
    %464 = math.exp %463 : vector<8x128xf32>
    %cst_115 = arith.constant 1.000000e+00 : f32
    %465 = vector.broadcast %cst_115 : f32 to vector<8x128xf32>
    %466 = arith.addf %465, %464 : vector<8x128xf32>
    %467 = arith.divf %465, %466 : vector<8x128xf32>
    %468 = vector.extract_strided_slice %461 {offsets = [0, 128], sizes = [8, 128], strides = [1, 1]} : vector<8x512xf32> to vector<8x128xf32>
    %469 = arith.negf %468 : vector<8x128xf32>
    %470 = math.exp %469 : vector<8x128xf32>
    %cst_116 = arith.constant 1.000000e+00 : f32
    %471 = vector.broadcast %cst_116 : f32 to vector<8x128xf32>
    %472 = arith.addf %471, %470 : vector<8x128xf32>
    %473 = arith.divf %471, %472 : vector<8x128xf32>
    %474 = vector.extract_strided_slice %461 {offsets = [0, 256], sizes = [8, 128], strides = [1, 1]} : vector<8x512xf32> to vector<8x128xf32>
    %475 = math.tanh %474 : vector<8x128xf32>
    %476 = vector.extract_strided_slice %461 {offsets = [0, 384], sizes = [8, 128], strides = [1, 1]} : vector<8x512xf32> to vector<8x128xf32>
    %477 = arith.negf %476 : vector<8x128xf32>
    %478 = math.exp %477 : vector<8x128xf32>
    %cst_117 = arith.constant 1.000000e+00 : f32
    %479 = vector.broadcast %cst_117 : f32 to vector<8x128xf32>
    %480 = arith.addf %479, %478 : vector<8x128xf32>
    %481 = arith.divf %479, %480 : vector<8x128xf32>
    %482 = arith.mulf %473, %421 : vector<8x128xf32>
    %483 = arith.mulf %467, %475 : vector<8x128xf32>
    %484 = arith.addf %482, %483 : vector<8x128xf32>
    %485 = math.tanh %484 : vector<8x128xf32>
    %486 = arith.mulf %481, %485 : vector<8x128xf32>
    %487 = arith.truncf %486 : vector<8x128xf32> to vector<8x128xbf16>
    %488 = tpu.concatenate %487, %454 in 1 : vector<8x128xbf16>, vector<8x128xbf16> -> vector<8x256xbf16>
    %c0_118 = arith.constant 0 : index
    %c0_119 = arith.constant 0 : index
    %489 = vector.load %arg4[%c0_118, %c0_119] : memref<256x512xbf16, #tpu.memory_space<vmem>>, vector<256x512xbf16>
    %cst_120 = arith.constant dense<0.000000e+00> : vector<8x512xf32>
    %490 = tpu.matmul %488, %489, %cst_120 {dimension_numbers = #tpu.dot_dimension_numbers<[1], [0], [0], [1], [0, 0, 1, 1], [], []>} : vector<8x256xbf16>, vector<256x512xbf16>, vector<8x512xf32> -> vector<8x512xf32>
    %491 = arith.addf %490, %9 : vector<8x512xf32>
    %492 = vector.extract_strided_slice %491 {offsets = [0, 0], sizes = [8, 128], strides = [1, 1]} : vector<8x512xf32> to vector<8x128xf32>
    %493 = arith.negf %492 : vector<8x128xf32>
    %494 = math.exp %493 : vector<8x128xf32>
    %cst_121 = arith.constant 1.000000e+00 : f32
    %495 = vector.broadcast %cst_121 : f32 to vector<8x128xf32>
    %496 = arith.addf %495, %494 : vector<8x128xf32>
    %497 = arith.divf %495, %496 : vector<8x128xf32>
    %498 = vector.extract_strided_slice %491 {offsets = [0, 128], sizes = [8, 128], strides = [1, 1]} : vector<8x512xf32> to vector<8x128xf32>
    %499 = arith.negf %498 : vector<8x128xf32>
    %500 = math.exp %499 : vector<8x128xf32>
    %cst_122 = arith.constant 1.000000e+00 : f32
    %501 = vector.broadcast %cst_122 : f32 to vector<8x128xf32>
    %502 = arith.addf %501, %500 : vector<8x128xf32>
    %503 = arith.divf %501, %502 : vector<8x128xf32>
    %504 = vector.extract_strided_slice %491 {offsets = [0, 256], sizes = [8, 128], strides = [1, 1]} : vector<8x512xf32> to vector<8x128xf32>
    %505 = math.tanh %504 : vector<8x128xf32>
    %506 = vector.extract_strided_slice %491 {offsets = [0, 384], sizes = [8, 128], strides = [1, 1]} : vector<8x512xf32> to vector<8x128xf32>
    %507 = arith.negf %506 : vector<8x128xf32>
    %508 = math.exp %507 : vector<8x128xf32>
    %cst_123 = arith.constant 1.000000e+00 : f32
    %509 = vector.broadcast %cst_123 : f32 to vector<8x128xf32>
    %510 = arith.addf %509, %508 : vector<8x128xf32>
    %511 = arith.divf %509, %510 : vector<8x128xf32>
    %512 = arith.mulf %503, %451 : vector<8x128xf32>
    %513 = arith.mulf %497, %505 : vector<8x128xf32>
    %514 = arith.addf %512, %513 : vector<8x128xf32>
    %515 = math.tanh %514 : vector<8x128xf32>
    %516 = arith.mulf %511, %515 : vector<8x128xf32>
    %517 = arith.truncf %516 : vector<8x128xf32> to vector<8x128xbf16>
    %c8_i32_124 = arith.constant 8 : i32
    %518 = arith.extf %487 : vector<8x128xbf16> to vector<8x128xf32>
    %c0_125 = arith.constant 0 : index
    %c0_126 = arith.constant 0 : index
    %c0_127 = arith.constant 0 : index
    %519 = vector.load %arg13[%c0_125, %c0_126, %c0_127] : memref<2x8x128xf32, #tpu.memory_space<vmem>>, vector<1x8x128xf32>
    %520 = vector.shape_cast %519 : vector<1x8x128xf32> to vector<8x128xf32>
    %521 = vector.shape_cast %518 : vector<8x128xf32> to vector<1x8x128xf32>
    tpu.vector_store %arg13[%c0_125, %c0_126, %c0_127], %521 {strides = array<i32>} : memref<2x8x128xf32, #tpu.memory_space<vmem>>, vector<1x8x128xf32>,
    %522 = arith.extf %517 : vector<8x128xbf16> to vector<8x128xf32>
    %c1 = arith.constant 1 : index
    %c0_128 = arith.constant 0 : index
    %c0_129 = arith.constant 0 : index
    %523 = vector.load %arg13[%c1, %c0_128, %c0_129] : memref<2x8x128xf32, #tpu.memory_space<vmem>>, vector<1x8x128xf32>
    %524 = vector.shape_cast %523 : vector<1x8x128xf32> to vector<8x128xf32>
    %525 = vector.shape_cast %522 : vector<8x128xf32> to vector<1x8x128xf32>
    tpu.vector_store %arg13[%c1, %c0_128, %c0_129], %525 {strides = array<i32>} : memref<2x8x128xf32, #tpu.memory_space<vmem>>, vector<1x8x128xf32>,
    %c0_130 = arith.constant 0 : index
    %c0_131 = arith.constant 0 : index
    %c0_132 = arith.constant 0 : index
    %526 = vector.load %arg14[%c0_130, %c0_131, %c0_132] : memref<2x8x128xf32, #tpu.memory_space<vmem>>, vector<1x8x128xf32>
    %527 = vector.shape_cast %526 : vector<1x8x128xf32> to vector<8x128xf32>
    %528 = vector.shape_cast %484 : vector<8x128xf32> to vector<1x8x128xf32>
    tpu.vector_store %arg14[%c0_130, %c0_131, %c0_132], %528 {strides = array<i32>} : memref<2x8x128xf32, #tpu.memory_space<vmem>>, vector<1x8x128xf32>,
    %c1_133 = arith.constant 1 : index
    %c0_134 = arith.constant 0 : index
    %c0_135 = arith.constant 0 : index
    %529 = vector.load %arg14[%c1_133, %c0_134, %c0_135] : memref<2x8x128xf32, #tpu.memory_space<vmem>>, vector<1x8x128xf32>
    %530 = vector.shape_cast %529 : vector<1x8x128xf32> to vector<8x128xf32>
    %531 = vector.shape_cast %514 : vector<8x128xf32> to vector<1x8x128xf32>
    tpu.vector_store %arg14[%c1_133, %c0_134, %c0_135], %531 {strides = array<i32>} : memref<2x8x128xf32, #tpu.memory_space<vmem>>, vector<1x8x128xf32>,
    %c0_136 = arith.constant 0 : index
    %c0_137 = arith.constant 0 : index
    %532 = vector.load %arg6[%c0_136, %c0_137] : memref<128x128xbf16, #tpu.memory_space<vmem>>, vector<128x128xbf16>
    %cst_138 = arith.constant dense<0.000000e+00> : vector<8x128xf32>
    %533 = tpu.matmul %487, %532, %cst_138 {dimension_numbers = #tpu.dot_dimension_numbers<[1], [0], [0], [1], [0, 0, 1, 1], [], []>} : vector<8x128xbf16>, vector<128x128xbf16>, vector<8x128xf32> -> vector<8x128xf32>
    %534 = arith.truncf %484 : vector<8x128xf32> to vector<8x128xbf16>
    %c0_139 = arith.constant 0 : index
    %c0_140 = arith.constant 0 : index
    %535 = vector.load %arg7[%c0_139, %c0_140] : memref<128x128xbf16, #tpu.memory_space<vmem>>, vector<128x128xbf16>
    %cst_141 = arith.constant dense<0.000000e+00> : vector<8x128xf32>
    %536 = tpu.matmul %534, %535, %cst_141 {dimension_numbers = #tpu.dot_dimension_numbers<[1], [0], [0], [1], [0, 0, 1, 1], [], []>} : vector<8x128xbf16>, vector<128x128xbf16>, vector<8x128xf32> -> vector<8x128xf32>
    %537 = arith.addf %533, %536 : vector<8x128xf32>
    %c0_142 = arith.constant 0 : index
    %c0_143 = arith.constant 0 : index
    %538 = vector.load %arg8[%c0_142, %c0_143] : memref<128x128xbf16, #tpu.memory_space<vmem>>, vector<128x128xbf16>
    %cst_144 = arith.constant dense<0.000000e+00> : vector<8x128xf32>
    %539 = tpu.matmul %517, %538, %cst_144 {dimension_numbers = #tpu.dot_dimension_numbers<[1], [0], [0], [1], [0, 0, 1, 1], [], []>} : vector<8x128xbf16>, vector<128x128xbf16>, vector<8x128xf32> -> vector<8x128xf32>
    %540 = arith.addf %537, %539 : vector<8x128xf32>
    %541 = arith.truncf %514 : vector<8x128xf32> to vector<8x128xbf16>
    %c0_145 = arith.constant 0 : index
    %c0_146 = arith.constant 0 : index
    %542 = vector.load %arg9[%c0_145, %c0_146] : memref<128x128xbf16, #tpu.memory_space<vmem>>, vector<128x128xbf16>
    %cst_147 = arith.constant dense<0.000000e+00> : vector<8x128xf32>
    %543 = tpu.matmul %541, %542, %cst_147 {dimension_numbers = #tpu.dot_dimension_numbers<[1], [0], [0], [1], [0, 0, 1, 1], [], []>} : vector<8x128xbf16>, vector<128x128xbf16>, vector<8x128xf32> -> vector<8x128xf32>
    %544 = arith.addf %540, %543 : vector<8x128xf32>
    %c0_148 = arith.constant 0 : index
    %c0_149 = arith.constant 0 : index
    %545 = vector.load %arg10[%c0_148, %c0_149] : memref<1x128xf32, #tpu.memory_space<vmem>>, vector<1x128xf32>
    %546 = vector.broadcast %545 : vector<1x128xf32> to vector<8x128xf32>
    %547 = arith.addf %544, %546 : vector<8x128xf32>
    %548 = math.tanh %547 : vector<8x128xf32>
    %c0_150 = arith.constant 0 : index
    %c0_151 = arith.constant 0 : index
    %549 = vector.load %arg15[%c0_150, %c0_151] : memref<8x128xf32, #tpu.memory_space<vmem>>, vector<8x128xf32>
    tpu.vector_store %arg15[%c0_150, %c0_151], %548 {strides = array<i32>} : memref<8x128xf32, #tpu.memory_space<vmem>>, vector<8x128xf32>,
    %550 = arith.truncf %548 : vector<8x128xf32> to vector<8x128xbf16>
    %c0_152 = arith.constant 0 : index
    %c0_153 = arith.constant 0 : index
    %551 = vector.load %arg11[%c0_152, %c0_153] : memref<128x128xbf16, #tpu.memory_space<vmem>>, vector<128x128xbf16>
    %cst_154 = arith.constant dense<0.000000e+00> : vector<8x128xf32>
    %552 = tpu.matmul %550, %551, %cst_154 {dimension_numbers = #tpu.dot_dimension_numbers<[1], [0], [0], [1], [0, 0, 1, 1], [], []>} : vector<8x128xbf16>, vector<128x128xbf16>, vector<8x128xf32> -> vector<8x128xf32>
    %c0_155 = arith.constant 0 : index
    %c0_156 = arith.constant 0 : index
    %553 = vector.load %arg12[%c0_155, %c0_156] : memref<1x128xf32, #tpu.memory_space<vmem>>, vector<1x128xf32>
    %554 = vector.broadcast %553 : vector<1x128xf32> to vector<8x128xf32>
    %555 = arith.addf %552, %554 : vector<8x128xf32>
    %c0_157 = arith.constant 0 : index
    %c0_158 = arith.constant 0 : index
    %556 = vector.load %arg16[%c0_157, %c0_158] : memref<8x128xf32, #tpu.memory_space<vmem>>, vector<8x128xf32>
    tpu.vector_store %arg16[%c0_157, %c0_158], %555 {strides = array<i32>} : memref<8x128xf32, #tpu.memory_space<vmem>>, vector<8x128xf32>,
    return
  }
}

</mosaic_0001>

<bundles_post_ra>
// kernel: tpu_custom_call.1
= control target key start
LH: loop header
LB: loop body
LE: loop exit
PB: predicated region body
PF: predicated region fallthrough
CT: control target
= control target key end

     0   :  { %s6941_s0 = inlined_call_operand.vmem [shape: bf16[64,16], index: 0, kind: input, shape index: {}]   ;;  %s6942_s1 = inlined_call_operand.vmem [shape: bf16[16,512], index: 1, kind: input, shape index: {}]   ;;  %s6943_s2 = inlined_call_operand.hbm [shape: bf16[128,512], index: 2, kind: input, shape index: {}]   ;;  %s6944_s3 = inlined_call_operand.vmem [shape: f32[1,512], index: 3, kind: input, shape index: {}]   ;;  %s6945_s4 = inlined_call_operand.hbm [shape: bf16[256,512], index: 4, kind: input, shape index: {}]   ;;  %s6946_s5 = inlined_call_operand.vmem [shape: f32[1,512], index: 5, kind: input, shape index: {}]   ;;  %s6947_s6 = inlined_call_operand.hbm [shape: bf16[128,128], index: 6, kind: input, shape index: {}]   ;;  %s6948_s7 = inlined_call_operand.hbm [shape: bf16[128,128], index: 7, kind: input, shape index: {}]   ;;  %s6949_s8 = inlined_call_operand.hbm [shape: bf16[128,128], index: 8, kind: input, shape index: {}]   ;;  %s6950_s9 = inlined_call_operand.hbm [shape: bf16[128,128], index: 9, kind: input, shape index: {}]   ;;  %s6951_s10 = inlined_call_operand.vmem [shape: f32[1,128], index: 10, kind: input, shape index: {}]   ;;  %s6952_s11 = inlined_call_operand.hbm [shape: bf16[128,128], index: 11, kind: input, shape index: {}]   ;;  %s6953_s12 = inlined_call_operand.vmem [shape: f32[1,128], index: 12, kind: input, shape index: {}]   ;;  %s6954_s13 = inlined_call_operand.hbm [shape: f32[2,8,128], index: 13, kind: output, shape index: {0}]   ;;  %s6955_s14 = inlined_call_operand.hbm [shape: f32[2,8,128], index: 14, kind: output, shape index: {1}]   ;;  %s6956_s15 = inlined_call_operand.hbm [shape: f32[8,128], index: 15, kind: output, shape index: {2}]   ;;  %s6957_s16 = inlined_call_operand.hbm [shape: f32[8,128], index: 16, kind: output, shape index: {3}]  }
   0x1   :  { %7151 = sst [smem:[#allocation143_spill]] %s6941_s0 }
   0x2   :  { %22 = vsyncpa [#allocation4], 0 }
   0x3   :  { %23 = vsyncpa [#allocation7], 0 }
   0x4   :  { %24 = vsyncpa [#allocation10], 0 }
   0x5   :  { %25 = vsyncpa [#allocation13], 0 }
   0x6   :  { %26 = vsyncpa [#allocation5], 0 }
   0x7   :  { %27 = vsyncpa [#allocation17], 0 }
   0x8   :  { %28 = vsyncpa [#allocation20], 0  ;;  %s52_s23 = sshll.u32 %s6945_s4, 4  ;;  %s5159_s24 = smov [#allocation6]   ;;  %s53_s23 = int_to_ptr.hbm [resolvable:$true] %s52_s23 }
   0x9   :  { %s54_s25 = sshll.u32 %s5159_s24, 4  ;;  %s5160_s26 = smov 256   ;;  %s55_s25 = int_to_ptr.vmem [resolvable:$true] %s54_s25 }
   0xa   :  { %s5161_s27 = smov 16   ;;  %s80_s30 = sshll.u32 %s6948_s7, 4  ;;  %s81_s30 = int_to_ptr.hbm [resolvable:$true] %s80_s30 }
   0xb   :  { %60 = dma.hbm_to_vmem [thread:$0]  %s53_s23, 8192, %s55_s25, [#allocation7], %s5160_s26, %s5160_s26, %s5161_s27  }
   0xc   :  { %s5162_s0 = smov [#allocation9]   ;;  %s106_s20 = sshll.u32 %s6950_s9, 4  ;;  %s107_s20 = int_to_ptr.hbm [resolvable:$true] %s106_s20 }
   0xd   :  { %s82_s17 = sshll.u32 %s5162_s0, 4  ;;  %s5163_s4 = smov 64   ;;  %s83_s17 = int_to_ptr.vmem [resolvable:$true] %s82_s17 }
   0xe   :  { %s5164_s21 = smov 4   ;;  %s37_s24 = sshll.u32 %s6943_s2, 4  ;;  %s38_s24 = int_to_ptr.hbm [resolvable:$true] %s37_s24 }
   0xf   :  { %88 = dma.hbm_to_vmem [thread:$0]  %s81_s30, 1024, %s83_s17, [#allocation10], %s5163_s4, %s5163_s4, %s5164_s21  }
  0x10   :  { %s5165_s7 = smov [#allocation12]   ;;  %s5166_s9 = smov [#allocation3]  }
  0x11   :  { %s108_s25 = sshll.u32 %s5165_s7, 4  ;;  %s39_s28 = sshll.u32 %s5166_s9, 4  ;;  %s109_s25 = int_to_ptr.vmem [resolvable:$true] %s108_s25  ;;  %s40_s28 = int_to_ptr.vmem [resolvable:$true] %s39_s28 }
  0x12   :  { %114 = dma.hbm_to_vmem [thread:$0]  %s107_s20, 1024, %s109_s25, [#allocation13], %s5163_s4, %s5163_s4, %s5164_s21  }
  0x13   :  { %s67_s18 = sshll.u32 %s6947_s6, 4  ;;  %s93_s2 = sshll.u32 %s6949_s8, 4  ;;  %s68_s18 = int_to_ptr.hbm [resolvable:$true] %s67_s18  ;;  %s94_s2 = int_to_ptr.hbm [resolvable:$true] %s93_s2 }
  0x14   :  { %45 = dma.hbm_to_vmem [thread:$0]  %s38_s24, 4096, %s40_s28, [#allocation4], %s5160_s26, %s5160_s26, %s5161_s27  }
  0x15   :  { %s5167_s19 = smov [#allocation8]   ;;  %s5168_s20 = smov [#allocation11]  }
  0x16   :  { %s69_s22 = sshll.u32 %s5167_s19, 4  ;;  %s95_s23 = sshll.u32 %s5168_s20, 4  ;;  %s70_s22 = int_to_ptr.vmem [resolvable:$true] %s69_s22  ;;  %s96_s23 = int_to_ptr.vmem [resolvable:$true] %s95_s23 }
  0x17   :  { %75 = dma.hbm_to_vmem [thread:$0]  %s68_s18, 1024, %s70_s22, [#allocation7], %s5163_s4, %s5163_s4, %s5164_s21  }
  0x18   :  { %s121_s6 = sshll.u32 %s6952_s11, 4  ;;  %s5169_s8 = smov [#allocation14]   ;;  %s122_s6 = int_to_ptr.hbm [resolvable:$true] %s121_s6 }
  0x19   :  { %101 = dma.hbm_to_vmem [thread:$0]  %s94_s2, 1024, %s96_s23, [#allocation10], %s5163_s4, %s5163_s4, %s5164_s21  }
  0x1a   :  { %s123_s26 = sshll.u32 %s5169_s8, 4  ;;  %s124_s26 = int_to_ptr.vmem [resolvable:$true] %s123_s26 }
  0x1b   :  { %129 = dma.hbm_to_vmem [thread:$0]  %s122_s6, 1024, %s124_s26, [#allocation13], %s5163_s4, %s5163_s4, %s5164_s21  }
  0x1c   :  { %5145 = dma.done.wait [#allocation4], 4096  }
  0x1d   :  { %5146 = vsyncadd [#allocation4], 4294963200 }
  0x1e   :  { %5147 = dma.done.wait [#allocation7], 9216  }
  0x1f   :  { %5148 = vsyncadd [#allocation7], 4294958080 }
  0x20   :  { %5149 = dma.done.wait [#allocation10], 2048  }
  0x21   :  { %5150 = vsyncadd [#allocation10], 4294965248 }
  0x22   :  { %5151 = dma.done.wait [#allocation13], 2048  }
  0x23   :  { %5152 = vsyncadd [#allocation13], 4294965248  ;;  %v3836_v0 = vld [vmem:[%s6942_s1] sm:$0xf]  ;;  %v4464_v1 = vld [vmem:[%s6942_s1 + $0xc] sm:$0xf0] }
  0x24   :  { %v3844_v2 = vld [vmem:[%s6942_s1 + $0x8] sm:$0xf]  ;;  %v3837_v3 = vor.u32 %v4464_v1, %v3836_v0  ;;  %v4465_v4 = vld [vmem:[%s6942_s1 + $0x14] sm:$0xf0]  ;;  %v4463_v5 = vld [vmem:[%s6942_s1 + $0xc] sm:$0xf] }
  0x25   :  { %v3846_v6 = vld [vmem:[%s6942_s1 + $0x18] sm:$0xf0]  ;;  %v3845_v7 = vor.u32 %v4465_v4, %v3844_v2  ;;  %s7152_s22 = sld [smem:[#allocation143_spill]]  ;;  %v4462_v11 = vld [vmem:[%s6942_s1 + $0x4] sm:$0xf]  ;;  %vm223_vm0 = vcmask 130048  }
  0x26   :  { %v3849_v8 = vor.u32 %v4463_v5, %v3846_v6  ;;  %243 = vmatpush.bf16.msra.mxu0 %v3837_v3  ;;  %4602 = vmatpush.bf16.msra.mxu1 %v3837_v3  ;;  %v3838_v12 = vld [vmem:[%s6942_s1 + $0x10] sm:$0xf0]  ;;  %v4494_v13 = vld [vmem:[#allocation3 + $0xe4] sm:$0xf]  ;;  %v3980_v16 = vld [vmem:[#allocation3 + $0xe0] sm:$0xf] }
  0x27   :  { %301 = vmatpush.bf16.msra.mxu2 %v3845_v7  ;;  %v3841_v14 = vor.u32 %v4462_v11, %v3838_v12  ;;  %v3982_v15 = vld [vmem:[#allocation3 + $0xf0] sm:$0xf0]  ;;  %v4496_v17 = vld [vmem:[#allocation3 + $0xec] sm:$0xf0]  ;;  %v3964_v20 = vld [vmem:[#allocation3 + $0xc0] sm:$0xf] }
  0x28   :  { %330 = vmatpush.bf16.msra.mxu3 %v3849_v8  ;;  %v5332_v18 = vor.u32 %v4494_v13, %v3982_v15  ;;  %v5334_v19 = vor.u32 %v4496_v17, %v3980_v16  ;;  %v4492_v21 = vld [vmem:[#allocation3 + $0xcc] sm:$0xf0]  ;;  %v4495_v22 = vld [vmem:[#allocation3 + $0xec] sm:$0xf]  ;;  %v3990_v23 = vld [vmem:[#allocation3 + $0xf8] sm:$0xf0] }
  0x29   :  { %v4490_v24 = vld [vmem:[#allocation3 + $0xc4] sm:$0xf]  ;;  %v3966_v25 = vld [vmem:[#allocation3 + $0xd0] sm:$0xf0]  ;;  %v5342_v26 = vor.u32 %v4495_v22, %v3990_v23  ;;  %v4491_v28 = vld [vmem:[#allocation3 + $0xcc] sm:$0xf]  ;;  %v5350_v30 = vor.u32 %v4492_v21, %v3964_v20 }
  0x2a   :  { %7153 = vst [vmem:[#allocation28_spill] sm:$0xff] %v5332_v18  ;;  %272 = vmatpush.bf16.msrb.mxu1 %v3841_v14  ;;  %v5347_v27 = vor.u32 %v4490_v24, %v3966_v25  ;;  %v3974_v29 = vld [vmem:[#allocation3 + $0xd8] sm:$0xf0]  ;;  %593 = vmatpush.bf16.msrb.mxu0 %v5334_v19  ;;  %v3948_v31 = vld [vmem:[#allocation3 + $0xa0] sm:$0xf]  ;;  %s3759_s0 = sshll.u32 %s6955_s14, 4  ;;  %s3760_s0 = int_to_ptr.hbm [resolvable:$true] %s3759_s0 }
  0x2b   :  { %v5319_v9 = vld [vmem:[%s7152_s22] sm:$0xff]  ;;  %v5324_v10 = vld [vmem:[%s7152_s22 + $0x18] sm:$0xff]  ;;  %7154 = vst [vmem:[#allocation29_spill] sm:$0xff] %v5342_v26  ;;  %v5353_v32 = vor.u32 %v4491_v28, %v3974_v29  ;;  %v3988_v33 = vld [vmem:[#allocation3 + $0xe8] sm:$0xf]  ;;  %s5171_s18 = smov [#allocation16]  }
  0x2c   :  { %3850 = vmatmul.msk.bf16.vlgmr.msra.gmra.mxu0 %vm223_vm0, %v5319_v9  ;;  %3853 = vmatmul.msk.bf16.vlgmr.msra.gmra.mxu1 %vm223_vm0, %v5324_v10  ;;  %v4497_v34 = vld [vmem:[#allocation3 + $0xf4] sm:$0xf0]  ;;  %v4488_v35 = vld [vmem:[#allocation3 + $0xac] sm:$0xf0]  ;;  %v4486_v37 = vld [vmem:[#allocation3 + $0xa4] sm:$0xf] }
  0x2d   :  { %3858 = vmatmul.msk.bf16.vlgmr.msra.gmra.mxu2 %vm223_vm0, %v5319_v9  ;;  %3862 = vmatmul.msk.bf16.vlgmr.msra.gmra.mxu3 %vm223_vm0, %v5319_v9  ;;  %7155 = vst [vmem:[#allocation30_spill] sm:$0xff] %v5353_v32  ;;  %v5355_v36 = vor.u32 %v4497_v34, %v3988_v33  ;;  %v3950_v38 = vld [vmem:[#allocation3 + $0xb0] sm:$0xf0]  ;;  %v3972_v40 = vld [vmem:[#allocation3 + $0xc8] sm:$0xf]  ;;  %v5362_v43 = vor.u32 %v4488_v35, %v3948_v31  ;;  %s3757_s30 = sshll.u32 %s5171_s18, 4  ;;  %s3758_s30 = int_to_ptr.vmem [resolvable:$true] %s3757_s30 }
  0x2e   :  { %606 = vmatpush.bf16.msra.mxu1 %v5332_v18  ;;  %632 = vmatpush.bf16.msrb.mxu3 %v5342_v26  ;;  %v5359_v39 = vor.u32 %v4486_v37, %v3950_v38  ;;  %v4493_v41 = vld [vmem:[#allocation3 + $0xd4] sm:$0xf0]  ;;  %v4487_v42 = vld [vmem:[#allocation3 + $0xac] sm:$0xf]  ;;  %v3958_v45 = vld [vmem:[#allocation3 + $0xb8] sm:$0xf0] }
  0x2f   :  { %619 = vmatpush.bf16.msrb.mxu2 %v5355_v36  ;;  %594 = vmatpush.bf16.msrb.mxu0 %v5350_v30  ;;  %7156 = vst [vmem:[#allocation31_spill] sm:$0xff] %v5362_v43  ;;  %v5365_v44 = vor.u32 %v4493_v41, %v3972_v40  ;;  %v4482_v46 = vld [vmem:[#allocation3 + $0x84] sm:$0xf]  ;;  %v3934_v47 = vld [vmem:[#allocation3 + $0x90] sm:$0xf0]  ;;  %v5367_v50 = vor.u32 %v4487_v42, %v3958_v45  ;;  %v5382_v60 = vld [vmem:[%s7152_s22 + $0x8] sm:$0xff] }
  0x30   :  { %v3932_v48 = vld [vmem:[#allocation3 + $0x80] sm:$0xf]  ;;  %v4484_v49 = vld [vmem:[#allocation3 + $0x8c] sm:$0xf0]  ;;  %v3956_v51 = vld [vmem:[#allocation3 + $0xa8] sm:$0xf]  ;;  %v5371_v53 = vor.u32 %v4482_v46, %v3934_v47 }
  0x31   :  { %v4489_v52 = vld [vmem:[#allocation3 + $0xb4] sm:$0xf0]  ;;  %v3940_v55 = vld [vmem:[#allocation3 + $0x88] sm:$0xf]  ;;  %v4483_v57 = vld [vmem:[#allocation3 + $0x8c] sm:$0xf]  ;;  %v5376_v58 = vor.u32 %v4484_v49, %v3932_v48 }
  0x32   :  { %607 = vmatpush.bf16.msra.mxu1 %v5347_v27  ;;  %633 = vmatpush.bf16.msrb.mxu3 %v5353_v32  ;;  %v5373_v54 = vor.u32 %v4489_v52, %v3956_v51  ;;  %v4485_v56 = vld [vmem:[#allocation3 + $0x94] sm:$0xf0]  ;;  %v3942_v59 = vld [vmem:[#allocation3 + $0x98] sm:$0xf0]  ;;  %v3916_v61 = vld [vmem:[#allocation3 + $0x60] sm:$0xf] }
  0x33   :  { %620 = vmatpush.bf16.msrb.mxu2 %v5365_v44  ;;  %595 = vmatpush.bf16.msrb.mxu0 %v5362_v43  ;;  %7158 = vst [vmem:[#allocation33_spill] sm:$0xff] %v5376_v58  ;;  %v4480_v62 = vld [vmem:[#allocation3 + $0x6c] sm:$0xf0]  ;;  %v5384_v63 = vor.u32 %v4483_v57, %v3942_v59  ;;  %v5388_v0 = vor.u32 %v4485_v56, %v3940_v55  ;;  %v3900_v2 = vld [vmem:[#allocation3 + $0x40] sm:$0xf]  ;;  %s5172_s17 = smov 128  }
  0x34   :  { %7157 = vst [vmem:[#allocation32_spill] sm:$0xff] %v5373_v54  ;;  %v5391_v1 = vor.u32 %v4480_v62, %v3916_v61  ;;  %v4476_v3 = vld [vmem:[#allocation3 + $0x4c] sm:$0xf0]  ;;  %v3924_v4 = vld [vmem:[#allocation3 + $0x68] sm:$0xf]  ;;  %s5173_s2 = smov 8  }
  0x35   :  { %7159 = vst [vmem:[#allocation34_spill] sm:$0xff] %v5388_v0  ;;  %v4481_v5 = vld [vmem:[#allocation3 + $0x74] sm:$0xf0]  ;;  %v4479_v6 = vld [vmem:[#allocation3 + $0x6c] sm:$0xf]  ;;  %v5408_v15 = vor.u32 %v4476_v3, %v3900_v2  ;;  %v4460_v51 = vld [vmem:[%s7152_s22 + $0x10] sm:$0xff] }
  0x36   :  { %608 = vmatpush.bf16.msra.mxu1 %v5359_v39  ;;  %634 = vmatpush.bf16.msrb.mxu3 %v5367_v50  ;;  %7160 = vst [vmem:[#allocation35_spill] sm:$0xff] %v5391_v1  ;;  %v3926_v7 = vld [vmem:[#allocation3 + $0x78] sm:$0xf0]  ;;  %v3884_v8 = vld [vmem:[#allocation3 + $0x20] sm:$0xf]  ;;  %v5403_v13 = vor.u32 %v4481_v5, %v3924_v4  ;;  %s3746_s23 = sshll.u32 %s6954_s13, 4  ;;  %s3747_s23 = int_to_ptr.hbm [resolvable:$true] %s3746_s23 }
  0x37   :  { %621 = vmatpush.bf16.msrb.mxu2 %v5373_v54  ;;  %596 = vmatpush.bf16.msrb.mxu0 %v5376_v58  ;;  %v4478_v11 = vld [vmem:[#allocation3 + $0x64] sm:$0xf]  ;;  %v3918_v12 = vld [vmem:[#allocation3 + $0x70] sm:$0xf0]  ;;  %v5405_v14 = vor.u32 %v4479_v6, %v3926_v7  ;;  %7163 = vst [vmem:[#allocation38_spill] sm:$0xff] %v5408_v15  ;;  %s3773_s14 = sshll.u32 %s6956_s15, 4  ;;  %s3774_s14 = int_to_ptr.hbm [resolvable:$true] %s3773_s14 }
  0x38   :  { %7161 = vst [vmem:[#allocation36_spill] sm:$0xff] %v5403_v13  ;;  %v5410_v16 = vor.u32 %v4478_v11, %v3918_v12  ;;  %v4477_v17 = vld [vmem:[#allocation3 + $0x54] sm:$0xf0]  ;;  %v4475_v20 = vld [vmem:[#allocation3 + $0x4c] sm:$0xf]  ;;  %s5175_s6 = smov [#allocation18]  }
  0x39   :  { %7162 = vst [vmem:[#allocation37_spill] sm:$0xff] %v5405_v14  ;;  %v3910_v21 = vld [vmem:[#allocation3 + $0x58] sm:$0xf0]  ;;  %v4472_v22 = vld [vmem:[#allocation3 + $0x2c] sm:$0xf0]  ;;  %s3771_s8 = sshll.u32 %s5175_s6, 4  ;;  %s3772_s8 = int_to_ptr.vmem [resolvable:$true] %s3771_s8 }
  0x3a   :  { %609 = vmatpush.bf16.msra.mxu1 %v5371_v53  ;;  %635 = vmatpush.bf16.msrb.mxu3 %v5384_v63  ;;  %v5413_v23 = vor.u32 %v4475_v20, %v3910_v21  ;;  %v4474_v24 = vld [vmem:[#allocation3 + $0x44] sm:$0xf]  ;;  %v3902_v25 = vld [vmem:[#allocation3 + $0x50] sm:$0xf0]  ;;  %v4471_v29 = vld [vmem:[#allocation3 + $0x2c] sm:$0xf]  ;;  %v5422_v34 = vor.u32 %v4472_v22, %v3884_v8 }
  0x3b   :  { %622 = vmatpush.bf16.msrb.mxu2 %v5388_v0  ;;  %597 = vmatpush.bf16.msrb.mxu0 %v5391_v1  ;;  %v5416_v28 = vor.u32 %v4474_v24, %v3902_v25  ;;  %v3894_v31 = vld [vmem:[#allocation3 + $0x38] sm:$0xf0]  ;;  %v3892_v35 = vld [vmem:[#allocation3 + $0x28] sm:$0xf]  ;;  %v4473_v37 = vld [vmem:[#allocation3 + $0x34] sm:$0xf0] }
  0x3c   :  { %3851 = vmatmul.msk.bf16.gmra.mxu0 %vm223_vm0, %v5382_v60  ;;  %3854 = vmatmul.msk.bf16.vlgmr.msrb.gmra.mxu1 %vm223_vm0, %v5319_v9  ;;  %v3908_v9 = vld [vmem:[#allocation3 + $0x48] sm:$0xf]  ;;  %7164 = vst [vmem:[#allocation39_spill] sm:$0xff] %v5413_v23  ;;  %v3868_v38 = vld [vmem:[#allocation3] sm:$0xf]  ;;  %v5425_v41 = vor.u32 %v4471_v29, %v3894_v31  ;;  %v5429_v42 = vor.u32 %v4473_v37, %v3892_v35  ;;  %s5176_s11 = smov [#allocation19]  }
  0x3d   :  { %3859 = vmatmul.msk.bf16.gmra.mxu2 %vm223_vm0, %v5382_v60  ;;  %3863 = vmatmul.msk.bf16.gmra.mxu3 %vm223_vm0, %v5382_v60  ;;  %7165 = vst [vmem:[#allocation40_spill] sm:$0xff] %v5416_v28  ;;  %v5419_v33 = vor.u32 %v4477_v17, %v3908_v9  ;;  %v4468_v40 = vld [vmem:[#allocation3 + $0xc] sm:$0xf0]  ;;  %v4467_v45 = vld [vmem:[#allocation3 + $0xc] sm:$0xf]  ;;  %s3782_s27 = sshll.u32 %s5176_s11, 4  ;;  %s3783_s27 = int_to_ptr.vmem [resolvable:$true] %s3782_s27 }
  0x3e   :  { %636 = vmatpush.bf16.msrb.mxu3 %v5405_v14  ;;  %610 = vmatpush.bf16.msra.mxu1 %v5410_v16  ;;  %7167 = vst [vmem:[#allocation42_spill] sm:$0xff] %v5422_v34  ;;  %v3878_v46 = vld [vmem:[#allocation3 + $0x18] sm:$0xf0]  ;;  %v5432_v47 = vor.u32 %v4468_v40, %v3868_v38  ;;  %v3876_v48 = vld [vmem:[#allocation3 + $0x8] sm:$0xf]  ;;  %s3784_s9 = sshll.u32 %s6957_s16, 4  ;;  %s3785_s9 = int_to_ptr.hbm [resolvable:$true] %s3784_s9 }
  0x3f   :  { %623 = vmatpush.bf16.msrb.mxu2 %v5403_v13  ;;  %7166 = vst [vmem:[#allocation41_spill] sm:$0xff] %v5419_v33  ;;  %598 = vmatpush.bf16.msrb.mxu0 %v5408_v15  ;;  %v4469_v49 = vld [vmem:[#allocation3 + $0x14] sm:$0xf0]  ;;  %v5438_v52 = vor.u32 %v4467_v45, %v3878_v46  ;;  %v4470_v56 = vld [vmem:[#allocation3 + $0x24] sm:$0xf] }
  0x40   :  { %7168 = vst [vmem:[#allocation43_spill] sm:$0xff] %v5429_v42  ;;  %v5441_v55 = vor.u32 %v4469_v49, %v3876_v48  ;;  %v3886_v57 = vld [vmem:[#allocation3 + $0x30] sm:$0xf0]  ;;  %v4466_v61 = vld [vmem:[#allocation3 + $0x4] sm:$0xf] }
  0x41   :  { %7169 = vst [vmem:[#allocation44_spill] sm:$0xff] %v5432_v47  ;;  %v5449_v59 = vor.u32 %v4470_v56, %v3886_v57  ;;  %v3870_v62 = vld [vmem:[#allocation3 + $0x10] sm:$0xf0]  ;;  %v5471_v3 = vld [vmem:[%s6944_s3] sm:$0xf] }
  0x42   :  { %637 = vmatpush.bf16.msrb.mxu3 %v5413_v23  ;;  %611 = vmatpush.bf16.msra.mxu1 %v5416_v28  ;;  %7170 = vst [vmem:[#allocation45_spill] sm:$0xff] %v5441_v55  ;;  %v5454_v2 = vor.u32 %v4466_v61, %v3870_v62  ;;  %v5474_v4 = vperm.slane %v5471_v3, 0  ;;  %v4560_v8 = vld [vmem:[#allocation6 + $0x1ec] sm:$0xf0]  ;;  %v4558_v11 = vld [vmem:[#allocation6 + $0x1e4] sm:$0xf] }
  0x43   :  { %624 = vmatpush.bf16.msrb.mxu2 %v5419_v33  ;;  %599 = vmatpush.bf16.msrb.mxu0 %v5422_v34  ;;  %7171 = vst [vmem:[#allocation46_spill] sm:$0xff] %v5449_v59  ;;  %v4241_v9 = vld [vmem:[#allocation6 + $0x1f0] sm:$0xf0]  ;;  %v4223_v24 = vld [vmem:[#allocation6 + $0x1c0] sm:$0xf] }
  0x44   :  { %7172 = vst [vmem:[#allocation47_spill] sm:$0xff] %v5474_v4  ;;  %v5483_v17 = vor.u32 %v4558_v11, %v4241_v9  ;;  %v4556_v25 = vld [vmem:[#allocation6 + $0x1cc] sm:$0xf0]  ;;  %v4554_v29 = vld [vmem:[#allocation6 + $0x1c4] sm:$0xf] }
  0x45   :  { %v5495_v35 = vor.u32 %v4556_v25, %v4223_v24  ;;  %v4225_v37 = vld [vmem:[#allocation6 + $0x1d0] sm:$0xf0]  ;;  %v4207_v40 = vld [vmem:[#allocation6 + $0x1a0] sm:$0xf]  ;;  %v4552_v45 = vld [vmem:[#allocation6 + $0x1ac] sm:$0xf0] }
  0x46   :  { %638 = vmatpush.bf16.msrb.mxu3 %v5425_v41  ;;  %612 = vmatpush.bf16.msra.mxu1 %v5449_v59  ;;  %7175 = vst [vmem:[#allocation50_spill] sm:$0xff] %v5483_v17  ;;  %v5497_v38 = vor.u32 %v4554_v29, %v4225_v37  ;;  %v4550_v46 = vld [vmem:[#allocation6 + $0x1a4] sm:$0xf]  ;;  %v5500_v48 = vor.u32 %v4552_v45, %v4207_v40  ;;  %v4209_v49 = vld [vmem:[#allocation6 + $0x1b0] sm:$0xf0] }
  0x47   :  { %625 = vmatpush.bf16.msrb.mxu2 %v5429_v42  ;;  %600 = vmatpush.bf16.msrb.mxu0 %v5432_v47  ;;  %7178 = vst [vmem:[#allocation53_spill] sm:$0xff] %v5495_v35  ;;  %v4191_v62 = vld [vmem:[#allocation6 + $0x180] sm:$0xf]  ;;  %v4193_v24 = vld [vmem:[#allocation6 + $0x190] sm:$0xf0] }
  0x48   :  { %7179 = vst [vmem:[#allocation54_spill] sm:$0xff] %v5497_v38  ;;  %v4175_v29 = vld [vmem:[#allocation6 + $0x160] sm:$0xf]  ;;  %v4544_v37 = vld [vmem:[#allocation6 + $0x16c] sm:$0xf0] }
  0x49   :  { %7180 = vst [vmem:[#allocation55_spill] sm:$0xff] %v5500_v48  ;;  %v4542_v40 = vld [vmem:[#allocation6 + $0x164] sm:$0xf]  ;;  %v5522_v45 = vor.u32 %v4544_v37, %v4175_v29  ;;  %v4159_v29 = vld [vmem:[#allocation6 + $0x140] sm:$0xf] }
  0x4a   :  { %639 = vmatpush.bf16.msrb.mxu3 %v5438_v52  ;;  %613 = vmatpush.bf16.msra.mxu1 %v5454_v2  ;;  %v4540_v37 = vld [vmem:[#allocation6 + $0x14c] sm:$0xf0]  ;;  %v4561_v47 = vld [vmem:[#allocation6 + $0x1f4] sm:$0xf0]  ;;  %v4559_v34 = vld [vmem:[#allocation6 + $0x1ec] sm:$0xf] }
  0x4b   :  { %626 = vmatpush.bf16.msrb.mxu2 %v5441_v55  ;;  %7187 = vst [vmem:[#allocation62_spill] sm:$0xff] %v5522_v45  ;;  %v4249_v33 = vld [vmem:[#allocation6 + $0x1f8] sm:$0xf0]  ;;  %v4551_v58 = vld [vmem:[#allocation6 + $0x1ac] sm:$0xf] }
  0x4c   :  { %3852 = vmatmul.msk.bf16.gmra.mxu0 %vm223_vm0, %v4460_v51  ;;  %3855 = vmatmul.msk.bf16.gmra.mxu1 %vm223_vm0, %v5382_v60  ;;  %v6959_v60 = vmov 0   ;;  %v5576_v15 = vor.u32 %v4559_v34, %v4249_v33  ;;  %v4555_v33 = vld [vmem:[#allocation6 + $0x1cc] sm:$0xf]  ;;  %v4233_v34 = vld [vmem:[#allocation6 + $0x1d8] sm:$0xf0] }
  0x4d   :  { %3860 = vmatmul.msk.bf16.gmra.mxu2 %vm223_vm0, %v4460_v51  ;;  %3864 = vmatmul.msk.bf16.gmra.mxu3 %vm223_vm0, %v4460_v51  ;;  %v5589_v1 = vor.u32 %v4555_v33, %v4233_v34  ;;  %v4217_v54 = vld [vmem:[#allocation6 + $0x1b8] sm:$0xf0] }
  0x4e   :  { %1136 = vmatpush.bf16.msra.mxu3 %v5483_v17  ;;  %7207 = vst [vmem:[#allocation82_spill] sm:$0xff] %v5576_v15  ;;  %v5612_v43 = vor.u32 %v4551_v58, %v4217_v54  ;;  %v4547_v54 = vld [vmem:[#allocation6 + $0x18c] sm:$0xf]  ;;  %v4201_v58 = vld [vmem:[#allocation6 + $0x198] sm:$0xf0] }
  0x4f   :  { %7212 = vst [vmem:[#allocation86_spill] sm:$0xff] %v5589_v1 }
  0x50   :  { %7220 = vst [vmem:[#allocation94_spill] sm:$0xff] %v5612_v43 }
  0x52   :  { %1137 = vmatpush.bf16.msra.mxu3 %v5497_v38 }
  0x5c   :  { %3856 = vmatmul.msk.bf16.gmra.mxu1 %vm223_vm0, %v4460_v51  ;;  %601 = vmatmul.bf16.vlgmr.msrb.gmra.mxu0 %v6959_v60  ;;  %v5503_v51 = vor.u32 %v4550_v46, %v4209_v49  ;;  %v4177_v46 = vld [vmem:[#allocation6 + $0x170] sm:$0xf0]  ;;  %v5525_v49 = vperm.slane %v5471_v3, 2 }
  0x5d   :  { %3861 = vmatmul.msk.bf16.gmra.mxu2 %vm223_vm0, %v5324_v10  ;;  %3865 = vmatmul.msk.bf16.gmra.mxu3 %vm223_vm0, %v5324_v10 }
  0x5e   :  { %7181 = vst [vmem:[#allocation56_spill] sm:$0xff] %v5503_v51  ;;  %1138 = vmatpush.bf16.msra.mxu3 %v5503_v51 }
  0x5f   :  { %7188 = vst [vmem:[#allocation63_spill] sm:$0xff] %v5525_v49 }
  0x6c   :  { %3857 = vmatmul.msk.bf16.gmra.mxu1 %vm223_vm0, %v5324_v10  ;;  %v4239_v10 = vld [vmem:[#allocation6 + $0x1e0] sm:$0xf] }
  0x6d   :  { %627 = vmatmul.bf16.vlgmr.msrb.gmra.mxu2 %v6959_v60  ;;  %640 = vmatmul.bf16.vlgmr.msrb.gmra.mxu3 %v6959_v60  ;;  %v5481_v12 = vor.u32 %v4560_v8, %v4239_v10  ;;  %v4546_v10 = vld [vmem:[#allocation6 + $0x184] sm:$0xf] }
  0x6e   :  { %v5518_v25 = vor.u32 %v4546_v10, %v4193_v24 }
  0x6f   :  { %7174 = vst [vmem:[#allocation49_spill] sm:$0xff] %v5481_v12  ;;  %1110 = vmatpush.bf16.msrb.mxu1 %v5481_v12 }
  0x70   :  { %7186 = vst [vmem:[#allocation61_spill] sm:$0xff] %v5518_v25  ;;  %1139 = vmatpush.bf16.msra.mxu3 %v5518_v25 }
  0x73   :  { %1111 = vmatpush.bf16.msrb.mxu1 %v5495_v35 }
  0x77   :  { %1112 = vmatpush.bf16.msrb.mxu1 %v5500_v48 }
  0x7c   :  { %614 = vmatmul.bf16.vlgmr.msra.gmra.mxu1 %v6959_v60 }
  0xa9   :  { %v5476_v5 = vpop.f32.mrf.mxu0  ;;  %v260_v6 = vpop.f32.mrf.mxu1 }
  0xaa   :  { %v5479_v7 = vadd.f32 %v260_v6, %v5474_v4  ;;  %v4548_v6 = vld [vmem:[#allocation6 + $0x18c] sm:$0xf0] }
  0xab   :  { %v5516_v9 = vor.u32 %v4548_v6, %v4191_v62  ;;  %v5530_v62 = vperm.slane %v5471_v3, 3 }
  0xac   :  { %7173 = vst [vmem:[#allocation48_spill] sm:$0xff] %v5479_v7  ;;  %v5544_v7 = vor.u32 %v4540_v37, %v4159_v29  ;;  %v4127_v37 = vld [vmem:[#allocation6 + $0x100] sm:$0xf] }
  0xad   :  { %7185 = vst [vmem:[#allocation60_spill] sm:$0xff] %v5516_v9  ;;  %1113 = vmatpush.bf16.msrb.mxu1 %v5516_v9 }
  0xae   :  { %7190 = vst [vmem:[#allocation65_spill] sm:$0xff] %v5530_v62 }
  0xaf   :  { %7195 = vst [vmem:[#allocation70_spill] sm:$0xff] %v5544_v7 }
  0xb0   :  { %v5487_v20 = vpop.f32.mrf.mxu2  ;;  %v5489_v21 = vpop.f32.mrf.mxu3 }
  0xb1   :  { %v5491_v22 = vpop.f32.mrf.mxu0  ;;  %v5493_v31 = vpop.f32.mrf.mxu1  ;;  %1114 = vmatpush.bf16.msrb.mxu1 %v5522_v45 }
  0xb2   :  { %7176 = vst [vmem:[#allocation51_spill] sm:$0xff] %v5491_v22 }
  0xb3   :  { %7177 = vst [vmem:[#allocation52_spill] sm:$0xff] %v5493_v31  ;;  %v4538_v31 = vld [vmem:[#allocation6 + $0x144] sm:$0xf] }
  0xb5   :  { %1115 = vmatpush.bf16.msrb.mxu1 %v5544_v7 }
  0xb8   :  { %v5505_v56 = vpop.f32.mrf.mxu2  ;;  %v5508_v57 = vpop.f32.mrf.mxu3 }
  0xb9   :  { %7182 = vst [vmem:[#allocation57_spill] sm:$0xff] %v5505_v56  ;;  %v250_v61 = vpop.f32.mrf.mxu0  ;;  %v5514_v11 = vpop.f32.mrf.mxu1 }
  0xba   :  { %7183 = vst [vmem:[#allocation58_spill] sm:$0xff] %v5508_v57  ;;  %v5512_v8 = vadd.f32 %v250_v61, %v5474_v4  ;;  %v5527_v61 = vor.u32 %v4542_v40, %v4177_v46  ;;  %v4145_v57 = vld [vmem:[#allocation6 + $0x130] sm:$0xf0] }
  0xbc   :  { %7184 = vst [vmem:[#allocation59_spill] sm:$0xff] %v5512_v8  ;;  %1140 = vmatpush.bf16.msra.mxu3 %v5527_v61  ;;  %v4161_v8 = vld [vmem:[#allocation6 + $0x150] sm:$0xf0] }
  0xbd   :  { %7189 = vst [vmem:[#allocation64_spill] sm:$0xff] %v5527_v61  ;;  %v5546_v56 = vor.u32 %v4538_v31, %v4161_v8 }
  0xbf   :  { %7196 = vst [vmem:[#allocation71_spill] sm:$0xff] %v5546_v56 }
  0xc0   :  { %v308_v6 = vpop.f32.mrf.mxu2  ;;  %v337_v24 = vpop.f32.mrf.mxu3  ;;  %1141 = vmatpush.bf16.msra.mxu3 %v5546_v56 }
  0xc1   :  { %v5534_v10 = vadd.f32 %v308_v6, %v5525_v49  ;;  %v5536_v60 = vpop.f32.mrf.mxu0  ;;  %v5540_v40 = vadd.f32 %v337_v24, %v5530_v62  ;;  %v5542_v46 = vpop.f32.mrf.mxu1  ;;  %v4143_v6 = vld [vmem:[#allocation6 + $0x120] sm:$0xf]  ;;  %v5555_v24 = vperm.slane %v5471_v3, 1  ;;  %v4129_v3 = vld [vmem:[#allocation6 + $0x110] sm:$0xf0] }
  0xc2   :  { %7192 = vst [vmem:[#allocation67_spill] sm:$0xff] %v5536_v60  ;;  %v4536_v60 = vld [vmem:[#allocation6 + $0x12c] sm:$0xf0] }
  0xc3   :  { %7191 = vst [vmem:[#allocation66_spill] sm:$0xff] %v5534_v10  ;;  %v4534_v10 = vld [vmem:[#allocation6 + $0x124] sm:$0xf]  ;;  %v5550_v22 = vor.u32 %v4536_v60, %v4143_v6  ;;  %v4247_v6 = vld [vmem:[#allocation6 + $0x1e8] sm:$0xf] }
  0xc4   :  { %7193 = vst [vmem:[#allocation68_spill] sm:$0xff] %v5540_v40  ;;  %v5552_v55 = vor.u32 %v4534_v10, %v4145_v57  ;;  %v4532_v40 = vld [vmem:[#allocation6 + $0x10c] sm:$0xf0] }
  0xc5   :  { %7194 = vst [vmem:[#allocation69_spill] sm:$0xff] %v5542_v46  ;;  %1116 = vmatpush.bf16.msrb.mxu1 %v5550_v22  ;;  %v4530_v46 = vld [vmem:[#allocation6 + $0x104] sm:$0xf]  ;;  %v5566_v10 = vor.u32 %v4532_v40, %v4127_v37  ;;  %v4111_v40 = vld [vmem:[#allocation6 + $0xe0] sm:$0xf] }
  0xc6   :  { %7197 = vst [vmem:[#allocation72_spill] sm:$0xff] %v5550_v22  ;;  %1142 = vmatpush.bf16.msra.mxu3 %v5552_v55  ;;  %v5571_v42 = vor.u32 %v4530_v46, %v4129_v3  ;;  %v4526_v37 = vld [vmem:[#allocation6 + $0xe4] sm:$0xf]  ;;  %v4113_v46 = vld [vmem:[#allocation6 + $0xf0] sm:$0xf0] }
  0xc7   :  { %7198 = vst [vmem:[#allocation73_spill] sm:$0xff] %v5552_v55  ;;  %v4557_v3 = vld [vmem:[#allocation6 + $0x1d4] sm:$0xf0] }
  0xc8   :  { %7199 = vst [vmem:[#allocation74_spill] sm:$0xff] %v5555_v24  ;;  %v5557_v29 = vpop.f32.mrf.mxu2  ;;  %v5560_v31 = vpop.f32.mrf.mxu3 }
  0xc9   :  { %7200 = vst [vmem:[#allocation75_spill] sm:$0xff] %v5557_v29  ;;  %v255_v8 = vpop.f32.mrf.mxu0  ;;  %v279_v57 = vpop.f32.mrf.mxu1  ;;  %1117 = vmatpush.bf16.msrb.mxu1 %v5566_v10 }
  0xca   :  { %7201 = vst [vmem:[#allocation76_spill] sm:$0xff] %v5560_v31  ;;  %v5564_v60 = vadd.f32 %v255_v8, %v5474_v4  ;;  %v5569_v29 = vadd.f32 %v279_v57, %v5555_v24  ;;  %v5573_v31 = vor.u32 %v4561_v47, %v4247_v6  ;;  %1143 = vmatpush.bf16.msra.mxu3 %v5571_v42  ;;  %v4528_v8 = vld [vmem:[#allocation6 + $0xec] sm:$0xf0]  ;;  %v4231_v47 = vld [vmem:[#allocation6 + $0x1c8] sm:$0xf] }
  0xcb   :  { %7203 = vst [vmem:[#allocation78_spill] sm:$0xff] %v5566_v10  ;;  %v5581_v57 = vor.u32 %v4528_v8, %v4111_v40  ;;  %v5583_v6 = vor.u32 %v4526_v37, %v4113_v46  ;;  %v4095_v37 = vld [vmem:[#allocation6 + $0xc0] sm:$0xf]  ;;  %v4524_v46 = vld [vmem:[#allocation6 + $0xcc] sm:$0xf0] }
  0xcc   :  { %7202 = vst [vmem:[#allocation77_spill] sm:$0xff] %v5564_v60  ;;  %v5585_v60 = vor.u32 %v4557_v3, %v4231_v47  ;;  %v4522_v47 = vld [vmem:[#allocation6 + $0xc4] sm:$0xf]  ;;  %v5605_v34 = vor.u32 %v4524_v46, %v4095_v37  ;;  %v4520_v37 = vld [vmem:[#allocation6 + $0xac] sm:$0xf0] }
  0xcd   :  { %7204 = vst [vmem:[#allocation79_spill] sm:$0xff] %v5569_v29  ;;  %1162 = vmatpush.bf16.msra.mxu1 %v5573_v31  ;;  %v7211_v29 = vmov 0   ;;  %1097 = vmatpush.bf16.msra.mxu0 %v5581_v57  ;;  %v4518_v46 = vld [vmem:[#allocation6 + $0xa4] sm:$0xf] }
  0xce   :  { %7205 = vst [vmem:[#allocation80_spill] sm:$0xff] %v5571_v42  ;;  %1188 = vmatpush.bf16.msrb.mxu3 %v5576_v15  ;;  %1118 = vmatmul.bf16.vlgmr.msrb.gmra.mxu1 %v7211_v29 }
  0xcf   :  { %7206 = vst [vmem:[#allocation81_spill] sm:$0xff] %v5573_v31  ;;  %1144 = vmatmul.bf16.vlgmr.msra.gmra.mxu3 %v7211_v29  ;;  %1123 = vmatpush.bf16.msra.mxu2 %v5583_v6 }
  0xd0   :  { %7208 = vst [vmem:[#allocation83_spill] sm:$0xff] %v5581_v57  ;;  %v313_v13 = vpop.f32.mrf.mxu2  ;;  %v342_v8 = vpop.f32.mrf.mxu3  ;;  %v4553_v57 = vld [vmem:[#allocation6 + $0x1b4] sm:$0xf0] }
  0xd1   :  { %7209 = vst [vmem:[#allocation84_spill] sm:$0xff] %v5583_v6  ;;  %v5593_v40 = vadd.f32 %v313_v13, %v5525_v49  ;;  %v5595_v0 = vpop.f32.mrf.mxu0  ;;  %1163 = vmatpush.bf16.msra.mxu1 %v5585_v60  ;;  %v5600_v3 = vadd.f32 %v342_v8, %v5530_v62  ;;  %v5602_v33 = vpop.f32.mrf.mxu1  ;;  %v4097_v13 = vld [vmem:[#allocation6 + $0xd0] sm:$0xf0]  ;;  %1098 = vmatpush.bf16.msra.mxu0 %v5605_v34  ;;  %v4079_v8 = vld [vmem:[#allocation6 + $0xa0] sm:$0xf] }
  0xd2   :  { %7210 = vst [vmem:[#allocation85_spill] sm:$0xff] %v5585_v60  ;;  %1189 = vmatpush.bf16.msrb.mxu3 %v5589_v1 }
  0xd3   :  { %7213 = vst [vmem:[#allocation87_spill] sm:$0xff] %v5593_v40  ;;  %v4215_v40 = vld [vmem:[#allocation6 + $0x1a8] sm:$0xf] }
  0xd4   :  { %7214 = vst [vmem:[#allocation88_spill] sm:$0xff] %v5595_v0  ;;  %v5607_v0 = vor.u32 %v4522_v47, %v4097_v13  ;;  %v5609_v6 = vor.u32 %v4553_v57, %v4215_v40  ;;  %v4081_v47 = vld [vmem:[#allocation6 + $0xb0] sm:$0xf0]  ;;  %v4199_v57 = vld [vmem:[#allocation6 + $0x188] sm:$0xf] }
  0xd5   :  { %7215 = vst [vmem:[#allocation89_spill] sm:$0xff] %v5600_v3  ;;  %v5617_v3 = vor.u32 %v4520_v37, %v4079_v8  ;;  %v4549_v40 = vld [vmem:[#allocation6 + $0x194] sm:$0xf0]  ;;  %v5619_v13 = vor.u32 %v4518_v46, %v4081_v47  ;;  %v4063_v46 = vld [vmem:[#allocation6 + $0x80] sm:$0xf] }
  0xd6   :  { %7216 = vst [vmem:[#allocation90_spill] sm:$0xff] %v5602_v33  ;;  %1124 = vmatpush.bf16.msra.mxu2 %v5607_v0  ;;  %1164 = vmatpush.bf16.msra.mxu1 %v5609_v6  ;;  %v5621_v33 = vor.u32 %v4549_v40, %v4199_v57  ;;  %v4516_v47 = vld [vmem:[#allocation6 + $0x8c] sm:$0xf0]  ;;  %v4514_v57 = vld [vmem:[#allocation6 + $0x84] sm:$0xf] }
  0xd7   :  { %7217 = vst [vmem:[#allocation91_spill] sm:$0xff] %v5605_v34  ;;  %1190 = vmatpush.bf16.msrb.mxu3 %v5612_v43  ;;  %1099 = vmatpush.bf16.msra.mxu0 %v5617_v3 }
  0xd8   :  { %7218 = vst [vmem:[#allocation92_spill] sm:$0xff] %v5607_v0  ;;  %v246_v0 = vadd.f32 %v5476_v5, %v5474_v4  ;;  %v5625_v34 = vpop.f32.mrf.mxu2  ;;  %v5630_v8 = vpop.f32.mrf.mxu3  ;;  %v5635_v5 = vor.u32 %v4516_v47, %v4063_v46  ;;  %v4183_v4 = vld [vmem:[#allocation6 + $0x168] sm:$0xf]  ;;  %v4512_v46 = vld [vmem:[#allocation6 + $0x6c] sm:$0xf0] }
  0xd9   :  { %7219 = vst [vmem:[#allocation93_spill] sm:$0xff] %v5609_v6  ;;  %v5628_v6 = vor.u32 %v4547_v54, %v4201_v58  ;;  %v602_v37 = vpop.f32.mrf.mxu0  ;;  %v284_v40 = vpop.f32.mrf.mxu1  ;;  %v4545_v54 = vld [vmem:[#allocation6 + $0x174] sm:$0xf0]  ;;  %v4510_v47 = vld [vmem:[#allocation6 + $0x64] sm:$0xf] }
  0xda   :  { %7221 = vst [vmem:[#allocation95_spill] sm:$0xff] %v5617_v3  ;;  %1125 = vmatpush.bf16.msra.mxu2 %v5619_v13  ;;  %1165 = vmatpush.bf16.msra.mxu1 %v5621_v33  ;;  %v645_v43 = vadd.f32 %v602_v37, %v246_v0  ;;  %v5638_v58 = vadd.f32 %v284_v40, %v5555_v24  ;;  %v4543_v3 = vld [vmem:[#allocation6 + $0x16c] sm:$0xf]  ;;  %v4047_v37 = vld [vmem:[#allocation6 + $0x60] sm:$0xf] }
  0xdb   :  { %7222 = vst [vmem:[#allocation96_spill] sm:$0xff] %v5619_v13  ;;  %1191 = vmatpush.bf16.msrb.mxu3 %v5628_v6  ;;  %v5642_v13 = vor.u32 %v4545_v54, %v4183_v4  ;;  %1100 = vmatpush.bf16.msra.mxu0 %v5635_v5  ;;  %v4049_v4 = vld [vmem:[#allocation6 + $0x70] sm:$0xf0]  ;;  %v4541_v40 = vld [vmem:[#allocation6 + $0x154] sm:$0xf0] }
  0xdc   :  { %7223 = vst [vmem:[#allocation97_spill] sm:$0xff] %v5621_v33  ;;  %v4185_v33 = vld [vmem:[#allocation6 + $0x178] sm:$0xf0]  ;;  %v3994_v1 = vmul.f32 -1.442695, %v645_v43  ;;  %v5652_v43 = vor.u32 %v4510_v47, %v4049_v4 }
  0xdd   :  { %7224 = vst [vmem:[#allocation98_spill] sm:$0xff] %v5625_v34  ;;  %v4065_v34 = vld [vmem:[#allocation6 + $0x90] sm:$0xf0]  ;;  %v5645_v0 = vor.u32 %v4543_v3, %v4185_v33  ;;  %v4539_v3 = vld [vmem:[#allocation6 + $0x14c] sm:$0xf] }
  0xde   :  { %7225 = vst [vmem:[#allocation99_spill] sm:$0xff] %v5628_v6  ;;  %1166 = vmatpush.bf16.msra.mxu1 %v5642_v13  ;;  %4623 = vpow2.f32 %v3994_v1  ;;  %v4169_v33 = vld [vmem:[#allocation6 + $0x158] sm:$0xf0]  ;;  %v4508_v47 = vld [vmem:[#allocation6 + $0x4c] sm:$0xf0] }
  0xdf   :  { %7226 = vst [vmem:[#allocation100_spill] sm:$0xff] %v5630_v8  ;;  %v5640_v8 = vor.u32 %v4514_v57, %v4065_v34  ;;  %1192 = vmatpush.bf16.msrb.mxu3 %v5645_v0  ;;  %v5650_v34 = vor.u32 %v4512_v46, %v4047_v37  ;;  %v4167_v57 = vld [vmem:[#allocation6 + $0x148] sm:$0xf]  ;;  %v4031_v46 = vld [vmem:[#allocation6 + $0x40] sm:$0xf] }
  0xe0   :  { %7227 = vst [vmem:[#allocation101_spill] sm:$0xff] %v5635_v5  ;;  %v5654_v54 = vor.u32 %v4541_v40, %v4167_v57  ;;  %v347_v5 = vpop.f32.mrf.mxu3  ;;  %v4506_v4 = vld [vmem:[#allocation6 + $0x44] sm:$0xf] }
  0xe1   :  { %7228 = vst [vmem:[#allocation102_spill] sm:$0xff] %v5638_v58  ;;  %1126 = vmatpush.bf16.msra.mxu2 %v5640_v8  ;;  %v318_v58 = vpop.f32.mrf.mxu2  ;;  %1101 = vmatpush.bf16.msra.mxu0 %v5650_v34  ;;  %v604_v37 = vpop.f32.mrf.mxu0  ;;  %v5665_v57 = vadd.f32 %v347_v5, %v5530_v62 }
  0xe2   :  { %7229 = vst [vmem:[#allocation103_spill] sm:$0xff] %v5640_v8  ;;  %v5657_v8 = vor.u32 %v4539_v3, %v4169_v33  ;;  %v5660_v1 = vadd.f32 %v318_v58, %v5525_v49  ;;  %1167 = vmatpush.bf16.msra.mxu1 %v5654_v54  ;;  %v5667_v40 = vpop.f32.mrf.mxu1  ;;  %v5670_v3 = vor.u32 %v4508_v47, %v4031_v46  ;;  %v4033_v58 = vld [vmem:[#allocation6 + $0x50] sm:$0xf0]  ;;  %v4151_v33 = vld [vmem:[#allocation6 + $0x128] sm:$0xf] }
  0xe3   :  { %7230 = vst [vmem:[#allocation104_spill] sm:$0xff] %v5642_v13  ;;  %v5672_v37 = vor.u32 %v4506_v4, %v4033_v58  ;;  %v4015_v46 = vld [vmem:[#allocation6 + $0x20] sm:$0xf]  ;;  %v4504_v47 = vld [vmem:[#allocation6 + $0x2c] sm:$0xf0] }
  0xe4   :  { %7231 = vst [vmem:[#allocation105_spill] sm:$0xff] %v5645_v0  ;;  %1193 = vmatpush.bf16.msrb.mxu3 %v5657_v8  ;;  %v4624_v0 = vpop.eup %4623  ;;  %v5684_v4 = vor.u32 %v4504_v47, %v4015_v46  ;;  %v4017_v58 = vld [vmem:[#allocation6 + $0x30] sm:$0xf0]  ;;  %v3999_v47 = vld [vmem:[#allocation6] sm:$0xf] }
  0xe5   :  { %7232 = vst [vmem:[#allocation106_spill] sm:$0xff] %v5650_v34  ;;  %1127 = vmatpush.bf16.msra.mxu2 %v5652_v43  ;;  %v4535_v34 = vld [vmem:[#allocation6 + $0x12c] sm:$0xf]  ;;  %1102 = vmatpush.bf16.msra.mxu0 %v5670_v3 }
  0xe6   :  { %7233 = vst [vmem:[#allocation107_spill] sm:$0xff] %v5652_v43 }
  0xe7   :  { %7234 = vst [vmem:[#allocation108_spill] sm:$0xff] %v5654_v54  ;;  %v4153_v54 = vld [vmem:[#allocation6 + $0x138] sm:$0xf0] }
  0xe8   :  { %7235 = vst [vmem:[#allocation109_spill] sm:$0xff] %v5657_v8  ;;  %v5677_v5 = vor.u32 %v4535_v34, %v4153_v54 }
  0xe9   :  { %7236 = vst [vmem:[#allocation110_spill] sm:$0xff] %v5660_v1  ;;  %v4537_v1 = vld [vmem:[#allocation6 + $0x134] sm:$0xf0]  ;;  %1128 = vmatpush.bf16.msra.mxu2 %v5672_v37  ;;  %v5687_v34 = vpop.f32.mrf.mxu2  ;;  %1103 = vmatpush.bf16.msra.mxu0 %v5684_v4 }
  0xea   :  { %7237 = vst [vmem:[#allocation111_spill] sm:$0xff] %v5665_v57  ;;  %v5674_v43 = vor.u32 %v4537_v1, %v4151_v33  ;;  %v5679_v57 = vadd.f32 1.0, %v4624_v0  ;;  %1194 = vmatpush.bf16.msrb.mxu3 %v5677_v5  ;;  %v4502_v1 = vld [vmem:[#allocation6 + $0x24] sm:$0xf]  ;;  %v4135_v33 = vld [vmem:[#allocation6 + $0x108] sm:$0xf]  ;;  %v289_v8 = vpop.f32.mrf.mxu1 }
  0xeb   :  { %7238 = vst [vmem:[#allocation112_spill] sm:$0xff] %v5667_v40  ;;  %v4533_v40 = vld [vmem:[#allocation6 + $0x114] sm:$0xf0]  ;;  %v5690_v0 = vor.u32 %v4502_v1, %v4017_v58  ;;  %v4001_v1 = vld [vmem:[#allocation6 + $0x10] sm:$0xf0] }
  0xec   :  { %7239 = vst [vmem:[#allocation113_spill] sm:$0xff] %v5670_v3  ;;  %1168 = vmatpush.bf16.msra.mxu1 %v5674_v43  ;;  %4625 = vrcp.f32 %v5679_v57  ;;  %v5692_v54 = vor.u32 %v4533_v40, %v4135_v33  ;;  %v4137_v3 = vld [vmem:[#allocation6 + $0x118] sm:$0xf0]  ;;  %v4119_v58 = vld [vmem:[#allocation6 + $0xe8] sm:$0xf]  ;;  %v5703_v40 = vadd.f32 %v289_v8, %v5555_v24  ;;  %vm658_vm2 = vweird.f32 %v5679_v57 }
  0xed   :  { %7240 = vst [vmem:[#allocation114_spill] sm:$0xff] %v5672_v37  ;;  %v4531_v37 = vld [vmem:[#allocation6 + $0x10c] sm:$0xf]  ;;  %1129 = vmatpush.bf16.msra.mxu2 %v5690_v0 }
  0xee   :  { %7241 = vst [vmem:[#allocation115_spill] sm:$0xff] %v5674_v43  ;;  %v5694_v43 = vpop.f32.mrf.mxu3  ;;  %v5696_v46 = vor.u32 %v4531_v37, %v4137_v3  ;;  %v4529_v37 = vld [vmem:[#allocation6 + $0xf4] sm:$0xf0]  ;;  %v4527_v33 = vld [vmem:[#allocation6 + $0xec] sm:$0xf] }
  0xef   :  { %7242 = vst [vmem:[#allocation116_spill] sm:$0xff] %v5677_v5  ;;  %v4500_v5 = vld [vmem:[#allocation6 + $0xc] sm:$0xf0] }
  0xf0   :  { %7243 = vst [vmem:[#allocation117_spill] sm:$0xff] %v5684_v4  ;;  %1169 = vmatpush.bf16.msra.mxu1 %v5692_v54  ;;  %v4498_v4 = vld [vmem:[#allocation6 + $0x4] sm:$0xf]  ;;  %1195 = vmatpush.bf16.msrb.mxu3 %v5696_v46 }
  0xf1   :  { %7244 = vst [vmem:[#allocation118_spill] sm:$0xff] %v5687_v34  ;;  %v5700_v34 = vor.u32 %v4500_v5, %v3999_v47  ;;  %v5707_v3 = vor.u32 %v4498_v4, %v4001_v1  ;;  %v5711_v5 = vor.u32 %v4529_v37, %v4119_v58  ;;  %v4103_v4 = vld [vmem:[#allocation6 + $0xc8] sm:$0xf]  ;;  %v4525_v1 = vld [vmem:[#allocation6 + $0xd4] sm:$0xf0] }
  0xf2   :  { %7245 = vst [vmem:[#allocation119_spill] sm:$0xff] %v5690_v0  ;;  %v4626_v0 = vpop.eup %4625  ;;  %v4105_v58 = vld [vmem:[#allocation6 + $0xd8] sm:$0xf0] }
  0xf3   :  { %7246 = vst [vmem:[#allocation120_spill] sm:$0xff] %v5692_v54  ;;  %1104 = vmatpush.bf16.msra.mxu0 %v5700_v34  ;;  %1170 = vmatmul.bf16.vlgmr.msra.gmra.mxu1 %v7211_v29  ;;  %v654_v8 = vmul.f32 %v4626_v0, %v5679_v57  ;;  %vm659_vm1 = vweird.f32 %v4626_v0 }
  0xf4   :  { %7247 = vst [vmem:[#allocation121_spill] sm:$0xff] %v5694_v43  ;;  %1285 = vmatpush.bf16.msrb.mxu1 %v5332_v18  ;;  %v4121_v43 = vld [vmem:[#allocation6 + $0xf8] sm:$0xf0]  ;;  %1311 = vmatpush.bf16.msra.mxu3 %v5342_v26  ;;  %v304_v26 = vadd.f32 %v5487_v20, %v5525_v49  ;;  %v664_v20 = vand.u32 2147483648, %v5679_v57  ;;  %vm660_vm3 = vmor %vm658_vm2, %vm659_vm1 }
  0xf5   :  { %7248 = vst [vmem:[#allocation122_spill] sm:$0xff] %v5696_v46  ;;  %v5713_v47 = vor.u32 %v4527_v33, %v4121_v43  ;;  %1130 = vmatpush.bf16.msra.mxu2 %v5707_v3  ;;  %v5723_v43 = vor.u32 %v4525_v1, %v4103_v4  ;;  %v655_v37 = vsub.f32 1.0, %v654_v8  ;;  %v628_v33 = vpop.f32.mrf.mxu2  ;;  %1196 = vmatmul.bf16.vlgmr.msrb.gmra.mxu3 %v7211_v29  ;;  %v5733_v1 = vpop.f32.mrf.mxu1  ;;  %v4087_v8 = vld [vmem:[#allocation6 + $0xa8] sm:$0xf] }
  0xf6   :  { %7249 = vst [vmem:[#allocation123_spill] sm:$0xff] %v5700_v34  ;;  %v662_v34 = vand.u32 2147483647, %v5679_v57  ;;  %v641_v49 = vpop.f32.mrf.mxu3 }
  0xf7   :  { %7250 = vst [vmem:[#allocation124_spill] sm:$0xff] %v5703_v40  ;;  %1149 = vmatpush.bf16.msrb.mxu0 %v5711_v5  ;;  %v4523_v40 = vld [vmem:[#allocation6 + $0xcc] sm:$0xf]  ;;  %v656_v4 = vmul.f32 %v4626_v0, %v655_v37  ;;  %v665_v37 = vor.u32 1.1754944e-38, %v664_v20  ;;  %v275_v20 = vadd.f32 %v5514_v11, %v5555_v24 }
  0xf8   :  { %7251 = vst [vmem:[#allocation125_spill] sm:$0xff] %v5707_v3  ;;  %1286 = vmatpush.bf16.msrb.mxu1 %v5347_v27  ;;  %1312 = vmatpush.bf16.msra.mxu3 %v5353_v32  ;;  %v5726_v18 = vor.u32 %v4523_v40, %v4105_v58  ;;  %v647_v3 = vadd.f32 %v628_v33, %v304_v26  ;;  %v4521_v40 = vld [vmem:[#allocation6 + $0xb4] sm:$0xf0]  ;;  %v4519_v58 = vld [vmem:[#allocation6 + $0xac] sm:$0xf]  ;;  %vm663_vm4 = vcmp.eq.f32.partialorder %v662_v34, 8.507059e+37 }
  0xf9   :  { %7252 = vst [vmem:[#allocation126_spill] sm:$0xff] %v5711_v5  ;;  %1175 = vmatpush.bf16.msrb.mxu2 %v5713_v47  ;;  %v333_v5 = vadd.f32 %v5489_v21, %v5530_v62  ;;  %v5738_v26 = vor.u32 %v4521_v40, %v4087_v8  ;;  %v4089_v21 = vld [vmem:[#allocation6 + $0xb8] sm:$0xf0]  ;;  %v657_v33 = vadd.f32 %v4626_v0, %v656_v4 }
  0xfa   :  { %7253 = vst [vmem:[#allocation127_spill] sm:$0xff] %v5713_v47  ;;  %4627 = vtanh.f32 %v647_v3  ;;  %v5742_v29 = vor.u32 %v4519_v58, %v4089_v21  ;;  %v4073_v4 = vld [vmem:[#allocation6 + $0x98] sm:$0xf0] }
  0xfb   :  { %7254 = vst [vmem:[#allocation128_spill] sm:$0xff] %v5723_v43  ;;  %1150 = vmatpush.bf16.msrb.mxu0 %v5723_v43  ;;  %v648_v32 = vadd.f32 %v641_v49, %v333_v5  ;;  %v661_v3 = vsel %vm660_vm3, %v4626_v0, %v657_v33  ;;  %v4071_v49 = vld [vmem:[#allocation6 + $0x88] sm:$0xf]  ;;  %v4517_v5 = vld [vmem:[#allocation6 + $0x94] sm:$0xf0] }
  0xfc   :  { %7255 = vst [vmem:[#allocation129_spill] sm:$0xff] %v5726_v18  ;;  %1287 = vmatpush.bf16.msrb.mxu1 %v5359_v39  ;;  %1313 = vmatpush.bf16.msra.mxu3 %v5367_v50  ;;  %v666_v8 = vsel %vm663_vm4, %v665_v37, %v661_v3  ;;  %v5748_v57 = vor.u32 %v4517_v5, %v4071_v49  ;;  %v4055_v37 = vld [vmem:[#allocation6 + $0x68] sm:$0xf]  ;;  %v4513_v3 = vld [vmem:[#allocation6 + $0x74] sm:$0xf0] }
  0xfd   :  { %7256 = vst [vmem:[#allocation130_spill] sm:$0xff] %v5733_v1  ;;  %1176 = vmatpush.bf16.msrb.mxu2 %v5726_v18  ;;  %v4515_v1 = vld [vmem:[#allocation6 + $0x8c] sm:$0xf]  ;;  %v3996_v40 = vmul.f32 -1.442695, %v648_v32  ;;  %v630_v58 = vpop.f32.mrf.mxu2  ;;  %v615_v32 = vpop.f32.mrf.mxu1 }
  0xfe   :  { %7257 = vst [vmem:[#allocation131_spill] sm:$0xff] %v5738_v26  ;;  %v5751_v34 = vor.u32 %v4515_v1, %v4073_v4  ;;  %v643_v21 = vpop.f32.mrf.mxu3  ;;  %v4511_v49 = vld [vmem:[#allocation6 + $0x6c] sm:$0xf]  ;;  %v646_v5 = vadd.f32 %v615_v32, %v275_v20  ;;  %v5760_v1 = vor.u32 %v4513_v3, %v4055_v37  ;;  %v4057_v4 = vld [vmem:[#allocation6 + $0x78] sm:$0xf0] }
  0xff   :  { %7258 = vst [vmem:[#allocation132_spill] sm:$0xff] %v5742_v29  ;;  %1151 = vmatpush.bf16.msrb.mxu0 %v5738_v26  ;;  %4629 = vpow2.f32 %v3996_v40  ;;  %v5763_v11 = vor.u32 %v4511_v49, %v4057_v4  ;;  %v4039_v58 = vld [vmem:[#allocation6 + $0x48] sm:$0xf]  ;;  %v4507_v21 = vld [vmem:[#allocation6 + $0x4c] sm:$0xf] }
 0x100   :  { %1288 = vmatpush.bf16.msrb.mxu1 %v5371_v53  ;;  %7259 = vst [vmem:[#allocation133_spill] sm:$0xff] %v5748_v57  ;;  %1314 = vmatpush.bf16.msra.mxu3 %v5384_v63  ;;  %v4628_v0 = vpop.eup %4627  ;;  %v4041_v40 = vld [vmem:[#allocation6 + $0x58] sm:$0xf0]  ;;  %v4023_v49 = vld [vmem:[#allocation6 + $0x28] sm:$0xf] }
 0x101   :  { %1177 = vmatpush.bf16.msrb.mxu2 %v5742_v29  ;;  %7260 = vst [vmem:[#allocation134_spill] sm:$0xff] %v5751_v34  ;;  %v5755_v33 = vmul.f32 %v4628_v0, %v666_v8  ;;  %v3995_v8 = vmul.f32 -1.442695, %v646_v5  ;;  %v4509_v0 = vld [vmem:[#allocation6 + $0x54] sm:$0xf0]  ;;  %v5771_v32 = vor.u32 %v4507_v21, %v4041_v40 }
 0x102   :  { %7261 = vst [vmem:[#allocation135_spill] sm:$0xff] %v5760_v1  ;;  %v5769_v20 = vor.u32 %v4509_v0, %v4039_v58  ;;  %v4505_v5 = vld [vmem:[#allocation6 + $0x34] sm:$0xf0]  ;;  %v4503_v4 = vld [vmem:[#allocation6 + $0x2c] sm:$0xf] }
 0x103   :  { %1152 = vmatpush.bf16.msrb.mxu0 %v5748_v57  ;;  %7262 = vst [vmem:[#allocation136_spill] sm:$0xff] %v5763_v11  ;;  %4631 = vpow2.f32 %v3995_v8  ;;  %v4025_v8 = vld [vmem:[#allocation6 + $0x38] sm:$0xf0]  ;;  %v4007_v21 = vld [vmem:[#allocation6 + $0x8] sm:$0xf] }
 0x104   :  { %1289 = vmatpush.bf16.msrb.mxu1 %v5410_v16  ;;  %1315 = vmatpush.bf16.msra.mxu3 %v5405_v14  ;;  %7263 = vst [vmem:[#allocation137_spill] sm:$0xff] %v5769_v20  ;;  %v5779_v58 = vor.u32 %v4503_v4, %v4025_v8  ;;  %v4501_v40 = vld [vmem:[#allocation6 + $0x14] sm:$0xf0] }
 0x105   :  { %1178 = vmatpush.bf16.msrb.mxu2 %v5751_v34  ;;  %7264 = vst [vmem:[#allocation138_spill] sm:$0xff] %v5771_v32  ;;  %v4630_v37 = vpop.eup %4629  ;;  %v617_v3 = vpop.f32.mrf.mxu1 }
 0x106   :  { %v691_v14 = vadd.f32 1.0, %v4630_v37  ;;  %7266 = vst [vmem:[#allocation140_spill] sm:$0xff] %v5779_v58  ;;  %v4499_v3 = vld [vmem:[#allocation6 + $0xc] sm:$0xf] }
 0x107   :  { %1153 = vmatpush.bf16.msrb.mxu0 %v5760_v1 }
 0x108   :  { %1290 = vmatpush.bf16.msrb.mxu1 %v5416_v28  ;;  %1316 = vmatpush.bf16.msra.mxu3 %v5413_v23  ;;  %v5776_v28 = vor.u32 %v4505_v5, %v4023_v49  ;;  %v4009_v49 = vld [vmem:[#allocation6 + $0x18] sm:$0xf0]  ;;  %4633 = vrcp.f32 %v691_v14  ;;  %vm697_vm10 = vweird.f32 %v691_v14 }
 0x109   :  { %1179 = vmatpush.bf16.msrb.mxu2 %v5763_v11  ;;  %v4632_v0 = vpop.eup %4631  ;;  %v5787_v37 = vor.u32 %v4499_v3, %v4009_v49 }
 0x10a   :  { %7265 = vst [vmem:[#allocation139_spill] sm:$0xff] %v5776_v28  ;;  %v671_v23 = vadd.f32 1.0, %v4632_v0 }
 0x10b   :  { %1154 = vmatpush.bf16.msrb.mxu0 %v5769_v20  ;;  %7268 = vst [vmem:[#allocation142_spill] sm:$0xff] %v5787_v37 }
 0x10c   :  { %1291 = vmatpush.bf16.msrb.mxu1 %v5449_v59  ;;  %1317 = vmatpush.bf16.msra.mxu3 %v5425_v41  ;;  %v5784_v59 = vor.u32 %v4501_v40, %v4007_v21  ;;  %4635 = vrcp.f32 %v671_v23  ;;  %v683_v40 = vand.u32 2147483648, %v671_v23  ;;  %v681_v49 = vand.u32 2147483647, %v671_v23 }
 0x10d   :  { %1180 = vmatpush.bf16.msrb.mxu2 %v5771_v32  ;;  %vm677_vm6 = vweird.f32 %v671_v23 }
 0x10e   :  { %7267 = vst [vmem:[#allocation141_spill] sm:$0xff] %v5784_v59  ;;  %v4634_v5 = vpop.eup %4633  ;;  %vm682_vm8 = vcmp.eq.f32.partialorder %v681_v49, 8.507059e+37  ;;  %v7274_v49 = vld [vmem:[#allocation33_spill] sm:$0xff] }
 0x10f   :  { %1155 = vmatpush.bf16.msrb.mxu0 %v5776_v28  ;;  %v693_v0 = vmul.f32 %v4634_v5, %v691_v14  ;;  %vm698_vm9 = vweird.f32 %v4634_v5 }
 0x110   :  { %1292 = vmatpush.bf16.msrb.mxu1 %v5454_v2  ;;  %1318 = vmatpush.bf16.msra.mxu3 %v5438_v52  ;;  %vm699_vm11 = vmor %vm697_vm10, %vm698_vm9 }
 0x111   :  { %1181 = vmatpush.bf16.msrb.mxu2 %v5779_v58 }
 0x112   :  { %v4636_v4 = vpop.eup %4635 }
 0x113   :  { %1156 = vmatpush.bf16.msrb.mxu0 %v5784_v59  ;;  %v673_v8 = vmul.f32 %v4636_v4, %v671_v23  ;;  %vm678_vm5 = vweird.f32 %v4636_v4  ;;  %v703_v23 = vand.u32 2147483648, %v691_v14 }
 0x114   :  { %1405 = vmatpush.bf16.msra.mxu1 %v5481_v12  ;;  %1431 = vmatpush.bf16.msrb.mxu3 %v5483_v17  ;;  %v694_v17 = vsub.f32 1.0, %v693_v0  ;;  %vm679_vm7 = vmor %vm677_vm6, %vm678_vm5 }
 0x115   :  { %1182 = vmatpush.bf16.msrb.mxu2 %v5787_v37  ;;  %v674_v21 = vsub.f32 1.0, %v673_v8 }
 0x117   :  { %v675_v3 = vmul.f32 %v4636_v4, %v674_v21 }
 0x118   :  { %1406 = vmatpush.bf16.msra.mxu1 %v5495_v35  ;;  %1432 = vmatpush.bf16.msrb.mxu3 %v5497_v38  ;;  %v684_v38 = vor.u32 1.1754944e-38, %v683_v40  ;;  %v7272_v40 = vld [vmem:[#allocation93_spill] sm:$0xff] }
 0x119   :  { %v676_v35 = vadd.f32 %v4636_v4, %v675_v3  ;;  %v7273_v3 = vld [vmem:[#allocation94_spill] sm:$0xff] }
 0x11b   :  { %v680_v12 = vsel %vm679_vm7, %v4636_v4, %v676_v35  ;;  %v701_v35 = vand.u32 2147483647, %v691_v14  ;;  %v7269_v14 = vld [vmem:[#allocation86_spill] sm:$0xff]  ;;  %v7271_v4 = vld [vmem:[#allocation32_spill] sm:$0xff] }
 0x11c   :  { %1407 = vmatpush.bf16.msra.mxu1 %v5500_v48  ;;  %1433 = vmatpush.bf16.msrb.mxu3 %v5503_v51  ;;  %v695_v48 = vmul.f32 %v4634_v5, %v694_v17  ;;  %v685_v51 = vsel %vm682_vm8, %v684_v38, %v680_v12  ;;  %v704_v17 = vor.u32 1.1754944e-38, %v703_v23  ;;  %v7277_v23 = vld [vmem:[#allocation35_spill] sm:$0xff] }
 0x11d   :  { %v707_v8 = vmul.f32 0.0, %v685_v51  ;;  %vm702_vm12 = vcmp.eq.f32.partialorder %v701_v35, 8.507059e+37  ;;  %v7278_v35 = vld [vmem:[#allocation36_spill] sm:$0xff] }
 0x11e   :  { %v696_v0 = vadd.f32 %v4634_v5, %v695_v48 }
 0x11f   :  { %v5802_v21 = vadd.f32 %v5755_v33, %v707_v8  ;;  %v7275_v8 = vld [vmem:[#allocation34_spill] sm:$0xff] }
 0x120   :  { %1408 = vmatpush.bf16.msra.mxu1 %v5516_v9  ;;  %1434 = vmatpush.bf16.msrb.mxu3 %v5518_v25  ;;  %v700_v12 = vsel %vm699_vm11, %v4634_v5, %v696_v0  ;;  %v7270_v5 = vld [vmem:[#allocation31_spill] sm:$0xff]  ;;  %v7276_v0 = vld [vmem:[#allocation97_spill] sm:$0xff] }
 0x121   :  { %4637 = vtanh.f32 %v5802_v21  ;;  %v705_v51 = vsel %vm702_vm12, %v704_v17, %v700_v12  ;;  %v7279_v12 = vld [vmem:[#allocation105_spill] sm:$0xff]  ;;  %v7280_v17 = vld [vmem:[#allocation38_spill] sm:$0xff] }
 0x124   :  { %1409 = vmatpush.bf16.msra.mxu1 %v5522_v45  ;;  %1435 = vmatpush.bf16.msrb.mxu3 %v5527_v61 }
 0x127   :  { %v4638_v38 = vpop.eup %4637 }
 0x128   :  { %1410 = vmatpush.bf16.msra.mxu1 %v5544_v7  ;;  %1436 = vmatpush.bf16.msrb.mxu3 %v5546_v56  ;;  %v711_v48 = vmul.f32 %v4638_v38, %v705_v51  ;;  %v7281_v38 = vld [vmem:[#allocation41_spill] sm:$0xff]  ;;  %v7282_v51 = vld [vmem:[#allocation108_spill] sm:$0xff] }
 0x12a   :  { %v712_v33 = vpack.c.bf16 %v711_v48, %v711_v48  ;;  %v7283_v48 = vld [vmem:[#allocation109_spill] sm:$0xff] }
 0x12c   :  { %1411 = vmatpush.bf16.msra.mxu1 %v5550_v22  ;;  %1437 = vmatpush.bf16.msrb.mxu3 %v5552_v55  ;;  %v7297_v55 = vld [vmem:[#allocation103_spill] sm:$0xff]  ;;  %v7300_v22 = vld [vmem:[#allocation113_spill] sm:$0xff] }
 0x12d   :  { %1105 = vmatmul.bf16.vlgmr.msra.gmra.mxu0 %v712_v33  ;;  %1131 = vmatmul.bf16.vlgmr.msra.gmra.mxu2 %v712_v33 }
 0x12e   :  { %1293 = vmatmul.bf16.vlgmr.msrb.gmra.mxu1 %v712_v33  ;;  %1319 = vmatmul.bf16.vlgmr.msra.gmra.mxu3 %v712_v33 }
 0x12f   :  { %1272 = vmatpush.bf16.msra.mxu0 %v5334_v19  ;;  %1298 = vmatpush.bf16.msra.mxu2 %v5355_v36 }
 0x130   :  { %1412 = vmatpush.bf16.msra.mxu1 %v5566_v10  ;;  %1438 = vmatpush.bf16.msrb.mxu3 %v5571_v42  ;;  %v7296_v10 = vld [vmem:[#allocation101_spill] sm:$0xff] }
 0x133   :  { %1273 = vmatpush.bf16.msra.mxu0 %v5350_v30  ;;  %1299 = vmatpush.bf16.msra.mxu2 %v5365_v44 }
 0x134   :  { %1457 = vmatpush.bf16.msrb.mxu1 %v5573_v31  ;;  %1483 = vmatpush.bf16.msra.mxu3 %v5576_v15  ;;  %v7295_v15 = vld [vmem:[#allocation96_spill] sm:$0xff] }
 0x137   :  { %1274 = vmatpush.bf16.msra.mxu0 %v7270_v5  ;;  %1300 = vmatpush.bf16.msra.mxu2 %v7271_v4 }
 0x138   :  { %1458 = vmatpush.bf16.msrb.mxu1 %v5585_v60  ;;  %1484 = vmatpush.bf16.msra.mxu3 %v7269_v14  ;;  %v7288_v14 = vld [vmem:[#allocation44_spill] sm:$0xff] }
 0x139   :  { %v7291_v60 = vld [vmem:[#allocation84_spill] sm:$0xff] }
 0x13b   :  { %1275 = vmatpush.bf16.msra.mxu0 %v7274_v49  ;;  %1301 = vmatpush.bf16.msra.mxu2 %v7275_v8 }
 0x13c   :  { %1459 = vmatpush.bf16.msrb.mxu1 %v7272_v40  ;;  %1485 = vmatpush.bf16.msra.mxu3 %v7273_v3  ;;  %v7286_v3 = vld [vmem:[#allocation115_spill] sm:$0xff]  ;;  %v7287_v40 = vld [vmem:[#allocation116_spill] sm:$0xff] }
 0x13d   :  { %1157 = vmatmul.bf16.vlgmr.msrb.gmra.mxu0 %v712_v33  ;;  %1183 = vmatmul.bf16.vlgmr.msrb.gmra.mxu2 %v712_v33 }
 0x13f   :  { %1276 = vmatpush.bf16.msra.mxu0 %v7277_v23  ;;  %1302 = vmatpush.bf16.msra.mxu2 %v7278_v35 }
 0x140   :  { %1460 = vmatpush.bf16.msrb.mxu1 %v7276_v0  ;;  %1486 = vmatpush.bf16.msra.mxu3 %v5628_v6  ;;  %v7284_v0 = vld [vmem:[#allocation42_spill] sm:$0xff]  ;;  %v7285_v6 = vld [vmem:[#allocation43_spill] sm:$0xff] }
 0x143   :  { %1277 = vmatpush.bf16.msra.mxu0 %v7280_v17  ;;  %1303 = vmatpush.bf16.msra.mxu2 %v7281_v38 }
 0x144   :  { %1461 = vmatpush.bf16.msrb.mxu1 %v5642_v13  ;;  %1487 = vmatpush.bf16.msra.mxu3 %v7279_v12  ;;  %v7289_v13 = vld [vmem:[#allocation45_spill] sm:$0xff]  ;;  %v7290_v12 = vld [vmem:[#allocation83_spill] sm:$0xff] }
 0x147   :  { %1278 = vmatpush.bf16.msra.mxu0 %v7284_v0  ;;  %1304 = vmatpush.bf16.msra.mxu2 %v7285_v6 }
 0x148   :  { %1462 = vmatpush.bf16.msrb.mxu1 %v7282_v51  ;;  %1488 = vmatpush.bf16.msra.mxu3 %v7283_v48  ;;  %v7292_v51 = vld [vmem:[#allocation91_spill] sm:$0xff] }
 0x14b   :  { %1279 = vmatpush.bf16.msra.mxu0 %v7288_v14  ;;  %1305 = vmatpush.bf16.msra.mxu2 %v7289_v13  ;;  %v1119_v48 = vpop.f32.mrf.mxu1 }
 0x14c   :  { %1463 = vmatpush.bf16.msrb.mxu1 %v7286_v3  ;;  %1489 = vmatpush.bf16.msra.mxu3 %v7287_v40  ;;  %v7293_v3 = vld [vmem:[#allocation92_spill] sm:$0xff]  ;;  %v7294_v40 = vld [vmem:[#allocation95_spill] sm:$0xff] }
 0x14e   :  { %1280 = vmatmul.bf16.vlgmr.msra.gmra.mxu0 %v712_v33  ;;  %1306 = vmatmul.bf16.vlgmr.msra.gmra.mxu2 %v712_v33 }
 0x14f   :  { %1392 = vmatpush.bf16.msrb.mxu0 %v7290_v12  ;;  %1418 = vmatpush.bf16.msrb.mxu2 %v7291_v60 }
 0x150   :  { %1464 = vmatpush.bf16.msrb.mxu1 %v5692_v54  ;;  %1490 = vmatpush.bf16.msra.mxu3 %v5696_v46  ;;  %v7298_v54 = vld [vmem:[#allocation106_spill] sm:$0xff]  ;;  %v7299_v46 = vld [vmem:[#allocation107_spill] sm:$0xff] }
 0x152   :  { %v1145_v31 = vpop.f32.mrf.mxu3 }
 0x153   :  { %1393 = vmatpush.bf16.msrb.mxu0 %v7292_v51  ;;  %1419 = vmatpush.bf16.msrb.mxu2 %v7293_v3  ;;  %v1121_v42 = vpop.f32.mrf.mxu1  ;;  %v7301_v51 = vld [vmem:[#allocation114_spill] sm:$0xff]  ;;  %v7302_v3 = vld [vmem:[#allocation117_spill] sm:$0xff] }
 0x154   :  { %v7305_v42 = vld [vmem:[#allocation125_spill] sm:$0xff] }
 0x157   :  { %1394 = vmatpush.bf16.msrb.mxu0 %v7294_v40  ;;  %1420 = vmatpush.bf16.msrb.mxu2 %v7295_v15  ;;  %v7303_v40 = vld [vmem:[#allocation119_spill] sm:$0xff] }
 0x158   :  { %v7304_v15 = vld [vmem:[#allocation123_spill] sm:$0xff] }
 0x15a   :  { %v1147_v33 = vpop.f32.mrf.mxu3 }
 0x15b   :  { %1395 = vmatpush.bf16.msrb.mxu0 %v7296_v10  ;;  %1421 = vmatpush.bf16.msrb.mxu2 %v7297_v55  ;;  %v7306_v10 = vld [vmem:[#allocation126_spill] sm:$0xff] }
 0x15f   :  { %1396 = vmatpush.bf16.msrb.mxu0 %v7298_v54  ;;  %1422 = vmatpush.bf16.msrb.mxu2 %v7299_v46 }
 0x163   :  { %1397 = vmatpush.bf16.msrb.mxu0 %v7300_v22  ;;  %1423 = vmatpush.bf16.msrb.mxu2 %v7301_v51 }
 0x167   :  { %1398 = vmatpush.bf16.msrb.mxu0 %v7302_v3  ;;  %1424 = vmatpush.bf16.msrb.mxu2 %v7303_v40 }
 0x16b   :  { %1399 = vmatpush.bf16.msrb.mxu0 %v7304_v15  ;;  %1425 = vmatpush.bf16.msrb.mxu2 %v7305_v42 }
 0x16f   :  { %1444 = vmatpush.bf16.msra.mxu0 %v7306_v10  ;;  %1470 = vmatpush.bf16.msra.mxu2 %v5713_v47 }
 0x170   :  { %v5863_v33 = vpop.f32.mrf.mxu1 }
 0x173   :  { %1445 = vmatpush.bf16.msra.mxu0 %v5723_v43  ;;  %1471 = vmatpush.bf16.msra.mxu2 %v5726_v18 }
 0x177   :  { %1446 = vmatpush.bf16.msra.mxu0 %v5738_v26  ;;  %1472 = vmatpush.bf16.msra.mxu2 %v5742_v29  ;;  %v7309_v29 = vld [vmem:[#allocation69_spill] sm:$0xff] }
 0x178   :  { %v1173_v15 = vpop.f32.mrf.mxu1  ;;  %v1197_v42 = vpop.f32.mrf.mxu3  ;;  %v277_v26 = vadd.f32 %v7309_v29, %v5555_v24 }
 0x179   :  { %v384_v15 = vld [vmem:[%s6946_s5] sm:$0xf] }
 0x17b   :  { %1447 = vmatpush.bf16.msra.mxu0 %v5748_v57  ;;  %1473 = vmatpush.bf16.msra.mxu2 %v5751_v34 }
 0x17f   :  { %1448 = vmatpush.bf16.msra.mxu0 %v5760_v1  ;;  %1474 = vmatpush.bf16.msra.mxu2 %v5763_v11  ;;  %v5880_v1 = vperm.slane %v384_v15, 0 }
 0x180   :  { %v1199_v18 = vpop.f32.mrf.mxu3 }
 0x181   :  { %7307 = vst [vmem:[#allocation31_spill] sm:$0xff] %v5880_v1  ;;  %v5883_v18 = vperm.slane %v384_v15, 1 }
 0x183   :  { %1449 = vmatpush.bf16.msra.mxu0 %v5769_v20  ;;  %1475 = vmatpush.bf16.msra.mxu2 %v5771_v32  ;;  %7308 = vst [vmem:[#allocation32_spill] sm:$0xff] %v5883_v18 }
 0x187   :  { %1450 = vmatpush.bf16.msra.mxu0 %v5776_v28  ;;  %1476 = vmatpush.bf16.msra.mxu2 %v5779_v58 }
 0x18b   :  { %1451 = vmatpush.bf16.msra.mxu0 %v5784_v59  ;;  %1477 = vmatpush.bf16.msra.mxu2 %v5787_v37 }
 0x1aa   :  { %v1106_v11 = vpop.f32.mrf.mxu0 }
 0x1ab   :  { %v1107_v20 = vadd.f32 %v1106_v11, %v5880_v1  ;;  %v1294_v34 = vpop.f32.mrf.mxu1 }
 0x1ac   :  { %v1325_v10 = vadd.f32 %v1294_v34, %v277_v26 }
 0x1ad   :  { %v1120_v32 = vadd.f32 %v1119_v48, %v1107_v20 }
 0x1ae   :  { %v4257_v48 = vmul.f32 -1.442695, %v1325_v10 }
 0x1af   :  { %v4253_v28 = vmul.f32 -1.442695, %v1120_v32 }
 0x1b0   :  { %v1132_v57 = vpop.f32.mrf.mxu2 }
 0x1b1   :  { %4639 = vpow2.f32 %v4253_v28  ;;  %v1133_v59 = vadd.f32 %v1132_v57, %v5883_v18  ;;  %v1320_v58 = vpop.f32.mrf.mxu3 }
 0x1b2   :  { %v1108_v37 = vpop.f32.mrf.mxu0 }
 0x1b3   :  { %v1146_v43 = vadd.f32 %v1145_v31, %v1133_v59  ;;  %v1296_v47 = vpop.f32.mrf.mxu1  ;;  %v7310_v37 = vld [vmem:[#allocation58_spill] sm:$0xff]  ;;  %v5893_v59 = vperm.slane %v384_v15, 3 }
 0x1b4   :  { %v335_v18 = vadd.f32 %v7310_v37, %v5530_v62 }
 0x1b5   :  { %v4254_v40 = vmul.f32 -1.442695, %v1146_v43 }
 0x1b6   :  { %v1327_v47 = vadd.f32 %v1320_v58, %v335_v18 }
 0x1b7   :  { %v4640_v3 = vpop.eup %4639  ;;  %4641 = vpow2.f32 %v4254_v40  ;;  %v5896_v40 = vperm.slane %v384_v15, 2  ;;  %v7313_v15 = vld [vmem:[#allocation51_spill] sm:$0xff] }
 0x1b8   :  { %v5888_v11 = vadd.f32 1.0, %v4640_v3  ;;  %v1134_v20 = vpop.f32.mrf.mxu2 }
 0x1b9   :  { %v1322_v32 = vpop.f32.mrf.mxu3  ;;  %7311 = vst [vmem:[#allocation33_spill] sm:$0xff] %v5896_v40 }
 0x1ba   :  { %4643 = vrcp.f32 %v5888_v11  ;;  %v1158_v28 = vpop.f32.mrf.mxu0  ;;  %vm1210_vm0 = vweird.f32 %v5888_v11 }
 0x1bb   :  { %4645 = vpow2.f32 %v4257_v48  ;;  %v4258_v48 = vmul.f32 -1.442695, %v1327_v47  ;;  %v1159_v62 = vadd.f32 %v1158_v28, %v5896_v40 }
 0x1bd   :  { %v4642_v57 = vpop.eup %4641 }
 0x1be   :  { %v1223_v29 = vadd.f32 1.0, %v4642_v57 }
 0x1c0   :  { %v4644_v31 = vpop.eup %4643  ;;  %4647 = vrcp.f32 %v1223_v29  ;;  %v1184_v43 = vpop.f32.mrf.mxu2  ;;  %v1235_v47 = vand.u32 2147483648, %v1223_v29  ;;  %v1233_v28 = vand.u32 2147483647, %v1223_v29  ;;  %vm1229_vm15 = vweird.f32 %v1223_v29 }
 0x1c1   :  { %v1206_v26 = vmul.f32 %v4644_v31, %v5888_v11  ;;  %v4646_v10 = vpop.eup %4645  ;;  %v1185_v3 = vadd.f32 %v1184_v43, %v5893_v59  ;;  %4649 = vpow2.f32 %v4258_v48  ;;  %vm1211_vm14 = vweird.f32 %v4644_v31 }
 0x1c2   :  { %v1160_v34 = vpop.f32.mrf.mxu0  ;;  %v5899_v37 = vadd.f32 1.0, %v4646_v10  ;;  %vm1212_vm2 = vmor %vm1210_vm0, %vm1211_vm14  ;;  %vm1234_vm3 = vcmp.eq.f32.partialorder %v1233_v28, 8.507059e+37 }
 0x1c3   :  { %v1207_v20 = vsub.f32 1.0, %v1206_v26  ;;  %v1198_v32 = vadd.f32 %v1197_v42, %v1185_v3  ;;  %v7312_v34 = vld [vmem:[#allocation47_spill] sm:$0xff]  ;;  %v1172_v42 = vadd.f32 %v5863_v33, %v1159_v62 }
 0x1c4   :  { %v248_v22 = vadd.f32 %v7313_v15, %v7312_v34  ;;  %vm1356_vm10 = vweird.f32 %v5899_v37 }
 0x1c5   :  { %v4255_v1 = vmul.f32 -1.442695, %v1198_v32  ;;  %v1208_v58 = vmul.f32 %v4644_v31, %v1207_v20  ;;  %v1216_v20 = vand.u32 2147483648, %v5888_v11  ;;  %v1214_v32 = vand.u32 2147483647, %v5888_v11 }
 0x1c6   :  { %v4648_v24 = vpop.eup %4647 }
 0x1c7   :  { %v1225_v57 = vmul.f32 %v4648_v24, %v1223_v29  ;;  %4651 = vpow2.f32 %v4255_v1  ;;  %vm1230_vm13 = vweird.f32 %v4648_v24  ;;  %v1209_v10 = vadd.f32 %v4644_v31, %v1208_v58  ;;  %v4650_v1 = vpop.eup %4649 }
 0x1c8   :  { %v1186_v18 = vpop.f32.mrf.mxu2  ;;  %4653 = vrcp.f32 %v5899_v37  ;;  %vm1231_vm1 = vmor %vm1229_vm15, %vm1230_vm13  ;;  %v1217_v29 = vor.u32 1.1754944e-38, %v1216_v20  ;;  %vm1215_vm4 = vcmp.eq.f32.partialorder %v1214_v32, 8.507059e+37 }
 0x1c9   :  { %v1226_v51 = vsub.f32 1.0, %v1225_v57  ;;  %v1236_v18 = vor.u32 1.1754944e-38, %v1235_v47  ;;  %4655 = vtanh.f32 %v1172_v42  ;;  %v1213_v58 = vsel %vm1212_vm2, %v4644_v31, %v1209_v10 }
 0x1ca   :  { %v5913_v47 = vadd.f32 1.0, %v4650_v1 }
 0x1cb   :  { %v1227_v43 = vmul.f32 %v4648_v24, %v1226_v51  ;;  %v1281_v26 = vpop.f32.mrf.mxu0 }
 0x1cc   :  { %v1324_v3 = vadd.f32 %v1281_v26, %v248_v22  ;;  %v1218_v26 = vsel %vm1215_vm4, %v1217_v29, %v1213_v58  ;;  %v7316_v58 = vld [vmem:[#allocation57_spill] sm:$0xff]  ;;  %vm1376_vm2 = vweird.f32 %v5913_v47 }
 0x1cd   :  { %v1228_v48 = vadd.f32 %v4648_v24, %v1227_v43  ;;  %v4652_v57 = vpop.eup %4651 }
 0x1ce   :  { %v4256_v51 = vmul.f32 -1.442695, %v1324_v3  ;;  %v5909_v33 = vpop.eup %4653  ;;  %v1243_v22 = vadd.f32 1.0, %v4652_v57 }
 0x1cf   :  { %v1232_v62 = vsel %vm1231_vm1, %v4648_v24, %v1228_v48  ;;  %v1352_v3 = vmul.f32 %v5909_v33, %v5899_v37  ;;  %v4656_v42 = vpop.eup %4655  ;;  %vm1357_vm7 = vweird.f32 %v5909_v33 }
 0x1d0   :  { %4657 = vpow2.f32 %v4256_v51  ;;  %v1237_v15 = vsel %vm1234_vm3, %v1236_v18, %v1232_v62  ;;  %v1260_v34 = vmul.f32 %v4656_v42, %v1218_v26  ;;  %v1255_v1 = vand.u32 2147483648, %v1243_v22  ;;  %v7315_v62 = vld [vmem:[#allocation63_spill] sm:$0xff]  ;;  %vm5931_vm11 = vmor %vm1356_vm10, %vm1357_vm7 }
 0x1d1   :  { %v1307_v43 = vpop.f32.mrf.mxu2  ;;  %4659 = vrcp.f32 %v1243_v22  ;;  %v1259_v24 = vmul.f32 0.0, %v1237_v15  ;;  %v1353_v28 = vsub.f32 1.0, %v1352_v3  ;;  %v306_v29 = vadd.f32 %v7316_v58, %v7315_v62 }
 0x1d2   :  { %4661 = vrcp.f32 %v5913_v47  ;;  %v1253_v26 = vand.u32 2147483647, %v1243_v22  ;;  %vm1249_vm6 = vweird.f32 %v1243_v22 }
 0x1d3   :  { %v1283_v11 = vpop.f32.mrf.mxu0  ;;  %v5916_v20 = vadd.f32 %v1260_v34, %v1259_v24  ;;  %v1354_v18 = vmul.f32 %v5909_v33, %v1353_v28  ;;  %v1326_v34 = vadd.f32 %v1307_v43, %v306_v29  ;;  %v1256_v28 = vor.u32 1.1754944e-38, %v1255_v1 }
 0x1d4   :  { %vm1254_vm9 = vcmp.eq.f32.partialorder %v1253_v26, 8.507059e+37 }
 0x1d5   :  { %7314 = vst [vmem:[#allocation34_spill] sm:$0xff] %v5916_v20 }
 0x1d6   :  { %v4658_v48 = vpop.eup %4657 }
 0x1d7   :  { %v1331_v31 = vadd.f32 1.0, %v4658_v48  ;;  %v4660_v10 = vpop.eup %4659  ;;  %v1355_v48 = vadd.f32 %v5909_v33, %v1354_v18 }
 0x1d8   :  { %v1245_v32 = vmul.f32 %v4660_v10, %v1243_v22  ;;  %vm1250_vm5 = vweird.f32 %v4660_v10  ;;  %v5922_v11 = vpop.eup %4661  ;;  %v1360_v22 = vand.u32 2147483647, %v5899_v37 }
 0x1d9   :  { %4663 = vrcp.f32 %v1331_v31  ;;  %v1309_v51 = vpop.f32.mrf.mxu2  ;;  %vm1251_vm8 = vmor %vm1249_vm6, %vm1250_vm5  ;;  %v1343_v18 = vand.u32 2147483648, %v1331_v31  ;;  %vm1337_vm13 = vweird.f32 %v1331_v31  ;;  %vm1377_vm1 = vweird.f32 %v5922_v11 }
 0x1da   :  { %v1246_v57 = vsub.f32 1.0, %v1245_v32  ;;  %4665 = vtanh.f32 %v5916_v20  ;;  %v1362_v32 = vand.u32 2147483648, %v5899_v37  ;;  %v1372_v51 = vmul.f32 %v5922_v11, %v5913_v47  ;;  %vm1378_vm3 = vmor %vm1376_vm2, %vm1377_vm1 }
 0x1db   :  { %4667 = vtanh.f32 %v1326_v34  ;;  %v1341_v20 = vand.u32 2147483647, %v1331_v31  ;;  %vm1361_vm14 = vcmp.eq.f32.partialorder %v1360_v22, 8.507059e+37  ;;  %v1344_v37 = vor.u32 1.1754944e-38, %v1343_v18 }
 0x1dc   :  { %v1247_v15 = vmul.f32 %v4660_v10, %v1246_v57  ;;  %v1363_v26 = vor.u32 1.1754944e-38, %v1362_v32 }
 0x1dd   :  { %vm1342_vm0 = vcmp.eq.f32.partialorder %v1341_v20, 8.507059e+37  ;;  %v1382_v20 = vand.u32 2147483648, %v5913_v47 }
 0x1de   :  { %v1248_v24 = vadd.f32 %v4660_v10, %v1247_v15 }
 0x1df   :  { %v4664_v3 = vpop.eup %4663  ;;  %v1383_v22 = vor.u32 1.1754944e-38, %v1382_v20  ;;  %v7337_v20 = vld [vmem:[#allocation96_spill] sm:$0xff] }
 0x1e0   :  { %v1333_v42 = vmul.f32 %v4664_v3, %v1331_v31  ;;  %v1252_v57 = vsel %vm1251_vm8, %v4660_v10, %v1248_v24  ;;  %v4666_v58 = vpop.eup %4665  ;;  %vm1338_vm12 = vweird.f32 %v4664_v3  ;;  %v1359_v10 = vsel %vm5931_vm11, %v5909_v33, %v1355_v48 }
 0x1e1   :  { %v1257_v29 = vsel %vm1254_vm9, %v1256_v28, %v1252_v57  ;;  %v1373_v24 = vsub.f32 1.0, %v1372_v51  ;;  %vm1339_vm15 = vmor %vm1337_vm13, %vm1338_vm12  ;;  %v1364_v28 = vsel %vm1361_vm14, %v1363_v26, %v1359_v10  ;;  %v7319_v57 = vld [vmem:[#allocation28_spill] sm:$0xff]  ;;  %v7321_v51 = vld [vmem:[#allocation30_spill] sm:$0xff] }
 0x1e2   :  { %v1334_v43 = vsub.f32 1.0, %v1333_v42  ;;  %v1263_v1 = vmul.f32 %v4666_v58, %v1257_v29  ;;  %v7320_v58 = vld [vmem:[#allocation29_spill] sm:$0xff]  ;;  %v1386_v32 = vmul.f32 %v1364_v28, %v5802_v21  ;;  %v7324_v10 = vld [vmem:[#allocation39_spill] sm:$0xff]  ;;  %v7325_v26 = vld [vmem:[#allocation46_spill] sm:$0xff] }
 0x1e3   :  { %v1374_v33 = vmul.f32 %v5922_v11, %v1373_v24  ;;  %v7326_v24 = vld [vmem:[#allocation49_spill] sm:$0xff]  ;;  %v7329_v28 = vld [vmem:[#allocation54_spill] sm:$0xff] }
 0x1e4   :  { %v1335_v62 = vmul.f32 %v4664_v3, %v1334_v43  ;;  %v1264_v42 = vpack.c.bf16 %v1263_v1, %v1263_v1  ;;  %v4668_v43 = vpop.eup %4667 }
 0x1e6   :  { %v1336_v40 = vadd.f32 %v4664_v3, %v1335_v62  ;;  %1413 = vmatmul.bf16.vlgmr.msra.gmra.mxu1 %v1264_v42  ;;  %1439 = vmatmul.bf16.vlgmr.msrb.gmra.mxu3 %v1264_v42 }
 0x1e7   :  { %1580 = vmatpush.bf16.msra.mxu1 %v7319_v57  ;;  %1606 = vmatpush.bf16.msrb.mxu3 %v7320_v58 }
 0x1e8   :  { %v1340_v34 = vsel %vm1339_vm15, %v4664_v3, %v1336_v40  ;;  %v1375_v40 = vadd.f32 %v5922_v11, %v1374_v33  ;;  %v1380_v3 = vand.u32 2147483647, %v5913_v47  ;;  %v7322_v47 = vld [vmem:[#allocation37_spill] sm:$0xff]  ;;  %v7332_v33 = vld [vmem:[#allocation91_spill] sm:$0xff] }
 0x1e9   :  { %v1345_v48 = vsel %vm1342_vm0, %v1344_v37, %v1340_v34  ;;  %v7328_v37 = vld [vmem:[#allocation53_spill] sm:$0xff]  ;;  %v7330_v34 = vld [vmem:[#allocation55_spill] sm:$0xff] }
 0x1ea   :  { %v1387_v62 = vmul.f32 %v4668_v43, %v1345_v48  ;;  %v1379_v21 = vsel %vm1378_vm3, %v5922_v11, %v1375_v40  ;;  %vm1381_vm4 = vcmp.eq.f32.partialorder %v1380_v3, 8.507059e+37  ;;  %v7323_v11 = vld [vmem:[#allocation40_spill] sm:$0xff]  ;;  %v7336_v40 = vld [vmem:[#allocation95_spill] sm:$0xff]  ;;  %v7338_v3 = vld [vmem:[#allocation78_spill] sm:$0xff] }
 0x1eb   :  { %1581 = vmatpush.bf16.msra.mxu1 %v5347_v27  ;;  %1607 = vmatpush.bf16.msrb.mxu3 %v7321_v51  ;;  %v1384_v15 = vsel %vm1381_vm4, %v1383_v22, %v1379_v21  ;;  %v7331_v43 = vld [vmem:[#allocation56_spill] sm:$0xff]  ;;  %v7340_v22 = vld [vmem:[#allocation81_spill] sm:$0xff] }
 0x1ec   :  { %v5942_v31 = vadd.f32 %v1387_v62, %v1386_v32  ;;  %v7333_v48 = vld [vmem:[#allocation92_spill] sm:$0xff]  ;;  %v7335_v62 = vld [vmem:[#allocation73_spill] sm:$0xff] }
 0x1ed   :  { %v7334_v32 = vld [vmem:[#allocation72_spill] sm:$0xff] }
 0x1ee   :  { %4669 = vtanh.f32 %v5942_v31  ;;  %v7339_v21 = vld [vmem:[#allocation80_spill] sm:$0xff] }
 0x1ef   :  { %1582 = vmatpush.bf16.msra.mxu1 %v5359_v39  ;;  %1608 = vmatpush.bf16.msrb.mxu3 %v5367_v50 }
 0x1f3   :  { %1583 = vmatpush.bf16.msra.mxu1 %v5371_v53  ;;  %1609 = vmatpush.bf16.msrb.mxu3 %v5384_v63 }
 0x1f4   :  { %v4670_v29 = vpop.eup %4669 }
 0x1f5   :  { %v1390_v18 = vmul.f32 %v4670_v29, %v1384_v15  ;;  %v7341_v29 = vld [vmem:[#allocation82_spill] sm:$0xff]  ;;  %v7342_v15 = vld [vmem:[#allocation101_spill] sm:$0xff] }
 0x1f6   :  { %1465 = vmatmul.bf16.vlgmr.msrb.gmra.mxu1 %v1264_v42  ;;  %1491 = vmatmul.bf16.vlgmr.msra.gmra.mxu3 %v1264_v42  ;;  %v7327_v42 = vld [vmem:[#allocation50_spill] sm:$0xff] }
 0x1f7   :  { %v1391_v1 = vpack.c.bf16 %v1390_v18, %v1390_v18  ;;  %1584 = vmatpush.bf16.msra.mxu1 %v5410_v16  ;;  %1610 = vmatpush.bf16.msrb.mxu3 %v7322_v47  ;;  %v7343_v18 = vld [vmem:[#allocation85_spill] sm:$0xff] }
 0x1f9   :  { %1400 = vmatmul.bf16.vlgmr.msrb.gmra.mxu0 %v1391_v1  ;;  %1426 = vmatmul.bf16.vlgmr.msrb.gmra.mxu2 %v1391_v1 }
 0x1fa   :  { %1567 = vmatpush.bf16.msrb.mxu0 %v5334_v19  ;;  %1593 = vmatpush.bf16.msrb.mxu2 %v5355_v36 }
 0x1fb   :  { %1585 = vmatpush.bf16.msra.mxu1 %v7323_v11  ;;  %1611 = vmatpush.bf16.msrb.mxu3 %v7324_v10 }
 0x1fe   :  { %1568 = vmatpush.bf16.msrb.mxu0 %v5350_v30  ;;  %1594 = vmatpush.bf16.msrb.mxu2 %v5365_v44 }
 0x1ff   :  { %1586 = vmatpush.bf16.msra.mxu1 %v7325_v26  ;;  %1612 = vmatpush.bf16.msrb.mxu3 %v5425_v41 }
 0x202   :  { %1569 = vmatpush.bf16.msrb.mxu0 %v7270_v5  ;;  %1595 = vmatpush.bf16.msrb.mxu2 %v7271_v4 }
 0x203   :  { %1587 = vmatpush.bf16.msra.mxu1 %v5454_v2  ;;  %1613 = vmatpush.bf16.msrb.mxu3 %v5438_v52 }
 0x206   :  { %1570 = vmatpush.bf16.msrb.mxu0 %v7274_v49  ;;  %1596 = vmatpush.bf16.msrb.mxu2 %v7275_v8 }
 0x207   :  { %1700 = vmatpush.bf16.msrb.mxu1 %v7326_v24  ;;  %1726 = vmatpush.bf16.msra.mxu3 %v7327_v42 }
 0x208   :  { %1588 = vmatmul.bf16.vlgmr.msra.gmra.mxu1 %v1391_v1  ;;  %1614 = vmatmul.bf16.vlgmr.msrb.gmra.mxu3 %v1391_v1 }
 0x209   :  { %1452 = vmatmul.bf16.vlgmr.msra.gmra.mxu0 %v1391_v1  ;;  %1478 = vmatmul.bf16.vlgmr.msra.gmra.mxu2 %v1391_v1 }
 0x20a   :  { %1571 = vmatpush.bf16.msrb.mxu0 %v7277_v23  ;;  %1597 = vmatpush.bf16.msrb.mxu2 %v7278_v35 }
 0x20b   :  { %1701 = vmatpush.bf16.msrb.mxu1 %v7328_v37  ;;  %1727 = vmatpush.bf16.msra.mxu3 %v7329_v28 }
 0x20e   :  { %1572 = vmatpush.bf16.msrb.mxu0 %v7280_v17  ;;  %1598 = vmatpush.bf16.msrb.mxu2 %v7281_v38 }
 0x20f   :  { %1702 = vmatpush.bf16.msrb.mxu1 %v7330_v34  ;;  %1728 = vmatpush.bf16.msra.mxu3 %v7331_v43 }
 0x212   :  { %1573 = vmatpush.bf16.msrb.mxu0 %v7284_v0  ;;  %1599 = vmatpush.bf16.msrb.mxu2 %v7285_v6 }
 0x213   :  { %1703 = vmatpush.bf16.msrb.mxu1 %v5516_v9  ;;  %1729 = vmatpush.bf16.msra.mxu3 %v5518_v25 }
 0x216   :  { %1574 = vmatpush.bf16.msrb.mxu0 %v7288_v14  ;;  %1600 = vmatpush.bf16.msrb.mxu2 %v7289_v13  ;;  %v7381_v14 = vld [vmem:[#allocation79_spill] sm:$0xff] }
 0x217   :  { %1704 = vmatpush.bf16.msrb.mxu1 %v5522_v45  ;;  %1730 = vmatpush.bf16.msra.mxu3 %v5527_v61 }
 0x219   :  { %1575 = vmatmul.bf16.vlgmr.msrb.gmra.mxu0 %v1391_v1  ;;  %1601 = vmatmul.bf16.vlgmr.msrb.gmra.mxu2 %v1391_v1  ;;  %v7344_v1 = vld [vmem:[#allocation86_spill] sm:$0xff] }
 0x21a   :  { %1687 = vmatpush.bf16.msra.mxu0 %v7290_v12  ;;  %1713 = vmatpush.bf16.msra.mxu2 %v7291_v60 }
 0x21b   :  { %1705 = vmatpush.bf16.msrb.mxu1 %v5544_v7  ;;  %1731 = vmatpush.bf16.msra.mxu3 %v5546_v56 }
 0x21e   :  { %1688 = vmatpush.bf16.msra.mxu0 %v7332_v33  ;;  %1714 = vmatpush.bf16.msra.mxu2 %v7333_v48 }
 0x21f   :  { %1706 = vmatpush.bf16.msrb.mxu1 %v7334_v32  ;;  %1732 = vmatpush.bf16.msra.mxu3 %v7335_v62  ;;  %v7379_v32 = vld [vmem:[#allocation31_spill] sm:$0xff] }
 0x222   :  { %1689 = vmatpush.bf16.msra.mxu0 %v7336_v40  ;;  %1715 = vmatpush.bf16.msra.mxu2 %v7337_v20  ;;  %v7345_v20 = vld [vmem:[#allocation93_spill] sm:$0xff] }
 0x223   :  { %1707 = vmatpush.bf16.msrb.mxu1 %v7338_v3  ;;  %1733 = vmatpush.bf16.msra.mxu3 %v7339_v21  ;;  %v7346_v3 = vld [vmem:[#allocation94_spill] sm:$0xff]  ;;  %v7347_v21 = vld [vmem:[#allocation113_spill] sm:$0xff] }
 0x226   :  { %1690 = vmatpush.bf16.msra.mxu0 %v7342_v15  ;;  %1716 = vmatpush.bf16.msra.mxu2 %v7297_v55  ;;  %v7350_v15 = vld [vmem:[#allocation99_spill] sm:$0xff]  ;;  %v7351_v55 = vld [vmem:[#allocation117_spill] sm:$0xff] }
 0x227   :  { %1752 = vmatpush.bf16.msra.mxu1 %v7340_v22  ;;  %1778 = vmatpush.bf16.msrb.mxu3 %v7341_v29  ;;  %v7348_v22 = vld [vmem:[#allocation114_spill] sm:$0xff]  ;;  %v7349_v29 = vld [vmem:[#allocation97_spill] sm:$0xff] }
 0x22a   :  { %1691 = vmatpush.bf16.msra.mxu0 %v7298_v54  ;;  %1717 = vmatpush.bf16.msra.mxu2 %v7299_v46  ;;  %v7354_v54 = vld [vmem:[#allocation105_spill] sm:$0xff]  ;;  %v7355_v46 = vld [vmem:[#allocation123_spill] sm:$0xff] }
 0x22b   :  { %1753 = vmatpush.bf16.msra.mxu1 %v7343_v18  ;;  %1779 = vmatpush.bf16.msrb.mxu3 %v7344_v1  ;;  %v7352_v18 = vld [vmem:[#allocation119_spill] sm:$0xff]  ;;  %v7353_v1 = vld [vmem:[#allocation104_spill] sm:$0xff] }
 0x22e   :  { %1692 = vmatpush.bf16.msra.mxu0 %v7347_v21  ;;  %1718 = vmatpush.bf16.msra.mxu2 %v7348_v22  ;;  %v7358_v21 = vld [vmem:[#allocation127_spill] sm:$0xff]  ;;  %v7359_v22 = vld [vmem:[#allocation108_spill] sm:$0xff] }
 0x22f   :  { %1754 = vmatpush.bf16.msra.mxu1 %v7345_v20  ;;  %1780 = vmatpush.bf16.msrb.mxu3 %v7346_v3  ;;  %v7356_v20 = vld [vmem:[#allocation125_spill] sm:$0xff]  ;;  %v7357_v3 = vld [vmem:[#allocation126_spill] sm:$0xff] }
 0x232   :  { %1693 = vmatpush.bf16.msra.mxu0 %v7351_v55  ;;  %1719 = vmatpush.bf16.msra.mxu2 %v7352_v18  ;;  %v7362_v55 = vld [vmem:[#allocation129_spill] sm:$0xff]  ;;  %v7363_v18 = vld [vmem:[#allocation115_spill] sm:$0xff] }
 0x233   :  { %1755 = vmatpush.bf16.msra.mxu1 %v7349_v29  ;;  %1781 = vmatpush.bf16.msrb.mxu3 %v7350_v15  ;;  %v7360_v29 = vld [vmem:[#allocation109_spill] sm:$0xff]  ;;  %v7361_v15 = vld [vmem:[#allocation128_spill] sm:$0xff] }
 0x236   :  { %1694 = vmatpush.bf16.msra.mxu0 %v7355_v46  ;;  %1720 = vmatpush.bf16.msra.mxu2 %v7356_v20  ;;  %v7366_v46 = vld [vmem:[#allocation132_spill] sm:$0xff] }
 0x237   :  { %1756 = vmatpush.bf16.msra.mxu1 %v7353_v1  ;;  %1782 = vmatpush.bf16.msrb.mxu3 %v7354_v54  ;;  %v7364_v1 = vld [vmem:[#allocation116_spill] sm:$0xff]  ;;  %v7365_v54 = vld [vmem:[#allocation131_spill] sm:$0xff] }
 0x238   :  { %v7367_v20 = vld [vmem:[#allocation120_spill] sm:$0xff] }
 0x23a   :  { %1739 = vmatpush.bf16.msrb.mxu0 %v7357_v3  ;;  %1765 = vmatpush.bf16.msrb.mxu2 %v7358_v21  ;;  %v7368_v3 = vld [vmem:[#allocation122_spill] sm:$0xff]  ;;  %v7369_v21 = vld [vmem:[#allocation133_spill] sm:$0xff] }
 0x23b   :  { %1757 = vmatpush.bf16.msra.mxu1 %v7359_v22  ;;  %1783 = vmatpush.bf16.msrb.mxu3 %v7360_v29  ;;  %v7370_v22 = vld [vmem:[#allocation134_spill] sm:$0xff]  ;;  %v7371_v29 = vld [vmem:[#allocation135_spill] sm:$0xff] }
 0x23e   :  { %1740 = vmatpush.bf16.msrb.mxu0 %v7361_v15  ;;  %1766 = vmatpush.bf16.msrb.mxu2 %v7362_v55  ;;  %v7372_v15 = vld [vmem:[#allocation136_spill] sm:$0xff]  ;;  %v7373_v55 = vld [vmem:[#allocation137_spill] sm:$0xff] }
 0x23f   :  { %1758 = vmatpush.bf16.msra.mxu1 %v7363_v18  ;;  %1784 = vmatpush.bf16.msrb.mxu3 %v7364_v1  ;;  %v7374_v18 = vld [vmem:[#allocation138_spill] sm:$0xff]  ;;  %v7375_v1 = vld [vmem:[#allocation139_spill] sm:$0xff] }
 0x242   :  { %1741 = vmatpush.bf16.msrb.mxu0 %v7365_v54  ;;  %1767 = vmatpush.bf16.msrb.mxu2 %v7366_v46  ;;  %v7376_v54 = vld [vmem:[#allocation140_spill] sm:$0xff]  ;;  %v7377_v46 = vld [vmem:[#allocation141_spill] sm:$0xff] }
 0x243   :  { %1759 = vmatpush.bf16.msra.mxu1 %v7367_v20  ;;  %1785 = vmatpush.bf16.msrb.mxu3 %v7368_v3  ;;  %v7378_v20 = vld [vmem:[#allocation142_spill] sm:$0xff] }
 0x246   :  { %1742 = vmatpush.bf16.msrb.mxu0 %v7369_v21  ;;  %1768 = vmatpush.bf16.msrb.mxu2 %v7370_v22 }
 0x24a   :  { %1743 = vmatpush.bf16.msrb.mxu0 %v7371_v29  ;;  %1769 = vmatpush.bf16.msrb.mxu2 %v7372_v15 }
 0x24e   :  { %1744 = vmatpush.bf16.msrb.mxu0 %v7373_v55  ;;  %1770 = vmatpush.bf16.msrb.mxu2 %v7374_v18 }
 0x252   :  { %1745 = vmatpush.bf16.msrb.mxu0 %v7375_v1  ;;  %1771 = vmatpush.bf16.msrb.mxu2 %v7376_v54  ;;  %v7380_v1 = vld [vmem:[#allocation32_spill] sm:$0xff] }
 0x256   :  { %1746 = vmatpush.bf16.msrb.mxu0 %v7377_v46  ;;  %1772 = vmatpush.bf16.msrb.mxu2 %v7378_v20 }
 0x263   :  { %v1414_v3 = vpop.f32.mrf.mxu1 }
 0x269   :  { %v1440_v21 = vpop.f32.mrf.mxu3 }
 0x26b   :  { %v1416_v40 = vpop.f32.mrf.mxu1 }
 0x271   :  { %v1442_v22 = vpop.f32.mrf.mxu3 }
 0x273   :  { %v1466_v62 = vpop.f32.mrf.mxu1 }
 0x276   :  { %v1401_v29 = vpop.f32.mrf.mxu0 }
 0x277   :  { %v1402_v15 = vadd.f32 %v1401_v29, %v7379_v32 }
 0x279   :  { %v1415_v48 = vadd.f32 %v1414_v3, %v1402_v15  ;;  %v1492_v55 = vpop.f32.mrf.mxu3 }
 0x27b   :  { %v4259_v33 = vmul.f32 -1.442695, %v1415_v48  ;;  %v1468_v18 = vpop.f32.mrf.mxu1 }
 0x27c   :  { %v1427_v56 = vpop.f32.mrf.mxu2 }
 0x27d   :  { %4671 = vpow2.f32 %v4259_v33  ;;  %v1428_v54 = vadd.f32 %v1427_v56, %v7380_v1 }
 0x27e   :  { %v1403_v7 = vpop.f32.mrf.mxu0 }
 0x27f   :  { %v1441_v46 = vadd.f32 %v1440_v21, %v1428_v54 }
 0x281   :  { %v4260_v60 = vmul.f32 -1.442695, %v1441_v46  ;;  %v1494_v20 = vpop.f32.mrf.mxu3 }
 0x282   :  { %v7382_v20 = vld [vmem:[#allocation68_spill] sm:$0xff] }
 0x283   :  { %v4672_v12 = vpop.eup %4671  ;;  %4673 = vpow2.f32 %v4260_v60 }
 0x284   :  { %v6047_v40 = vadd.f32 1.0, %v4672_v12  ;;  %v1429_v13 = vpop.f32.mrf.mxu2 }
 0x285   :  { %v1589_v22 = vpop.f32.mrf.mxu1 }
 0x286   :  { %v1620_v29 = vadd.f32 %v1589_v22, %v7381_v14  ;;  %4675 = vrcp.f32 %v6047_v40  ;;  %v1453_v48 = vpop.f32.mrf.mxu0  ;;  %vm1505_vm7 = vweird.f32 %v6047_v40 }
 0x288   :  { %v4263_v3 = vmul.f32 -1.442695, %v1620_v29  ;;  %v7383_v29 = vld [vmem:[#allocation33_spill] sm:$0xff] }
 0x289   :  { %v4674_v15 = vpop.eup %4673 }
 0x28a   :  { %4677 = vpow2.f32 %v4263_v3  ;;  %v1518_v33 = vadd.f32 1.0, %v4674_v15  ;;  %v1454_v3 = vadd.f32 %v1453_v48, %v7383_v29 }
 0x28b   :  { %v1615_v56 = vpop.f32.mrf.mxu3 }
 0x28c   :  { %v4676_v7 = vpop.eup %4675  ;;  %4679 = vrcp.f32 %v1518_v33  ;;  %v1479_v46 = vpop.f32.mrf.mxu2  ;;  %v1622_v13 = vadd.f32 %v1615_v56, %v7382_v20  ;;  %v1467_v56 = vadd.f32 %v1466_v62, %v1454_v3  ;;  %v1528_v20 = vand.u32 2147483647, %v1518_v33 }
 0x28d   :  { %v1591_v54 = vpop.f32.mrf.mxu1  ;;  %v1501_v60 = vmul.f32 %v4676_v7, %v6047_v40  ;;  %v1480_v12 = vadd.f32 %v1479_v46, %v5893_v59  ;;  %v1511_v46 = vand.u32 2147483648, %v6047_v40  ;;  %vm1506_vm5 = vweird.f32 %v4676_v7 }
 0x28e   :  { %v1455_v21 = vpop.f32.mrf.mxu0  ;;  %v4264_v45 = vmul.f32 -1.442695, %v1622_v13  ;;  %vm1524_vm8 = vweird.f32 %v1518_v33  ;;  %vm6062_vm9 = vmor %vm1505_vm7, %vm1506_vm5  ;;  %vm1529_vm11 = vcmp.eq.f32.partialorder %v1528_v20, 8.507059e+37 }
 0x28f   :  { %v1502_v18 = vsub.f32 1.0, %v1501_v60  ;;  %v1493_v22 = vadd.f32 %v1492_v55, %v1480_v12  ;;  %v1530_v60 = vand.u32 2147483648, %v1518_v33  ;;  %v7384_v21 = vld [vmem:[#allocation59_spill] sm:$0xff]  ;;  %v1512_v3 = vor.u32 1.1754944e-38, %v1511_v46 }
 0x290   :  { %v4678_v14 = vpop.eup %4677 }
 0x291   :  { %v6054_v1 = vadd.f32 1.0, %v4678_v14  ;;  %v4261_v15 = vmul.f32 -1.442695, %v1493_v22  ;;  %v1503_v61 = vmul.f32 %v4676_v7, %v1502_v18 }
 0x292   :  { %v4680_v32 = vpop.eup %4679 }
 0x293   :  { %v1617_v54 = vpop.f32.mrf.mxu3  ;;  %v1520_v6 = vmul.f32 %v4680_v32, %v1518_v33  ;;  %4681 = vpow2.f32 %v4261_v15  ;;  %v1504_v55 = vadd.f32 %v4676_v7, %v1503_v61  ;;  %vm1525_vm6 = vweird.f32 %v4680_v32 }
 0x294   :  { %v1481_v0 = vpop.f32.mrf.mxu2  ;;  %4683 = vrcp.f32 %v6054_v1  ;;  %vm1526_vm10 = vmor %vm1524_vm8, %vm1525_vm6  ;;  %vm1651_vm2 = vweird.f32 %v6054_v1 }
 0x295   :  { %v1521_v25 = vsub.f32 1.0, %v1520_v6  ;;  %4685 = vpow2.f32 %v4264_v45  ;;  %v1509_v0 = vand.u32 2147483647, %v6047_v40  ;;  %v1531_v45 = vor.u32 1.1754944e-38, %v1530_v60  ;;  %v7387_v60 = vld [vmem:[#allocation34_spill] sm:$0xff] }
 0x296   :  { %v1576_v12 = vpop.f32.mrf.mxu0  ;;  %4687 = vtanh.f32 %v1467_v56 }
 0x297   :  { %v1522_v48 = vmul.f32 %v4680_v32, %v1521_v25  ;;  %v1619_v13 = vadd.f32 %v1576_v12, %v7384_v21  ;;  %v1508_v25 = vsel %vm6062_vm9, %v4676_v7, %v1504_v55  ;;  %vm1510_vm12 = vcmp.eq.f32.partialorder %v1509_v0, 8.507059e+37 }
 0x298   :  { %v1513_v12 = vsel %vm1510_vm12, %v1512_v3, %v1508_v25 }
 0x299   :  { %v4682_v6 = vpop.eup %4681  ;;  %v1523_v14 = vadd.f32 %v4680_v32, %v1522_v48  ;;  %v4262_v61 = vmul.f32 -1.442695, %v1619_v13 }
 0x29a   :  { %v1538_v18 = vadd.f32 1.0, %v4682_v6  ;;  %v6068_v22 = vpop.eup %4683 }
 0x29b   :  { %v1527_v15 = vsel %vm1526_vm10, %v4680_v32, %v1523_v14  ;;  %4689 = vpow2.f32 %v4262_v61  ;;  %v4686_v40 = vpop.eup %4685  ;;  %v1647_v56 = vmul.f32 %v6068_v22, %v6054_v1  ;;  %vm1652_vm15 = vweird.f32 %v6068_v22 }
 0x29c   :  { %v1532_v33 = vsel %vm1529_vm11, %v1531_v45, %v1527_v15  ;;  %4691 = vrcp.f32 %v1538_v18  ;;  %v1602_v54 = vpop.f32.mrf.mxu2  ;;  %v4688_v7 = vpop.eup %4687  ;;  %v6073_v55 = vadd.f32 1.0, %v4686_v40  ;;  %v1550_v25 = vand.u32 2147483648, %v1538_v18  ;;  %vm6089_vm3 = vmor %vm1651_vm2, %vm1652_vm15 }
 0x29d   :  { %v1554_v48 = vmul.f32 %v1532_v33, %v7387_v60  ;;  %v1555_v13 = vmul.f32 %v4688_v7, %v1513_v12  ;;  %v1648_v20 = vsub.f32 1.0, %v1647_v56  ;;  %v1548_v15 = vand.u32 2147483647, %v1538_v18  ;;  %v7388_v56 = vld [vmem:[#allocation66_spill] sm:$0xff] }
 0x29e   :  { %v1578_v21 = vpop.f32.mrf.mxu0  ;;  %4693 = vrcp.f32 %v6073_v55  ;;  %vm1544_vm14 = vweird.f32 %v1538_v18  ;;  %v1621_v60 = vadd.f32 %v1602_v54, %v7388_v56  ;;  %vm1671_vm10 = vweird.f32 %v6073_v55 }
 0x29f   :  { %v6075_v6 = vadd.f32 %v1555_v13, %v1554_v48  ;;  %v1649_v45 = vmul.f32 %v6068_v22, %v1648_v20  ;;  %v1551_v21 = vor.u32 1.1754944e-38, %v1550_v25  ;;  %vm1549_vm1 = vcmp.eq.f32.partialorder %v1548_v15, 8.507059e+37 }
 0x2a0   :  { %v1657_v20 = vand.u32 2147483648, %v6054_v1 }
 0x2a1   :  { %v4690_v46 = vpop.eup %4689  ;;  %v1650_v48 = vadd.f32 %v6068_v22, %v1649_v45 }
 0x2a2   :  { %v4692_v32 = vpop.eup %4691  ;;  %v1626_v0 = vadd.f32 1.0, %v4690_v46  ;;  %v1658_v56 = vor.u32 1.1754944e-38, %v1657_v20 }
 0x2a3   :  { %v1540_v62 = vmul.f32 %v4692_v32, %v1538_v18  ;;  %vm1545_vm13 = vweird.f32 %v4692_v32 }
 0x2a4   :  { %4695 = vrcp.f32 %v1626_v0  ;;  %v1604_v14 = vpop.f32.mrf.mxu2  ;;  %v6080_v40 = vpop.eup %4693  ;;  %vm1546_vm0 = vmor %vm1544_vm14, %vm1545_vm13  ;;  %v1638_v25 = vand.u32 2147483648, %v1626_v0  ;;  %v1636_v15 = vand.u32 2147483647, %v1626_v0  ;;  %vm1632_vm5 = vweird.f32 %v1626_v0 }
 0x2a5   :  { %v1541_v61 = vsub.f32 1.0, %v1540_v62  ;;  %4697 = vtanh.f32 %v6075_v6  ;;  %v1667_v18 = vmul.f32 %v6080_v40, %v6073_v55  ;;  %vm1672_vm9 = vweird.f32 %v6080_v40 }
 0x2a6   :  { %4699 = vtanh.f32 %v1621_v60  ;;  %vm1637_vm8 = vcmp.eq.f32.partialorder %v1636_v15, 8.507059e+37  ;;  %v1675_v14 = vand.u32 2147483647, %v6073_v55  ;;  %vm1673_vm11 = vmor %vm1671_vm10, %vm1672_vm9  ;;  %v7394_v15 = vld [vmem:[#allocation62_spill] sm:$0xff] }
 0x2a7   :  { %v1542_v3 = vmul.f32 %v4692_v32, %v1541_v61  ;;  %v1655_v61 = vand.u32 2147483647, %v6054_v1  ;;  %v1639_v1 = vor.u32 1.1754944e-38, %v1638_v25 }
 0x2a8   :  { %vm1676_vm12 = vcmp.eq.f32.partialorder %v1675_v14, 8.507059e+37  ;;  %v7409_v14 = vld [vmem:[#allocation80_spill] sm:$0xff] }
 0x2a9   :  { %v1543_v33 = vadd.f32 %v4692_v32, %v1542_v3  ;;  %vm1656_vm6 = vcmp.eq.f32.partialorder %v1655_v61, 8.507059e+37 }
 0x2aa   :  { %v4696_v12 = vpop.eup %4695 }
 0x2ab   :  { %v1628_v7 = vmul.f32 %v4696_v12, %v1626_v0  ;;  %v1547_v13 = vsel %vm1546_vm0, %v4692_v32, %v1543_v33  ;;  %v4698_v46 = vpop.eup %4697  ;;  %v1654_v32 = vsel %vm6089_vm3, %v6068_v22, %v1650_v48  ;;  %vm1633_vm4 = vweird.f32 %v4696_v12 }
 0x2ac   :  { %v1552_v62 = vsel %vm1549_vm1, %v1551_v21, %v1547_v13  ;;  %v1668_v21 = vsub.f32 1.0, %v1667_v18  ;;  %vm1634_vm7 = vmor %vm1632_vm5, %vm1633_vm4  ;;  %v4700_v60 = vpop.eup %4699 }
 0x2ad   :  { %v1629_v54 = vsub.f32 1.0, %v1628_v7  ;;  %v1558_v45 = vmul.f32 %v4698_v46, %v1552_v62  ;;  %v1659_v7 = vsel %vm1656_vm6, %v1658_v56, %v1654_v32  ;;  %v7396_v56 = vld [vmem:[#allocation44_spill] sm:$0xff] }
 0x2ae   :  { %v1669_v48 = vmul.f32 %v6080_v40, %v1668_v21  ;;  %v1681_v20 = vmul.f32 %v1659_v7, %v5942_v31  ;;  %v7397_v21 = vld [vmem:[#allocation45_spill] sm:$0xff]  ;;  %v7400_v7 = vld [vmem:[#allocation70_spill] sm:$0xff] }
 0x2af   :  { %v1630_v3 = vmul.f32 %v4696_v12, %v1629_v54  ;;  %v1559_v33 = vpack.c.bf16 %v1558_v45, %v1558_v45 }
 0x2b0   :  { %v1670_v62 = vadd.f32 %v6080_v40, %v1669_v48  ;;  %v7403_v48 = vld [vmem:[#allocation92_spill] sm:$0xff] }
 0x2b1   :  { %v1631_v13 = vadd.f32 %v4696_v12, %v1630_v3  ;;  %1708 = vmatmul.bf16.vlgmr.msrb.gmra.mxu1 %v1559_v33  ;;  %1734 = vmatmul.bf16.vlgmr.msra.gmra.mxu3 %v1559_v33  ;;  %v7393_v3 = vld [vmem:[#allocation43_spill] sm:$0xff] }
 0x2b2   :  { %1875 = vmatpush.bf16.msrb.mxu1 %v7319_v57  ;;  %1901 = vmatpush.bf16.msra.mxu3 %v7320_v58  ;;  %v1674_v31 = vsel %vm1673_vm11, %v6080_v40, %v1670_v62  ;;  %v7392_v40 = vld [vmem:[#allocation42_spill] sm:$0xff]  ;;  %v7407_v62 = vld [vmem:[#allocation96_spill] sm:$0xff] }
 0x2b3   :  { %v1635_v22 = vsel %vm1634_vm7, %v4696_v12, %v1631_v13  ;;  %v1677_v12 = vand.u32 2147483648, %v6073_v55  ;;  %v7391_v55 = vld [vmem:[#allocation61_spill] sm:$0xff]  ;;  %v7398_v13 = vld [vmem:[#allocation83_spill] sm:$0xff] }
 0x2b4   :  { %v1640_v46 = vsel %vm1637_vm8, %v1639_v1, %v1635_v22  ;;  %v7399_v1 = vld [vmem:[#allocation84_spill] sm:$0xff]  ;;  %v7401_v22 = vld [vmem:[#allocation71_spill] sm:$0xff] }
 0x2b5   :  { %v1682_v18 = vmul.f32 %v4700_v60, %v1640_v46  ;;  %v1678_v54 = vor.u32 1.1754944e-38, %v1677_v12  ;;  %v7402_v60 = vld [vmem:[#allocation91_spill] sm:$0xff]  ;;  %v7404_v46 = vld [vmem:[#allocation72_spill] sm:$0xff]  ;;  %v7408_v12 = vld [vmem:[#allocation78_spill] sm:$0xff] }
 0x2b6   :  { %1876 = vmatpush.bf16.msrb.mxu1 %v5347_v27  ;;  %1902 = vmatpush.bf16.msra.mxu3 %v7321_v51 }
 0x2b7   :  { %v6103_v0 = vadd.f32 %v1682_v18, %v1681_v20  ;;  %v1679_v45 = vsel %vm1676_vm12, %v1678_v54, %v1674_v31  ;;  %v7405_v20 = vld [vmem:[#allocation73_spill] sm:$0xff]  ;;  %v7406_v18 = vld [vmem:[#allocation95_spill] sm:$0xff]  ;;  %v7411_v54 = vld [vmem:[#allocation82_spill] sm:$0xff] }
 0x2b8   :  { %v7410_v31 = vld [vmem:[#allocation81_spill] sm:$0xff] }
 0x2b9   :  { %4701 = vtanh.f32 %v6103_v0 }
 0x2ba   :  { %1877 = vmatpush.bf16.msrb.mxu1 %v5359_v39  ;;  %1903 = vmatpush.bf16.msra.mxu3 %v5367_v50 }
 0x2be   :  { %1878 = vmatpush.bf16.msrb.mxu1 %v5371_v53  ;;  %1904 = vmatpush.bf16.msra.mxu3 %v5384_v63 }
 0x2bf   :  { %v4702_v61 = vpop.eup %4701 }
 0x2c0   :  { %v1685_v25 = vmul.f32 %v4702_v61, %v1679_v45  ;;  %v7412_v61 = vld [vmem:[#allocation101_spill] sm:$0xff]  ;;  %v7413_v45 = vld [vmem:[#allocation103_spill] sm:$0xff] }
 0x2c1   :  { %1760 = vmatmul.bf16.vlgmr.msra.gmra.mxu1 %v1559_v33  ;;  %1786 = vmatmul.bf16.vlgmr.msrb.gmra.mxu3 %v1559_v33  ;;  %v7395_v33 = vld [vmem:[#allocation64_spill] sm:$0xff] }
 0x2c2   :  { %v1686_v32 = vpack.c.bf16 %v1685_v25, %v1685_v25  ;;  %1879 = vmatpush.bf16.msrb.mxu1 %v5410_v16  ;;  %1905 = vmatpush.bf16.msra.mxu3 %v7322_v47  ;;  %v7414_v25 = vld [vmem:[#allocation85_spill] sm:$0xff] }
 0x2c4   :  { %1695 = vmatmul.bf16.vlgmr.msra.gmra.mxu0 %v1686_v32  ;;  %1721 = vmatmul.bf16.vlgmr.msra.gmra.mxu2 %v1686_v32 }
 0x2c5   :  { %1862 = vmatpush.bf16.msra.mxu0 %v5334_v19  ;;  %1888 = vmatpush.bf16.msra.mxu2 %v5355_v36 }
 0x2c6   :  { %1880 = vmatpush.bf16.msrb.mxu1 %v7323_v11  ;;  %1906 = vmatpush.bf16.msra.mxu3 %v7324_v10 }
 0x2c9   :  { %1863 = vmatpush.bf16.msra.mxu0 %v5350_v30  ;;  %1889 = vmatpush.bf16.msra.mxu2 %v5365_v44 }
 0x2ca   :  { %1881 = vmatpush.bf16.msrb.mxu1 %v7325_v26  ;;  %1907 = vmatpush.bf16.msra.mxu3 %v5425_v41 }
 0x2cd   :  { %1864 = vmatpush.bf16.msra.mxu0 %v7270_v5  ;;  %1890 = vmatpush.bf16.msra.mxu2 %v7271_v4 }
 0x2ce   :  { %1882 = vmatpush.bf16.msrb.mxu1 %v5454_v2  ;;  %1908 = vmatpush.bf16.msra.mxu3 %v5438_v52 }
 0x2d1   :  { %1865 = vmatpush.bf16.msra.mxu0 %v7274_v49  ;;  %1883 = vmatmul.bf16.vlgmr.msrb.gmra.mxu1 %v1686_v32 }
 0x2d2   :  { %1995 = vmatpush.bf16.msra.mxu1 %v7326_v24  ;;  %2021 = vmatpush.bf16.msrb.mxu3 %v7327_v42 }
 0x2d3   :  { %1891 = vmatpush.bf16.msra.mxu2 %v7275_v8  ;;  %1909 = vmatmul.bf16.vlgmr.msra.gmra.mxu3 %v1686_v32 }
 0x2d4   :  { %1747 = vmatmul.bf16.vlgmr.msrb.gmra.mxu0 %v1686_v32  ;;  %1773 = vmatmul.bf16.vlgmr.msrb.gmra.mxu2 %v1686_v32 }
 0x2d5   :  { %1866 = vmatpush.bf16.msra.mxu0 %v7277_v23 }
 0x2d6   :  { %1996 = vmatpush.bf16.msra.mxu1 %v7328_v37  ;;  %2022 = vmatpush.bf16.msrb.mxu3 %v7329_v28 }
 0x2d7   :  { %1892 = vmatpush.bf16.msra.mxu2 %v7278_v35 }
 0x2d9   :  { %1867 = vmatpush.bf16.msra.mxu0 %v7280_v17 }
 0x2da   :  { %1997 = vmatpush.bf16.msra.mxu1 %v7330_v34  ;;  %2023 = vmatpush.bf16.msrb.mxu3 %v7331_v43 }
 0x2db   :  { %1893 = vmatpush.bf16.msra.mxu2 %v7281_v38 }
 0x2dd   :  { %1868 = vmatpush.bf16.msra.mxu0 %v7392_v40 }
 0x2de   :  { %1998 = vmatpush.bf16.msra.mxu1 %v5516_v9  ;;  %2024 = vmatpush.bf16.msrb.mxu3 %v7391_v55  ;;  %v7458_v9 = vld [vmem:[#allocation47_spill] sm:$0xff] }
 0x2df   :  { %1894 = vmatpush.bf16.msra.mxu2 %v7393_v3 }
 0x2e1   :  { %1869 = vmatpush.bf16.msra.mxu0 %v7396_v56  ;;  %v7454_v56 = vld [vmem:[#allocation74_spill] sm:$0xff] }
 0x2e2   :  { %1999 = vmatpush.bf16.msra.mxu1 %v7394_v15  ;;  %2025 = vmatpush.bf16.msrb.mxu3 %v7395_v33  ;;  %v7455_v33 = vld [vmem:[#allocation90_spill] sm:$0xff] }
 0x2e3   :  { %1895 = vmatpush.bf16.msra.mxu2 %v7397_v21 }
 0x2e4   :  { %1870 = vmatmul.bf16.vlgmr.msra.gmra.mxu0 %v1686_v32 }
 0x2e5   :  { %1982 = vmatpush.bf16.msrb.mxu0 %v7398_v13 }
 0x2e6   :  { %2000 = vmatpush.bf16.msra.mxu1 %v7400_v7  ;;  %2026 = vmatpush.bf16.msrb.mxu3 %v7401_v22 }
 0x2e7   :  { %2008 = vmatpush.bf16.msrb.mxu2 %v7399_v1 }
 0x2e8   :  { %1896 = vmatmul.bf16.vlgmr.msra.gmra.mxu2 %v1686_v32  ;;  %v7415_v32 = vld [vmem:[#allocation86_spill] sm:$0xff] }
 0x2e9   :  { %1983 = vmatpush.bf16.msrb.mxu0 %v7402_v60  ;;  %v7452_v60 = vld [vmem:[#allocation31_spill] sm:$0xff] }
 0x2ea   :  { %2001 = vmatpush.bf16.msra.mxu1 %v7404_v46  ;;  %2027 = vmatpush.bf16.msrb.mxu3 %v7405_v20  ;;  %v7416_v20 = vld [vmem:[#allocation106_spill] sm:$0xff] }
 0x2eb   :  { %2009 = vmatpush.bf16.msrb.mxu2 %v7403_v48 }
 0x2ed   :  { %1984 = vmatpush.bf16.msrb.mxu0 %v7406_v18  ;;  %v7417_v18 = vld [vmem:[#allocation107_spill] sm:$0xff] }
 0x2ee   :  { %2002 = vmatpush.bf16.msra.mxu1 %v7408_v12  ;;  %2028 = vmatpush.bf16.msrb.mxu3 %v7409_v14  ;;  %v7419_v12 = vld [vmem:[#allocation94_spill] sm:$0xff]  ;;  %v7420_v14 = vld [vmem:[#allocation113_spill] sm:$0xff] }
 0x2ef   :  { %2010 = vmatpush.bf16.msrb.mxu2 %v7407_v62  ;;  %v7418_v62 = vld [vmem:[#allocation93_spill] sm:$0xff] }
 0x2f1   :  { %1985 = vmatpush.bf16.msrb.mxu0 %v7412_v61  ;;  %v7423_v61 = vld [vmem:[#allocation99_spill] sm:$0xff] }
 0x2f2   :  { %2047 = vmatpush.bf16.msrb.mxu1 %v7410_v31  ;;  %2073 = vmatpush.bf16.msra.mxu3 %v7411_v54  ;;  %v7421_v31 = vld [vmem:[#allocation114_spill] sm:$0xff]  ;;  %v7422_v54 = vld [vmem:[#allocation97_spill] sm:$0xff] }
 0x2f3   :  { %2011 = vmatpush.bf16.msrb.mxu2 %v7413_v45  ;;  %v7424_v45 = vld [vmem:[#allocation117_spill] sm:$0xff] }
 0x2f5   :  { %1986 = vmatpush.bf16.msrb.mxu0 %v7416_v20  ;;  %v7427_v20 = vld [vmem:[#allocation105_spill] sm:$0xff] }
 0x2f6   :  { %2048 = vmatpush.bf16.msrb.mxu1 %v7414_v25  ;;  %2074 = vmatpush.bf16.msra.mxu3 %v7415_v32  ;;  %v7425_v25 = vld [vmem:[#allocation119_spill] sm:$0xff]  ;;  %v7426_v32 = vld [vmem:[#allocation104_spill] sm:$0xff] }
 0x2f7   :  { %2012 = vmatpush.bf16.msrb.mxu2 %v7417_v18  ;;  %v7428_v18 = vld [vmem:[#allocation123_spill] sm:$0xff] }
 0x2f9   :  { %1987 = vmatpush.bf16.msrb.mxu0 %v7420_v14  ;;  %v7431_v14 = vld [vmem:[#allocation127_spill] sm:$0xff] }
 0x2fa   :  { %2049 = vmatpush.bf16.msrb.mxu1 %v7418_v62  ;;  %2075 = vmatpush.bf16.msra.mxu3 %v7419_v12  ;;  %v7429_v62 = vld [vmem:[#allocation125_spill] sm:$0xff]  ;;  %v7430_v12 = vld [vmem:[#allocation126_spill] sm:$0xff] }
 0x2fb   :  { %2013 = vmatpush.bf16.msrb.mxu2 %v7421_v31  ;;  %v7432_v31 = vld [vmem:[#allocation108_spill] sm:$0xff] }
 0x2fd   :  { %1988 = vmatpush.bf16.msrb.mxu0 %v7424_v45  ;;  %v7435_v45 = vld [vmem:[#allocation129_spill] sm:$0xff] }
 0x2fe   :  { %2050 = vmatpush.bf16.msrb.mxu1 %v7422_v54  ;;  %2076 = vmatpush.bf16.msra.mxu3 %v7423_v61  ;;  %v7433_v54 = vld [vmem:[#allocation109_spill] sm:$0xff]  ;;  %v7434_v61 = vld [vmem:[#allocation128_spill] sm:$0xff] }
 0x2ff   :  { %2014 = vmatpush.bf16.msrb.mxu2 %v7425_v25  ;;  %v7436_v25 = vld [vmem:[#allocation115_spill] sm:$0xff] }
 0x301   :  { %1989 = vmatpush.bf16.msrb.mxu0 %v7428_v18  ;;  %v7439_v18 = vld [vmem:[#allocation132_spill] sm:$0xff] }
 0x302   :  { %2051 = vmatpush.bf16.msrb.mxu1 %v7426_v32  ;;  %2077 = vmatpush.bf16.msra.mxu3 %v7427_v20  ;;  %v7437_v32 = vld [vmem:[#allocation116_spill] sm:$0xff]  ;;  %v7438_v20 = vld [vmem:[#allocation131_spill] sm:$0xff] }
 0x303   :  { %2015 = vmatpush.bf16.msrb.mxu2 %v7429_v62  ;;  %v7440_v62 = vld [vmem:[#allocation120_spill] sm:$0xff] }
 0x305   :  { %2034 = vmatpush.bf16.msra.mxu0 %v7430_v12  ;;  %v7441_v12 = vld [vmem:[#allocation122_spill] sm:$0xff] }
 0x306   :  { %2052 = vmatpush.bf16.msrb.mxu1 %v7432_v31  ;;  %2078 = vmatpush.bf16.msra.mxu3 %v7433_v54  ;;  %v7443_v31 = vld [vmem:[#allocation134_spill] sm:$0xff]  ;;  %v7444_v54 = vld [vmem:[#allocation135_spill] sm:$0xff] }
 0x307   :  { %2060 = vmatpush.bf16.msra.mxu2 %v7431_v14  ;;  %v7442_v14 = vld [vmem:[#allocation133_spill] sm:$0xff] }
 0x309   :  { %2035 = vmatpush.bf16.msra.mxu0 %v7434_v61  ;;  %v7445_v61 = vld [vmem:[#allocation136_spill] sm:$0xff] }
 0x30a   :  { %2053 = vmatpush.bf16.msrb.mxu1 %v7436_v25  ;;  %2079 = vmatpush.bf16.msra.mxu3 %v7437_v32  ;;  %v7447_v25 = vld [vmem:[#allocation138_spill] sm:$0xff]  ;;  %v7448_v32 = vld [vmem:[#allocation139_spill] sm:$0xff] }
 0x30b   :  { %2061 = vmatpush.bf16.msra.mxu2 %v7435_v45  ;;  %v7446_v45 = vld [vmem:[#allocation137_spill] sm:$0xff] }
 0x30d   :  { %2036 = vmatpush.bf16.msra.mxu0 %v7438_v20  ;;  %v7449_v20 = vld [vmem:[#allocation140_spill] sm:$0xff] }
 0x30e   :  { %2054 = vmatpush.bf16.msrb.mxu1 %v7440_v62  ;;  %2080 = vmatpush.bf16.msra.mxu3 %v7441_v12  ;;  %v7451_v62 = vld [vmem:[#allocation142_spill] sm:$0xff] }
 0x30f   :  { %2062 = vmatpush.bf16.msra.mxu2 %v7439_v18  ;;  %v7450_v18 = vld [vmem:[#allocation141_spill] sm:$0xff] }
 0x311   :  { %2037 = vmatpush.bf16.msra.mxu0 %v7442_v14 }
 0x313   :  { %2063 = vmatpush.bf16.msra.mxu2 %v7443_v31 }
 0x315   :  { %2038 = vmatpush.bf16.msra.mxu0 %v7444_v54 }
 0x317   :  { %2064 = vmatpush.bf16.msra.mxu2 %v7445_v61 }
 0x319   :  { %2039 = vmatpush.bf16.msra.mxu0 %v7446_v45 }
 0x31b   :  { %2065 = vmatpush.bf16.msra.mxu2 %v7447_v25 }
 0x31d   :  { %2040 = vmatpush.bf16.msra.mxu0 %v7448_v32  ;;  %v7453_v32 = vld [vmem:[#allocation32_spill] sm:$0xff] }
 0x31f   :  { %2066 = vmatpush.bf16.msra.mxu2 %v7449_v20 }
 0x321   :  { %2041 = vmatpush.bf16.msra.mxu0 %v7450_v18 }
 0x323   :  { %2067 = vmatpush.bf16.msra.mxu2 %v7451_v62 }
 0x32e   :  { %v1709_v12 = vpop.f32.mrf.mxu1 }
 0x334   :  { %v1735_v14 = vpop.f32.mrf.mxu3 }
 0x336   :  { %v1711_v46 = vpop.f32.mrf.mxu1 }
 0x337   :  { %v282_v46 = vadd.f32 %v7455_v33, %v7454_v56 }
 0x33c   :  { %v1737_v31 = vpop.f32.mrf.mxu3 }
 0x33e   :  { %v1761_v48 = vpop.f32.mrf.mxu1 }
 0x341   :  { %v1696_v54 = vpop.f32.mrf.mxu0 }
 0x342   :  { %v1697_v61 = vadd.f32 %v1696_v54, %v7452_v60 }
 0x344   :  { %v1710_v22 = vadd.f32 %v1709_v12, %v1697_v61  ;;  %v1787_v45 = vpop.f32.mrf.mxu3 }
 0x346   :  { %v4265_v7 = vmul.f32 -1.442695, %v1710_v22  ;;  %v1763_v25 = vpop.f32.mrf.mxu1 }
 0x347   :  { %v1722_v1 = vpop.f32.mrf.mxu2 }
 0x348   :  { %4703 = vpow2.f32 %v4265_v7  ;;  %v1723_v20 = vadd.f32 %v1722_v1, %v7453_v32 }
 0x349   :  { %v1698_v13 = vpop.f32.mrf.mxu0 }
 0x34a   :  { %v1736_v18 = vadd.f32 %v1735_v14, %v1723_v20  ;;  %v7456_v20 = vld [vmem:[#allocation65_spill] sm:$0xff] }
 0x34c   :  { %v4266_v21 = vmul.f32 -1.442695, %v1736_v18  ;;  %v1789_v62 = vpop.f32.mrf.mxu3  ;;  %v7457_v18 = vld [vmem:[#allocation76_spill] sm:$0xff] }
 0x34d   :  { %v340_v62 = vadd.f32 %v7457_v18, %v7456_v20 }
 0x34e   :  { %v4704_v31 = vpop.eup %4703  ;;  %4705 = vpow2.f32 %v4266_v21  ;;  %v1884_v15 = vpop.f32.mrf.mxu1 }
 0x34f   :  { %v6208_v3 = vadd.f32 1.0, %v4704_v31  ;;  %v1915_v12 = vadd.f32 %v1884_v15, %v282_v46  ;;  %v1724_v54 = vpop.f32.mrf.mxu2 }
 0x351   :  { %4707 = vrcp.f32 %v6208_v3  ;;  %v4269_v22 = vmul.f32 -1.442695, %v1915_v12  ;;  %v1748_v7 = vpop.f32.mrf.mxu0  ;;  %vm1800_vm15 = vweird.f32 %v6208_v3 }
 0x353   :  { %4709 = vpow2.f32 %v4269_v22  ;;  %v1749_v22 = vadd.f32 %v1748_v7, %v7383_v29 }
 0x354   :  { %v4706_v61 = vpop.eup %4705 }
 0x355   :  { %v1813_v13 = vadd.f32 1.0, %v4706_v61 }
 0x356   :  { %v1910_v1 = vpop.f32.mrf.mxu3  ;;  %v1886_v14 = vpop.f32.mrf.mxu1 }
 0x357   :  { %v4708_v33 = vpop.eup %4707  ;;  %4711 = vrcp.f32 %v1813_v13  ;;  %v1774_v21 = vpop.f32.mrf.mxu2  ;;  %v1917_v31 = vadd.f32 %v1910_v1, %v340_v62  ;;  %v7459_v1 = vld [vmem:[#allocation67_spill] sm:$0xff]  ;;  %vm1819_vm0 = vweird.f32 %v1813_v13 }
 0x358   :  { %v1796_v25 = vmul.f32 %v4708_v33, %v6208_v3  ;;  %v1775_v15 = vadd.f32 %v1774_v21, %v5893_v59  ;;  %v253_v62 = vadd.f32 %v7459_v1, %v7458_v9  ;;  %vm1801_vm13 = vweird.f32 %v4708_v33  ;;  %v7491_v9 = vld [vmem:[#allocation86_spill] sm:$0xff] }
 0x359   :  { %v1750_v46 = vpop.f32.mrf.mxu0  ;;  %v4710_v54 = vpop.eup %4709  ;;  %v4270_v61 = vmul.f32 -1.442695, %v1917_v31  ;;  %vm6223_vm1 = vmor %vm1800_vm15, %vm1801_vm13 }
 0x35a   :  { %v1797_v12 = vsub.f32 1.0, %v1796_v25  ;;  %v1788_v56 = vadd.f32 %v1787_v45, %v1775_v15  ;;  %v6216_v60 = vadd.f32 1.0, %v4710_v54  ;;  %v1762_v46 = vadd.f32 %v1761_v48, %v1749_v22 }
 0x35b   :  { %v1825_v25 = vand.u32 2147483648, %v1813_v13  ;;  %v1823_v45 = vand.u32 2147483647, %v1813_v13  ;;  %v1804_v48 = vand.u32 2147483647, %v6208_v3 }
 0x35c   :  { %v4267_v18 = vmul.f32 -1.442695, %v1788_v56  ;;  %v1798_v40 = vmul.f32 %v4708_v33, %v1797_v12  ;;  %vm1946_vm10 = vweird.f32 %v6216_v60 }
 0x35d   :  { %v4712_v32 = vpop.eup %4711  ;;  %vm1824_vm3 = vcmp.eq.f32.partialorder %v1823_v45, 8.507059e+37  ;;  %vm1805_vm4 = vcmp.eq.f32.partialorder %v1804_v48, 8.507059e+37 }
 0x35e   :  { %v1912_v14 = vpop.f32.mrf.mxu3  ;;  %v1815_v20 = vmul.f32 %v4712_v32, %v1813_v13  ;;  %4713 = vpow2.f32 %v4267_v18  ;;  %vm1820_vm14 = vweird.f32 %v4712_v32  ;;  %v1799_v56 = vadd.f32 %v4708_v33, %v1798_v40 }
 0x35f   :  { %v1776_v55 = vpop.f32.mrf.mxu2  ;;  %4715 = vpow2.f32 %v4270_v61  ;;  %vm1821_vm2 = vmor %vm1819_vm0, %vm1820_vm14  ;;  %v1826_v61 = vor.u32 1.1754944e-38, %v1825_v25 }
 0x360   :  { %v1816_v21 = vsub.f32 1.0, %v1815_v20  ;;  %4717 = vrcp.f32 %v6216_v60  ;;  %v1806_v55 = vand.u32 2147483648, %v6208_v3  ;;  %v1803_v40 = vsel %vm6223_vm1, %v4708_v33, %v1799_v56 }
 0x361   :  { %v1871_v7 = vpop.f32.mrf.mxu0  ;;  %4719 = vtanh.f32 %v1762_v46 }
 0x362   :  { %v1817_v31 = vmul.f32 %v4712_v32, %v1816_v21  ;;  %v1914_v15 = vadd.f32 %v1871_v7, %v253_v62  ;;  %v1807_v62 = vor.u32 1.1754944e-38, %v1806_v55 }
 0x364   :  { %v1818_v20 = vadd.f32 %v4712_v32, %v1817_v31  ;;  %v4268_v12 = vmul.f32 -1.442695, %v1914_v15  ;;  %v4714_v22 = vpop.eup %4713  ;;  %v1808_v7 = vsel %vm1805_vm4, %v1807_v62, %v1803_v40  ;;  %v7463_v62 = vld [vmem:[#allocation75_spill] sm:$0xff] }
 0x365   :  { %v4716_v18 = vpop.eup %4715  ;;  %v1833_v1 = vadd.f32 1.0, %v4714_v22 }
 0x366   :  { %v1822_v14 = vsel %vm1821_vm2, %v4712_v32, %v1818_v20  ;;  %v6230_v13 = vpop.eup %4717  ;;  %4721 = vpow2.f32 %v4268_v12  ;;  %v6235_v33 = vadd.f32 1.0, %v4716_v18 }
 0x367   :  { %v1827_v21 = vsel %vm1824_vm3, %v1826_v61, %v1822_v14  ;;  %4723 = vrcp.f32 %v1833_v1  ;;  %v1942_v46 = vmul.f32 %v6230_v13, %v6216_v60  ;;  %v4720_v15 = vpop.eup %4719  ;;  %v1843_v40 = vand.u32 2147483647, %v1833_v1  ;;  %v7462_v14 = vld [vmem:[#allocation63_spill] sm:$0xff] }
 0x368   :  { %v1849_v25 = vmul.f32 %v1827_v21, %v6075_v6  ;;  %v1850_v32 = vmul.f32 %v4720_v15, %v1808_v7  ;;  %4725 = vrcp.f32 %v6235_v33  ;;  %v1845_v6 = vand.u32 2147483648, %v1833_v1 }
 0x369   :  { %v1873_v31 = vpop.f32.mrf.mxu0  ;;  %v1943_v54 = vsub.f32 1.0, %v1942_v46  ;;  %v311_v21 = vadd.f32 %v7463_v62, %v7462_v14  ;;  %vm1839_vm6 = vweird.f32 %v1833_v1  ;;  %vm1947_vm7 = vweird.f32 %v6230_v13 }
 0x36a   :  { %v6237_v55 = vadd.f32 %v1850_v32, %v1849_v25  ;;  %v1846_v32 = vor.u32 1.1754944e-38, %v1845_v6  ;;  %vm1844_vm9 = vcmp.eq.f32.partialorder %v1843_v40, 8.507059e+37  ;;  %vm6252_vm11 = vmor %vm1946_vm10, %vm1947_vm7  ;;  %vm1966_vm2 = vweird.f32 %v6235_v33 }
 0x36b   :  { %v1897_v3 = vpop.f32.mrf.mxu2  ;;  %v1944_v61 = vmul.f32 %v6230_v13, %v1943_v54 }
 0x36c   :  { %v4722_v45 = vpop.eup %4721  ;;  %v1916_v25 = vadd.f32 %v1897_v3, %v311_v21 }
 0x36d   :  { %v4724_v56 = vpop.eup %4723  ;;  %v1921_v20 = vadd.f32 1.0, %v4722_v45  ;;  %v1945_v15 = vadd.f32 %v6230_v13, %v1944_v61  ;;  %v1950_v61 = vand.u32 2147483647, %v6216_v60 }
 0x36e   :  { %v1835_v48 = vmul.f32 %v4724_v56, %v1833_v1  ;;  %vm1840_vm5 = vweird.f32 %v4724_v56  ;;  %v6244_v7 = vpop.eup %4725 }
 0x36f   :  { %4727 = vrcp.f32 %v1921_v20  ;;  %vm1841_vm8 = vmor %vm1839_vm6, %vm1840_vm5  ;;  %v1962_v1 = vmul.f32 %v6244_v7, %v6235_v33  ;;  %v1933_v62 = vand.u32 2147483648, %v1921_v20  ;;  %v1931_v21 = vand.u32 2147483647, %v1921_v20 }
 0x370   :  { %v1836_v22 = vsub.f32 1.0, %v1835_v48  ;;  %4729 = vtanh.f32 %v6237_v55  ;;  %vm1927_vm13 = vweird.f32 %v1921_v20  ;;  %vm1951_vm14 = vcmp.eq.f32.partialorder %v1950_v61, 8.507059e+37 }
 0x371   :  { %4731 = vtanh.f32 %v1916_v25  ;;  %vm1932_vm0 = vcmp.eq.f32.partialorder %v1931_v21, 8.507059e+37  ;;  %vm1967_vm1 = vweird.f32 %v6244_v7  ;;  %v7470_v21 = vld [vmem:[#allocation62_spill] sm:$0xff] }
 0x372   :  { %v1837_v18 = vmul.f32 %v4724_v56, %v1836_v22  ;;  %vm1968_vm3 = vmor %vm1966_vm2, %vm1967_vm1 }
 0x373   :  { %v1899_v12 = vpop.f32.mrf.mxu2 }
 0x374   :  { %v1838_v31 = vadd.f32 %v4724_v56, %v1837_v18  ;;  %v1952_v12 = vand.u32 2147483648, %v6216_v60  ;;  %v1934_v60 = vor.u32 1.1754944e-38, %v1933_v62 }
 0x375   :  { %v4728_v46 = vpop.eup %4727 }
 0x376   :  { %v1923_v45 = vmul.f32 %v4728_v46, %v1921_v20  ;;  %v1842_v54 = vsel %vm1841_vm8, %v4724_v56, %v1838_v31  ;;  %v4730_v48 = vpop.eup %4729  ;;  %v1949_v56 = vsel %vm6252_vm11, %v6230_v13, %v1945_v15  ;;  %vm1928_vm12 = vweird.f32 %v4728_v46 }
 0x377   :  { %v1847_v22 = vsel %vm1844_vm9, %v1846_v32, %v1842_v54  ;;  %v1953_v14 = vor.u32 1.1754944e-38, %v1952_v12  ;;  %v1963_v32 = vsub.f32 1.0, %v1962_v1  ;;  %vm1929_vm15 = vmor %vm1927_vm13, %vm1928_vm12  ;;  %v4732_v25 = vpop.eup %4731 }
 0x378   :  { %v1924_v3 = vsub.f32 1.0, %v1923_v45  ;;  %v1853_v6 = vmul.f32 %v4730_v48, %v1847_v22  ;;  %v1970_v22 = vand.u32 2147483647, %v6235_v33 }
 0x379   :  { %v1954_v45 = vsel %vm1951_vm14, %v1953_v14, %v1949_v56  ;;  %v1964_v15 = vmul.f32 %v6244_v7, %v1963_v32  ;;  %v7468_v56 = vld [vmem:[#allocation42_spill] sm:$0xff]  ;;  %v7472_v32 = vld [vmem:[#allocation44_spill] sm:$0xff] }
 0x37a   :  { %v1925_v40 = vmul.f32 %v4728_v46, %v1924_v3  ;;  %v1854_v31 = vpack.c.bf16 %v1853_v6, %v1853_v6  ;;  %v1976_v12 = vmul.f32 %v1954_v45, %v6103_v0  ;;  %vm1971_vm4 = vcmp.eq.f32.partialorder %v1970_v22, 8.507059e+37  ;;  %v7475_v45 = vld [vmem:[#allocation84_spill] sm:$0xff]  ;;  %v7484_v22 = vld [vmem:[#allocation78_spill] sm:$0xff] }
 0x37b   :  { %v1965_v14 = vadd.f32 %v6244_v7, %v1964_v15  ;;  %v7478_v15 = vld [vmem:[#allocation91_spill] sm:$0xff] }
 0x37c   :  { %v1926_v54 = vadd.f32 %v4728_v46, %v1925_v40  ;;  %2003 = vmatmul.bf16.vlgmr.msra.gmra.mxu1 %v1854_v31  ;;  %2029 = vmatmul.bf16.vlgmr.msrb.gmra.mxu3 %v1854_v31  ;;  %v7469_v40 = vld [vmem:[#allocation43_spill] sm:$0xff] }
 0x37d   :  { %2170 = vmatpush.bf16.msra.mxu1 %v7319_v57  ;;  %2196 = vmatpush.bf16.msrb.mxu3 %v7320_v58  ;;  %v1969_v0 = vsel %vm1968_vm3, %v6244_v7, %v1965_v14  ;;  %v7467_v7 = vld [vmem:[#allocation61_spill] sm:$0xff]  ;;  %v7482_v14 = vld [vmem:[#allocation95_spill] sm:$0xff] }
 0x37e   :  { %v1930_v13 = vsel %vm1929_vm15, %v4728_v46, %v1926_v54  ;;  %v1972_v46 = vand.u32 2147483648, %v6235_v33  ;;  %v7466_v33 = vld [vmem:[#allocation60_spill] sm:$0xff]  ;;  %v7473_v54 = vld [vmem:[#allocation45_spill] sm:$0xff] }
 0x37f   :  { %v1935_v48 = vsel %vm1932_vm0, %v1934_v60, %v1930_v13  ;;  %v7474_v60 = vld [vmem:[#allocation83_spill] sm:$0xff]  ;;  %v7476_v13 = vld [vmem:[#allocation70_spill] sm:$0xff] }
 0x380   :  { %v1977_v1 = vmul.f32 %v4732_v25, %v1935_v48  ;;  %v1973_v18 = vor.u32 1.1754944e-38, %v1972_v46  ;;  %v7477_v25 = vld [vmem:[#allocation71_spill] sm:$0xff]  ;;  %v7479_v48 = vld [vmem:[#allocation92_spill] sm:$0xff] }
 0x381   :  { %2171 = vmatpush.bf16.msra.mxu1 %v5347_v27  ;;  %2197 = vmatpush.bf16.msrb.mxu3 %v7321_v51  ;;  %v7483_v46 = vld [vmem:[#allocation96_spill] sm:$0xff] }
 0x382   :  { %v6266_v20 = vadd.f32 %v1977_v1, %v1976_v12  ;;  %v1974_v61 = vsel %vm1971_vm4, %v1973_v18, %v1969_v0  ;;  %v7480_v12 = vld [vmem:[#allocation72_spill] sm:$0xff]  ;;  %v7481_v1 = vld [vmem:[#allocation73_spill] sm:$0xff] }
 0x383   :  { %v7485_v0 = vld [vmem:[#allocation80_spill] sm:$0xff]  ;;  %v7486_v18 = vld [vmem:[#allocation81_spill] sm:$0xff] }
 0x384   :  { %4733 = vtanh.f32 %v6266_v20 }
 0x385   :  { %2172 = vmatpush.bf16.msra.mxu1 %v5359_v39  ;;  %2198 = vmatpush.bf16.msrb.mxu3 %v5367_v50 }
 0x389   :  { %2173 = vmatpush.bf16.msra.mxu1 %v5371_v53  ;;  %2199 = vmatpush.bf16.msrb.mxu3 %v5384_v63 }
 0x38a   :  { %v4734_v3 = vpop.eup %4733 }
 0x38b   :  { %v1980_v6 = vmul.f32 %v4734_v3, %v1974_v61  ;;  %v7487_v3 = vld [vmem:[#allocation82_spill] sm:$0xff]  ;;  %v7488_v61 = vld [vmem:[#allocation101_spill] sm:$0xff] }
 0x38c   :  { %2055 = vmatmul.bf16.vlgmr.msrb.gmra.mxu1 %v1854_v31  ;;  %2081 = vmatmul.bf16.vlgmr.msra.gmra.mxu3 %v1854_v31  ;;  %v7471_v31 = vld [vmem:[#allocation64_spill] sm:$0xff] }
 0x38d   :  { %v1981_v62 = vpack.c.bf16 %v1980_v6, %v1980_v6  ;;  %2174 = vmatpush.bf16.msra.mxu1 %v5410_v16  ;;  %2200 = vmatpush.bf16.msrb.mxu3 %v7322_v47  ;;  %v7489_v6 = vld [vmem:[#allocation103_spill] sm:$0xff] }
 0x38f   :  { %1990 = vmatmul.bf16.vlgmr.msrb.gmra.mxu0 %v1981_v62  ;;  %2016 = vmatmul.bf16.vlgmr.msrb.gmra.mxu2 %v1981_v62 }
 0x390   :  { %2157 = vmatpush.bf16.msrb.mxu0 %v5334_v19  ;;  %2183 = vmatpush.bf16.msrb.mxu2 %v5355_v36 }
 0x391   :  { %2175 = vmatpush.bf16.msra.mxu1 %v7323_v11  ;;  %2201 = vmatpush.bf16.msrb.mxu3 %v7324_v10 }
 0x394   :  { %2158 = vmatpush.bf16.msrb.mxu0 %v5350_v30  ;;  %2184 = vmatpush.bf16.msrb.mxu2 %v5365_v44 }
 0x395   :  { %2176 = vmatpush.bf16.msra.mxu1 %v7325_v26  ;;  %2202 = vmatpush.bf16.msrb.mxu3 %v5425_v41 }
 0x398   :  { %2159 = vmatpush.bf16.msrb.mxu0 %v7270_v5  ;;  %2185 = vmatpush.bf16.msrb.mxu2 %v7271_v4 }
 0x399   :  { %2177 = vmatpush.bf16.msra.mxu1 %v5454_v2  ;;  %2203 = vmatpush.bf16.msrb.mxu3 %v5438_v52 }
 0x39c   :  { %2160 = vmatpush.bf16.msrb.mxu0 %v7274_v49  ;;  %2178 = vmatmul.bf16.vlgmr.msra.gmra.mxu1 %v1981_v62 }
 0x39d   :  { %2290 = vmatpush.bf16.msrb.mxu1 %v7326_v24  ;;  %2316 = vmatpush.bf16.msra.mxu3 %v7327_v42 }
 0x39e   :  { %2186 = vmatpush.bf16.msrb.mxu2 %v7275_v8  ;;  %2204 = vmatmul.bf16.vlgmr.msrb.gmra.mxu3 %v1981_v62 }
 0x39f   :  { %2042 = vmatmul.bf16.vlgmr.msra.gmra.mxu0 %v1981_v62  ;;  %2068 = vmatmul.bf16.vlgmr.msra.gmra.mxu2 %v1981_v62 }
 0x3a0   :  { %2161 = vmatpush.bf16.msrb.mxu0 %v7277_v23 }
 0x3a1   :  { %2291 = vmatpush.bf16.msrb.mxu1 %v7328_v37  ;;  %2317 = vmatpush.bf16.msra.mxu3 %v7329_v28 }
 0x3a2   :  { %2187 = vmatpush.bf16.msrb.mxu2 %v7278_v35 }
 0x3a4   :  { %2162 = vmatpush.bf16.msrb.mxu0 %v7280_v17 }
 0x3a5   :  { %2292 = vmatpush.bf16.msrb.mxu1 %v7330_v34  ;;  %2318 = vmatpush.bf16.msra.mxu3 %v7331_v43 }
 0x3a6   :  { %2188 = vmatpush.bf16.msrb.mxu2 %v7281_v38 }
 0x3a8   :  { %2163 = vmatpush.bf16.msrb.mxu0 %v7468_v56 }
 0x3a9   :  { %2293 = vmatpush.bf16.msrb.mxu1 %v7466_v33  ;;  %2319 = vmatpush.bf16.msra.mxu3 %v7467_v7 }
 0x3aa   :  { %2189 = vmatpush.bf16.msrb.mxu2 %v7469_v40 }
 0x3ac   :  { %2164 = vmatpush.bf16.msrb.mxu0 %v7472_v32 }
 0x3ad   :  { %2294 = vmatpush.bf16.msrb.mxu1 %v7470_v21  ;;  %2320 = vmatpush.bf16.msra.mxu3 %v7471_v31  ;;  %v7530_v31 = vld [vmem:[#allocation102_spill] sm:$0xff] }
 0x3ae   :  { %2190 = vmatpush.bf16.msrb.mxu2 %v7473_v54 }
 0x3af   :  { %2165 = vmatmul.bf16.vlgmr.msrb.gmra.mxu0 %v1981_v62 }
 0x3b0   :  { %2277 = vmatpush.bf16.msra.mxu0 %v7474_v60 }
 0x3b1   :  { %2295 = vmatpush.bf16.msrb.mxu1 %v7476_v13  ;;  %2321 = vmatpush.bf16.msra.mxu3 %v7477_v25 }
 0x3b2   :  { %2303 = vmatpush.bf16.msra.mxu2 %v7475_v45 }
 0x3b3   :  { %2191 = vmatmul.bf16.vlgmr.msrb.gmra.mxu2 %v1981_v62  ;;  %v7490_v62 = vld [vmem:[#allocation85_spill] sm:$0xff] }
 0x3b4   :  { %2278 = vmatpush.bf16.msra.mxu0 %v7478_v15  ;;  %v7528_v15 = vld [vmem:[#allocation31_spill] sm:$0xff] }
 0x3b5   :  { %2296 = vmatpush.bf16.msrb.mxu1 %v7480_v12  ;;  %2322 = vmatpush.bf16.msra.mxu3 %v7481_v1  ;;  %v7492_v1 = vld [vmem:[#allocation106_spill] sm:$0xff] }
 0x3b6   :  { %2304 = vmatpush.bf16.msra.mxu2 %v7479_v48 }
 0x3b8   :  { %2279 = vmatpush.bf16.msra.mxu0 %v7482_v14  ;;  %v7493_v14 = vld [vmem:[#allocation107_spill] sm:$0xff] }
 0x3b9   :  { %2297 = vmatpush.bf16.msrb.mxu1 %v7484_v22  ;;  %2323 = vmatpush.bf16.msra.mxu3 %v7485_v0  ;;  %v7495_v22 = vld [vmem:[#allocation94_spill] sm:$0xff]  ;;  %v7496_v0 = vld [vmem:[#allocation113_spill] sm:$0xff] }
 0x3ba   :  { %2305 = vmatpush.bf16.msra.mxu2 %v7483_v46  ;;  %v7494_v46 = vld [vmem:[#allocation93_spill] sm:$0xff] }
 0x3bc   :  { %2280 = vmatpush.bf16.msra.mxu0 %v7488_v61  ;;  %v7499_v61 = vld [vmem:[#allocation99_spill] sm:$0xff] }
 0x3bd   :  { %2342 = vmatpush.bf16.msra.mxu1 %v7486_v18  ;;  %2368 = vmatpush.bf16.msrb.mxu3 %v7487_v3  ;;  %v7497_v18 = vld [vmem:[#allocation114_spill] sm:$0xff]  ;;  %v7498_v3 = vld [vmem:[#allocation97_spill] sm:$0xff] }
 0x3be   :  { %2306 = vmatpush.bf16.msra.mxu2 %v7489_v6  ;;  %v7500_v6 = vld [vmem:[#allocation117_spill] sm:$0xff] }
 0x3c0   :  { %2281 = vmatpush.bf16.msra.mxu0 %v7492_v1  ;;  %v7503_v1 = vld [vmem:[#allocation105_spill] sm:$0xff] }
 0x3c1   :  { %2343 = vmatpush.bf16.msra.mxu1 %v7490_v62  ;;  %2369 = vmatpush.bf16.msrb.mxu3 %v7491_v9  ;;  %v7501_v62 = vld [vmem:[#allocation119_spill] sm:$0xff]  ;;  %v7502_v9 = vld [vmem:[#allocation104_spill] sm:$0xff] }
 0x3c2   :  { %2307 = vmatpush.bf16.msra.mxu2 %v7493_v14  ;;  %v7504_v14 = vld [vmem:[#allocation123_spill] sm:$0xff] }
 0x3c4   :  { %2282 = vmatpush.bf16.msra.mxu0 %v7496_v0  ;;  %v7507_v0 = vld [vmem:[#allocation127_spill] sm:$0xff] }
 0x3c5   :  { %2344 = vmatpush.bf16.msra.mxu1 %v7494_v46  ;;  %2370 = vmatpush.bf16.msrb.mxu3 %v7495_v22  ;;  %v7505_v46 = vld [vmem:[#allocation125_spill] sm:$0xff]  ;;  %v7506_v22 = vld [vmem:[#allocation126_spill] sm:$0xff] }
 0x3c6   :  { %2308 = vmatpush.bf16.msra.mxu2 %v7497_v18  ;;  %v7508_v18 = vld [vmem:[#allocation108_spill] sm:$0xff] }
 0x3c8   :  { %2283 = vmatpush.bf16.msra.mxu0 %v7500_v6  ;;  %v7511_v6 = vld [vmem:[#allocation129_spill] sm:$0xff] }
 0x3c9   :  { %2345 = vmatpush.bf16.msra.mxu1 %v7498_v3  ;;  %2371 = vmatpush.bf16.msrb.mxu3 %v7499_v61  ;;  %v7509_v3 = vld [vmem:[#allocation109_spill] sm:$0xff]  ;;  %v7510_v61 = vld [vmem:[#allocation128_spill] sm:$0xff] }
 0x3ca   :  { %2309 = vmatpush.bf16.msra.mxu2 %v7501_v62  ;;  %v7512_v62 = vld [vmem:[#allocation115_spill] sm:$0xff] }
 0x3cc   :  { %2284 = vmatpush.bf16.msra.mxu0 %v7504_v14  ;;  %v7515_v14 = vld [vmem:[#allocation132_spill] sm:$0xff] }
 0x3cd   :  { %2346 = vmatpush.bf16.msra.mxu1 %v7502_v9  ;;  %2372 = vmatpush.bf16.msrb.mxu3 %v7503_v1  ;;  %v7513_v9 = vld [vmem:[#allocation116_spill] sm:$0xff]  ;;  %v7514_v1 = vld [vmem:[#allocation131_spill] sm:$0xff] }
 0x3ce   :  { %2310 = vmatpush.bf16.msra.mxu2 %v7505_v46  ;;  %v7516_v46 = vld [vmem:[#allocation120_spill] sm:$0xff] }
 0x3d0   :  { %2329 = vmatpush.bf16.msrb.mxu0 %v7506_v22  ;;  %v7517_v22 = vld [vmem:[#allocation122_spill] sm:$0xff] }
 0x3d1   :  { %2347 = vmatpush.bf16.msra.mxu1 %v7508_v18  ;;  %2373 = vmatpush.bf16.msrb.mxu3 %v7509_v3  ;;  %v7519_v18 = vld [vmem:[#allocation134_spill] sm:$0xff]  ;;  %v7520_v3 = vld [vmem:[#allocation135_spill] sm:$0xff] }
 0x3d2   :  { %2355 = vmatpush.bf16.msrb.mxu2 %v7507_v0  ;;  %v7518_v0 = vld [vmem:[#allocation133_spill] sm:$0xff] }
 0x3d4   :  { %2330 = vmatpush.bf16.msrb.mxu0 %v7510_v61  ;;  %v7521_v61 = vld [vmem:[#allocation136_spill] sm:$0xff] }
 0x3d5   :  { %2348 = vmatpush.bf16.msra.mxu1 %v7512_v62  ;;  %2374 = vmatpush.bf16.msrb.mxu3 %v7513_v9  ;;  %v7523_v62 = vld [vmem:[#allocation138_spill] sm:$0xff]  ;;  %v7524_v9 = vld [vmem:[#allocation139_spill] sm:$0xff] }
 0x3d6   :  { %2356 = vmatpush.bf16.msrb.mxu2 %v7511_v6  ;;  %v7522_v6 = vld [vmem:[#allocation137_spill] sm:$0xff] }
 0x3d8   :  { %2331 = vmatpush.bf16.msrb.mxu0 %v7514_v1  ;;  %v7525_v1 = vld [vmem:[#allocation140_spill] sm:$0xff] }
 0x3d9   :  { %2349 = vmatpush.bf16.msra.mxu1 %v7516_v46  ;;  %2375 = vmatpush.bf16.msrb.mxu3 %v7517_v22  ;;  %v7527_v46 = vld [vmem:[#allocation142_spill] sm:$0xff] }
 0x3da   :  { %2357 = vmatpush.bf16.msrb.mxu2 %v7515_v14  ;;  %v7526_v14 = vld [vmem:[#allocation141_spill] sm:$0xff] }
 0x3dc   :  { %2332 = vmatpush.bf16.msrb.mxu0 %v7518_v0 }
 0x3de   :  { %2358 = vmatpush.bf16.msrb.mxu2 %v7519_v18 }
 0x3e0   :  { %2333 = vmatpush.bf16.msrb.mxu0 %v7520_v3 }
 0x3e2   :  { %2359 = vmatpush.bf16.msrb.mxu2 %v7521_v61 }
 0x3e4   :  { %2334 = vmatpush.bf16.msrb.mxu0 %v7522_v6 }
 0x3e6   :  { %2360 = vmatpush.bf16.msrb.mxu2 %v7523_v62 }
 0x3e8   :  { %2335 = vmatpush.bf16.msrb.mxu0 %v7524_v9  ;;  %v7529_v9 = vld [vmem:[#allocation32_spill] sm:$0xff] }
 0x3ea   :  { %2361 = vmatpush.bf16.msrb.mxu2 %v7525_v1 }
 0x3ec   :  { %2336 = vmatpush.bf16.msrb.mxu0 %v7526_v14 }
 0x3ee   :  { %2362 = vmatpush.bf16.msrb.mxu2 %v7527_v46 }
 0x3f9   :  { %v2004_v22 = vpop.f32.mrf.mxu1 }
 0x3ff   :  { %v2030_v0 = vpop.f32.mrf.mxu3 }
 0x401   :  { %v2006_v12 = vpop.f32.mrf.mxu1 }
 0x407   :  { %v2032_v18 = vpop.f32.mrf.mxu3 }
 0x409   :  { %v2056_v48 = vpop.f32.mrf.mxu1 }
 0x40c   :  { %v1991_v3 = vpop.f32.mrf.mxu0 }
 0x40d   :  { %v1992_v61 = vadd.f32 %v1991_v3, %v7528_v15 }
 0x40f   :  { %v2005_v25 = vadd.f32 %v2004_v22, %v1992_v61  ;;  %v2082_v6 = vpop.f32.mrf.mxu3 }
 0x411   :  { %v4271_v13 = vmul.f32 -1.442695, %v2005_v25  ;;  %v2058_v62 = vpop.f32.mrf.mxu1 }
 0x412   :  { %v2017_v45 = vpop.f32.mrf.mxu2 }
 0x413   :  { %4735 = vpow2.f32 %v4271_v13  ;;  %v2018_v1 = vadd.f32 %v2017_v45, %v7529_v9 }
 0x414   :  { %v1993_v60 = vpop.f32.mrf.mxu0 }
 0x415   :  { %v2031_v14 = vadd.f32 %v2030_v0, %v2018_v1 }
 0x417   :  { %v4272_v54 = vmul.f32 -1.442695, %v2031_v14  ;;  %v2084_v46 = vpop.f32.mrf.mxu3 }
 0x418   :  { %v7531_v46 = vld [vmem:[#allocation89_spill] sm:$0xff] }
 0x419   :  { %v4736_v32 = vpop.eup %4735  ;;  %4737 = vpow2.f32 %v4272_v54  ;;  %v2179_v12 = vpop.f32.mrf.mxu1 }
 0x41a   :  { %v6369_v18 = vadd.f32 1.0, %v4736_v32  ;;  %v2210_v21 = vadd.f32 %v2179_v12, %v7530_v31  ;;  %v2019_v3 = vpop.f32.mrf.mxu2 }
 0x41c   :  { %4739 = vrcp.f32 %v6369_v18  ;;  %v4275_v25 = vmul.f32 -1.442695, %v2210_v21  ;;  %v2043_v22 = vpop.f32.mrf.mxu0  ;;  %vm2095_vm7 = vweird.f32 %v6369_v18 }
 0x41d   :  { %v2044_v21 = vadd.f32 %v2043_v22, %v7383_v29 }
 0x41e   :  { %4741 = vpow2.f32 %v4275_v25 }
 0x41f   :  { %v4738_v61 = vpop.eup %4737 }
 0x420   :  { %v2108_v13 = vadd.f32 1.0, %v4738_v61 }
 0x421   :  { %v2205_v45 = vpop.f32.mrf.mxu3  ;;  %v2181_v60 = vpop.f32.mrf.mxu1 }
 0x422   :  { %v4740_v1 = vpop.eup %4739  ;;  %4743 = vrcp.f32 %v2108_v13  ;;  %v2069_v14 = vpop.f32.mrf.mxu2  ;;  %v2212_v32 = vadd.f32 %v2205_v45, %v7531_v46  ;;  %v2057_v45 = vadd.f32 %v2056_v48, %v2044_v21  ;;  %vm2114_vm8 = vweird.f32 %v2108_v13 }
 0x423   :  { %v2091_v54 = vmul.f32 %v4740_v1, %v6369_v18  ;;  %v2070_v0 = vadd.f32 %v2069_v14, %v5893_v59  ;;  %v2120_v14 = vand.u32 2147483648, %v2108_v13  ;;  %vm2096_vm5 = vweird.f32 %v4740_v1 }
 0x424   :  { %v2045_v31 = vpop.f32.mrf.mxu0  ;;  %v4742_v62 = vpop.eup %4741  ;;  %v4276_v9 = vmul.f32 -1.442695, %v2212_v32  ;;  %v7532_v32 = vld [vmem:[#allocation77_spill] sm:$0xff]  ;;  %vm6383_vm9 = vmor %vm2095_vm7, %vm2096_vm5 }
 0x425   :  { %v2092_v12 = vsub.f32 1.0, %v2091_v54  ;;  %v2083_v3 = vadd.f32 %v2082_v6, %v2070_v0  ;;  %v6377_v61 = vadd.f32 1.0, %v4742_v62  ;;  %v2118_v6 = vand.u32 2147483647, %v2108_v13 }
 0x427   :  { %v4273_v60 = vmul.f32 -1.442695, %v2083_v3  ;;  %v2093_v56 = vmul.f32 %v4740_v1, %v2092_v12  ;;  %vm2119_vm11 = vcmp.eq.f32.partialorder %v2118_v6, 8.507059e+37  ;;  %vm2241_vm2 = vweird.f32 %v6377_v61 }
 0x428   :  { %v4744_v25 = vpop.eup %4743 }
 0x429   :  { %v2207_v15 = vpop.f32.mrf.mxu3  ;;  %v2110_v40 = vmul.f32 %v4744_v25, %v2108_v13  ;;  %4745 = vpow2.f32 %v4273_v60  ;;  %vm2115_vm6 = vweird.f32 %v4744_v25  ;;  %v2094_v46 = vadd.f32 %v4740_v1, %v2093_v56 }
 0x42a   :  { %v2071_v7 = vpop.f32.mrf.mxu2  ;;  %4747 = vpow2.f32 %v4276_v9  ;;  %v2101_v15 = vand.u32 2147483648, %v6369_v18  ;;  %v2099_v9 = vand.u32 2147483647, %v6369_v18  ;;  %vm2116_vm10 = vmor %vm2114_vm8, %vm2115_vm6 }
 0x42b   :  { %v2111_v33 = vsub.f32 1.0, %v2110_v40  ;;  %4749 = vrcp.f32 %v6377_v61  ;;  %v2098_v62 = vsel %vm6383_vm9, %v4740_v1, %v2094_v46 }
 0x42c   :  { %v2166_v54 = vpop.f32.mrf.mxu0  ;;  %4751 = vtanh.f32 %v2057_v45  ;;  %v2102_v21 = vor.u32 1.1754944e-38, %v2101_v15  ;;  %vm2100_vm12 = vcmp.eq.f32.partialorder %v2099_v9, 8.507059e+37 }
 0x42d   :  { %v2112_v22 = vmul.f32 %v4744_v25, %v2111_v33  ;;  %v2209_v0 = vadd.f32 %v2166_v54, %v7532_v32  ;;  %v2121_v33 = vor.u32 1.1754944e-38, %v2120_v14 }
 0x42e   :  { %v2103_v54 = vsel %vm2100_vm12, %v2102_v21, %v2098_v62 }
 0x42f   :  { %v2113_v40 = vadd.f32 %v4744_v25, %v2112_v22  ;;  %v4274_v48 = vmul.f32 -1.442695, %v2209_v0  ;;  %v4746_v31 = vpop.eup %4745 }
 0x430   :  { %v4748_v56 = vpop.eup %4747  ;;  %v2128_v3 = vadd.f32 1.0, %v4746_v31 }
 0x431   :  { %v2117_v12 = vsel %vm2116_vm10, %v4744_v25, %v2113_v40  ;;  %v6390_v13 = vpop.eup %4749  ;;  %4753 = vpow2.f32 %v4274_v48  ;;  %v6395_v1 = vadd.f32 1.0, %v4748_v56 }
 0x432   :  { %v2122_v60 = vsel %vm2119_vm11, %v2121_v33, %v2117_v12  ;;  %4755 = vrcp.f32 %v2128_v3  ;;  %v2237_v45 = vmul.f32 %v6390_v13, %v6377_v61  ;;  %v4752_v32 = vpop.eup %4751  ;;  %v2138_v56 = vand.u32 2147483647, %v2128_v3 }
 0x433   :  { %v2144_v14 = vmul.f32 %v2122_v60, %v6237_v55  ;;  %v2145_v25 = vmul.f32 %v4752_v32, %v2103_v54  ;;  %4757 = vrcp.f32 %v6395_v1  ;;  %v2140_v55 = vand.u32 2147483648, %v2128_v3  ;;  %v7535_v60 = vld [vmem:[#allocation87_spill] sm:$0xff] }
 0x434   :  { %v2168_v22 = vpop.f32.mrf.mxu0  ;;  %v2238_v0 = vsub.f32 1.0, %v2237_v45  ;;  %vm2134_vm14 = vweird.f32 %v2128_v3  ;;  %vm2242_vm15 = vweird.f32 %v6390_v13  ;;  %vm2139_vm1 = vcmp.eq.f32.partialorder %v2138_v56, 8.507059e+37 }
 0x435   :  { %v6397_v15 = vadd.f32 %v2145_v25, %v2144_v14  ;;  %v2141_v45 = vor.u32 1.1754944e-38, %v2140_v55  ;;  %vm6411_vm3 = vmor %vm2241_vm2, %vm2242_vm15  ;;  %vm2261_vm10 = vweird.f32 %v6395_v1 }
 0x436   :  { %v2192_v18 = vpop.f32.mrf.mxu2  ;;  %v2239_v31 = vmul.f32 %v6390_v13, %v2238_v0 }
 0x437   :  { %v4754_v6 = vpop.eup %4753  ;;  %v2211_v54 = vadd.f32 %v2192_v18, %v7535_v60 }
 0x438   :  { %v4756_v46 = vpop.eup %4755  ;;  %v2216_v7 = vadd.f32 1.0, %v4754_v6  ;;  %v2240_v22 = vadd.f32 %v6390_v13, %v2239_v31  ;;  %v2247_v6 = vand.u32 2147483648, %v6377_v61 }
 0x439   :  { %v2130_v9 = vmul.f32 %v4756_v46, %v2128_v3  ;;  %vm2135_vm13 = vweird.f32 %v4756_v46  ;;  %v6402_v62 = vpop.eup %4757 }
 0x43a   :  { %4759 = vrcp.f32 %v2216_v7  ;;  %vm2136_vm0 = vmor %vm2134_vm14, %vm2135_vm13  ;;  %v2257_v3 = vmul.f32 %v6402_v62, %v6395_v1  ;;  %v2228_v31 = vand.u32 2147483648, %v2216_v7  ;;  %vm2222_vm5 = vweird.f32 %v2216_v7 }
 0x43b   :  { %v2131_v48 = vsub.f32 1.0, %v2130_v9  ;;  %4761 = vtanh.f32 %v6397_v15  ;;  %vm2262_vm9 = vweird.f32 %v6402_v62 }
 0x43c   :  { %4763 = vtanh.f32 %v2211_v54  ;;  %v2258_v60 = vsub.f32 1.0, %v2257_v3  ;;  %vm2263_vm11 = vmor %vm2261_vm10, %vm2262_vm9 }
 0x43d   :  { %v2132_v33 = vmul.f32 %v4756_v46, %v2131_v48 }
 0x43e   :  { %v2194_v40 = vpop.f32.mrf.mxu2 }
 0x43f   :  { %v2133_v12 = vadd.f32 %v4756_v46, %v2132_v33  ;;  %v2245_v40 = vand.u32 2147483647, %v6377_v61  ;;  %v2226_v33 = vand.u32 2147483647, %v2216_v7  ;;  %v2229_v61 = vor.u32 1.1754944e-38, %v2228_v31 }
 0x440   :  { %v4760_v21 = vpop.eup %4759 }
 0x441   :  { %v2218_v14 = vmul.f32 %v4760_v21, %v2216_v7  ;;  %v2137_v32 = vsel %vm2136_vm0, %v4756_v46, %v2133_v12  ;;  %v4762_v25 = vpop.eup %4761  ;;  %v2244_v46 = vsel %vm6411_vm3, %v6390_v13, %v2240_v22  ;;  %vm2223_vm4 = vweird.f32 %v4760_v21 }
 0x442   :  { %v2142_v0 = vsel %vm2139_vm1, %v2141_v45, %v2137_v32  ;;  %v2248_v12 = vor.u32 1.1754944e-38, %v2247_v6  ;;  %vm2246_vm6 = vcmp.eq.f32.partialorder %v2245_v40, 8.507059e+37  ;;  %vm2224_vm7 = vmor %vm2222_vm5, %vm2223_vm4  ;;  %vm2227_vm8 = vcmp.eq.f32.partialorder %v2226_v33, 8.507059e+37  ;;  %v4764_v54 = vpop.eup %4763  ;;  %v7542_v33 = vld [vmem:[#allocation62_spill] sm:$0xff] }
 0x443   :  { %v2219_v18 = vsub.f32 1.0, %v2218_v14  ;;  %v2148_v48 = vmul.f32 %v4762_v25, %v2142_v0  ;;  %v2259_v22 = vmul.f32 %v6402_v62, %v2258_v60  ;;  %v2265_v0 = vand.u32 2147483647, %v6395_v1  ;;  %v7545_v60 = vld [vmem:[#allocation45_spill] sm:$0xff] }
 0x444   :  { %v2249_v14 = vsel %vm2246_vm6, %v2248_v12, %v2244_v46  ;;  %v7540_v46 = vld [vmem:[#allocation42_spill] sm:$0xff]  ;;  %v7544_v12 = vld [vmem:[#allocation44_spill] sm:$0xff] }
 0x445   :  { %v2220_v55 = vmul.f32 %v4760_v21, %v2219_v18  ;;  %v2149_v56 = vpack.c.bf16 %v2148_v48, %v2148_v48  ;;  %v2271_v25 = vmul.f32 %v2249_v14, %v6266_v20  ;;  %v2260_v3 = vadd.f32 %v6402_v62, %v2259_v22  ;;  %v7548_v14 = vld [vmem:[#allocation70_spill] sm:$0xff]  ;;  %v7551_v22 = vld [vmem:[#allocation92_spill] sm:$0xff] }
 0x446   :  { %vm2266_vm12 = vcmp.eq.f32.partialorder %v2265_v0, 8.507059e+37  ;;  %v7557_v0 = vld [vmem:[#allocation80_spill] sm:$0xff] }
 0x447   :  { %v2221_v45 = vadd.f32 %v4760_v21, %v2220_v55  ;;  %2298 = vmatmul.bf16.vlgmr.msrb.gmra.mxu1 %v2149_v56  ;;  %2324 = vmatmul.bf16.vlgmr.msra.gmra.mxu3 %v2149_v56  ;;  %v2264_v20 = vsel %vm2263_vm11, %v6402_v62, %v2260_v3  ;;  %v7539_v62 = vld [vmem:[#allocation61_spill] sm:$0xff]  ;;  %v7541_v55 = vld [vmem:[#allocation43_spill] sm:$0xff]  ;;  %v7555_v3 = vld [vmem:[#allocation96_spill] sm:$0xff] }
 0x448   :  { %2465 = vmatpush.bf16.msrb.mxu1 %v7319_v57  ;;  %2491 = vmatpush.bf16.msra.mxu3 %v7320_v58 }
 0x449   :  { %v2225_v13 = vsel %vm2224_vm7, %v4760_v21, %v2221_v45  ;;  %v2267_v21 = vand.u32 2147483648, %v6395_v1  ;;  %v7538_v1 = vld [vmem:[#allocation60_spill] sm:$0xff]  ;;  %v7546_v45 = vld [vmem:[#allocation83_spill] sm:$0xff] }
 0x44a   :  { %v2230_v32 = vsel %vm2227_vm8, %v2229_v61, %v2225_v13  ;;  %v7547_v61 = vld [vmem:[#allocation84_spill] sm:$0xff]  ;;  %v7549_v13 = vld [vmem:[#allocation71_spill] sm:$0xff] }
 0x44b   :  { %v2272_v6 = vmul.f32 %v4764_v54, %v2230_v32  ;;  %v2268_v9 = vor.u32 1.1754944e-38, %v2267_v21  ;;  %v7550_v54 = vld [vmem:[#allocation91_spill] sm:$0xff]  ;;  %v7552_v32 = vld [vmem:[#allocation72_spill] sm:$0xff]  ;;  %v7556_v21 = vld [vmem:[#allocation78_spill] sm:$0xff] }
 0x44c   :  { %2466 = vmatpush.bf16.msrb.mxu1 %v5347_v27  ;;  %2492 = vmatpush.bf16.msra.mxu3 %v7321_v51 }
 0x44d   :  { %v6425_v7 = vadd.f32 %v2272_v6, %v2271_v25  ;;  %v2269_v40 = vsel %vm2266_vm12, %v2268_v9, %v2264_v20  ;;  %v7553_v25 = vld [vmem:[#allocation73_spill] sm:$0xff]  ;;  %v7554_v6 = vld [vmem:[#allocation95_spill] sm:$0xff]  ;;  %v7559_v9 = vld [vmem:[#allocation82_spill] sm:$0xff] }
 0x44e   :  { %v7558_v20 = vld [vmem:[#allocation81_spill] sm:$0xff] }
 0x44f   :  { %4765 = vtanh.f32 %v6425_v7 }
 0x450   :  { %2467 = vmatpush.bf16.msrb.mxu1 %v5359_v39  ;;  %2493 = vmatpush.bf16.msra.mxu3 %v5367_v50 }
 0x454   :  { %2468 = vmatpush.bf16.msrb.mxu1 %v5371_v53  ;;  %2494 = vmatpush.bf16.msra.mxu3 %v5384_v63 }
 0x455   :  { %v4766_v18 = vpop.eup %4765 }
 0x456   :  { %v2275_v48 = vmul.f32 %v4766_v18, %v2269_v40  ;;  %v7560_v18 = vld [vmem:[#allocation101_spill] sm:$0xff]  ;;  %v7561_v40 = vld [vmem:[#allocation103_spill] sm:$0xff] }
 0x457   :  { %2350 = vmatmul.bf16.vlgmr.msra.gmra.mxu1 %v2149_v56  ;;  %2376 = vmatmul.bf16.vlgmr.msrb.gmra.mxu3 %v2149_v56  ;;  %v7543_v56 = vld [vmem:[#allocation64_spill] sm:$0xff] }
 0x458   :  { %v2276_v31 = vpack.c.bf16 %v2275_v48, %v2275_v48  ;;  %2469 = vmatpush.bf16.msrb.mxu1 %v5410_v16  ;;  %2495 = vmatpush.bf16.msra.mxu3 %v7322_v47  ;;  %v7562_v48 = vld [vmem:[#allocation85_spill] sm:$0xff] }
 0x45a   :  { %2285 = vmatmul.bf16.vlgmr.msra.gmra.mxu0 %v2276_v31  ;;  %2311 = vmatmul.bf16.vlgmr.msra.gmra.mxu2 %v2276_v31 }
 0x45b   :  { %2452 = vmatpush.bf16.msra.mxu0 %v5334_v19  ;;  %2478 = vmatpush.bf16.msra.mxu2 %v5355_v36 }
 0x45c   :  { %2470 = vmatpush.bf16.msrb.mxu1 %v7323_v11  ;;  %2496 = vmatpush.bf16.msra.mxu3 %v7324_v10 }
 0x45f   :  { %2453 = vmatpush.bf16.msra.mxu0 %v5350_v30  ;;  %2479 = vmatpush.bf16.msra.mxu2 %v5365_v44 }
 0x460   :  { %2471 = vmatpush.bf16.msrb.mxu1 %v7325_v26  ;;  %2497 = vmatpush.bf16.msra.mxu3 %v5425_v41 }
 0x463   :  { %2454 = vmatpush.bf16.msra.mxu0 %v7270_v5  ;;  %2480 = vmatpush.bf16.msra.mxu2 %v7271_v4 }
 0x464   :  { %2472 = vmatpush.bf16.msrb.mxu1 %v5454_v2  ;;  %2498 = vmatpush.bf16.msra.mxu3 %v5438_v52 }
 0x467   :  { %2455 = vmatpush.bf16.msra.mxu0 %v7274_v49  ;;  %2473 = vmatmul.bf16.vlgmr.msrb.gmra.mxu1 %v2276_v31 }
 0x468   :  { %2585 = vmatpush.bf16.msra.mxu1 %v7326_v24  ;;  %2611 = vmatpush.bf16.msrb.mxu3 %v7327_v42 }
 0x469   :  { %2481 = vmatpush.bf16.msra.mxu2 %v7275_v8  ;;  %2499 = vmatmul.bf16.vlgmr.msra.gmra.mxu3 %v2276_v31 }
 0x46a   :  { %2337 = vmatmul.bf16.vlgmr.msrb.gmra.mxu0 %v2276_v31  ;;  %2363 = vmatmul.bf16.vlgmr.msrb.gmra.mxu2 %v2276_v31 }
 0x46b   :  { %2456 = vmatpush.bf16.msra.mxu0 %v7277_v23 }
 0x46c   :  { %2586 = vmatpush.bf16.msra.mxu1 %v7328_v37  ;;  %2612 = vmatpush.bf16.msrb.mxu3 %v7329_v28 }
 0x46d   :  { %2482 = vmatpush.bf16.msra.mxu2 %v7278_v35 }
 0x46f   :  { %2457 = vmatpush.bf16.msra.mxu0 %v7280_v17 }
 0x470   :  { %2587 = vmatpush.bf16.msra.mxu1 %v7330_v34  ;;  %2613 = vmatpush.bf16.msrb.mxu3 %v7331_v43 }
 0x471   :  { %2483 = vmatpush.bf16.msra.mxu2 %v7281_v38 }
 0x473   :  { %2458 = vmatpush.bf16.msra.mxu0 %v7540_v46 }
 0x474   :  { %2588 = vmatpush.bf16.msra.mxu1 %v7538_v1  ;;  %2614 = vmatpush.bf16.msrb.mxu3 %v7539_v62  ;;  %v7606_v1 = vld [vmem:[#allocation47_spill] sm:$0xff] }
 0x475   :  { %2484 = vmatpush.bf16.msra.mxu2 %v7541_v55 }
 0x477   :  { %2459 = vmatpush.bf16.msra.mxu0 %v7544_v12  ;;  %v7602_v12 = vld [vmem:[#allocation74_spill] sm:$0xff] }
 0x478   :  { %2589 = vmatpush.bf16.msra.mxu1 %v7542_v33  ;;  %2615 = vmatpush.bf16.msrb.mxu3 %v7543_v56  ;;  %v7603_v56 = vld [vmem:[#allocation112_spill] sm:$0xff] }
 0x479   :  { %2485 = vmatpush.bf16.msra.mxu2 %v7545_v60 }
 0x47a   :  { %2460 = vmatmul.bf16.vlgmr.msra.gmra.mxu0 %v2276_v31 }
 0x47b   :  { %2572 = vmatpush.bf16.msrb.mxu0 %v7546_v45 }
 0x47c   :  { %2590 = vmatpush.bf16.msra.mxu1 %v7548_v14  ;;  %2616 = vmatpush.bf16.msrb.mxu3 %v7549_v13 }
 0x47d   :  { %2598 = vmatpush.bf16.msrb.mxu2 %v7547_v61 }
 0x47e   :  { %2486 = vmatmul.bf16.vlgmr.msra.gmra.mxu2 %v2276_v31  ;;  %v7563_v31 = vld [vmem:[#allocation86_spill] sm:$0xff] }
 0x47f   :  { %2573 = vmatpush.bf16.msrb.mxu0 %v7550_v54  ;;  %v7600_v54 = vld [vmem:[#allocation31_spill] sm:$0xff] }
 0x480   :  { %2591 = vmatpush.bf16.msra.mxu1 %v7552_v32  ;;  %2617 = vmatpush.bf16.msrb.mxu3 %v7553_v25  ;;  %v7564_v25 = vld [vmem:[#allocation106_spill] sm:$0xff] }
 0x481   :  { %2599 = vmatpush.bf16.msrb.mxu2 %v7551_v22 }
 0x483   :  { %2574 = vmatpush.bf16.msrb.mxu0 %v7554_v6  ;;  %v7565_v6 = vld [vmem:[#allocation107_spill] sm:$0xff] }
 0x484   :  { %2592 = vmatpush.bf16.msra.mxu1 %v7556_v21  ;;  %2618 = vmatpush.bf16.msrb.mxu3 %v7557_v0  ;;  %v7567_v21 = vld [vmem:[#allocation94_spill] sm:$0xff]  ;;  %v7568_v0 = vld [vmem:[#allocation113_spill] sm:$0xff] }
 0x485   :  { %2600 = vmatpush.bf16.msrb.mxu2 %v7555_v3  ;;  %v7566_v3 = vld [vmem:[#allocation93_spill] sm:$0xff] }
 0x487   :  { %2575 = vmatpush.bf16.msrb.mxu0 %v7560_v18  ;;  %v7571_v18 = vld [vmem:[#allocation99_spill] sm:$0xff] }
 0x488   :  { %2637 = vmatpush.bf16.msrb.mxu1 %v7558_v20  ;;  %2663 = vmatpush.bf16.msra.mxu3 %v7559_v9  ;;  %v7569_v20 = vld [vmem:[#allocation114_spill] sm:$0xff]  ;;  %v7570_v9 = vld [vmem:[#allocation97_spill] sm:$0xff] }
 0x489   :  { %2601 = vmatpush.bf16.msrb.mxu2 %v7561_v40  ;;  %v7572_v40 = vld [vmem:[#allocation117_spill] sm:$0xff] }
 0x48b   :  { %2576 = vmatpush.bf16.msrb.mxu0 %v7564_v25  ;;  %v7575_v25 = vld [vmem:[#allocation105_spill] sm:$0xff] }
 0x48c   :  { %2638 = vmatpush.bf16.msrb.mxu1 %v7562_v48  ;;  %2664 = vmatpush.bf16.msra.mxu3 %v7563_v31  ;;  %v7573_v48 = vld [vmem:[#allocation119_spill] sm:$0xff]  ;;  %v7574_v31 = vld [vmem:[#allocation104_spill] sm:$0xff] }
 0x48d   :  { %2602 = vmatpush.bf16.msrb.mxu2 %v7565_v6  ;;  %v7576_v6 = vld [vmem:[#allocation123_spill] sm:$0xff] }
 0x48f   :  { %2577 = vmatpush.bf16.msrb.mxu0 %v7568_v0  ;;  %v7579_v0 = vld [vmem:[#allocation127_spill] sm:$0xff] }
 0x490   :  { %2639 = vmatpush.bf16.msrb.mxu1 %v7566_v3  ;;  %2665 = vmatpush.bf16.msra.mxu3 %v7567_v21  ;;  %v7577_v3 = vld [vmem:[#allocation125_spill] sm:$0xff]  ;;  %v7578_v21 = vld [vmem:[#allocation126_spill] sm:$0xff] }
 0x491   :  { %2603 = vmatpush.bf16.msrb.mxu2 %v7569_v20  ;;  %v7580_v20 = vld [vmem:[#allocation108_spill] sm:$0xff] }
 0x493   :  { %2578 = vmatpush.bf16.msrb.mxu0 %v7572_v40  ;;  %v7583_v40 = vld [vmem:[#allocation129_spill] sm:$0xff] }
 0x494   :  { %2640 = vmatpush.bf16.msrb.mxu1 %v7570_v9  ;;  %2666 = vmatpush.bf16.msra.mxu3 %v7571_v18  ;;  %v7581_v9 = vld [vmem:[#allocation109_spill] sm:$0xff]  ;;  %v7582_v18 = vld [vmem:[#allocation128_spill] sm:$0xff] }
 0x495   :  { %2604 = vmatpush.bf16.msrb.mxu2 %v7573_v48  ;;  %v7584_v48 = vld [vmem:[#allocation115_spill] sm:$0xff] }
 0x497   :  { %2579 = vmatpush.bf16.msrb.mxu0 %v7576_v6  ;;  %v7587_v6 = vld [vmem:[#allocation132_spill] sm:$0xff] }
 0x498   :  { %2641 = vmatpush.bf16.msrb.mxu1 %v7574_v31  ;;  %2667 = vmatpush.bf16.msra.mxu3 %v7575_v25  ;;  %v7585_v31 = vld [vmem:[#allocation116_spill] sm:$0xff]  ;;  %v7586_v25 = vld [vmem:[#allocation131_spill] sm:$0xff] }
 0x499   :  { %2605 = vmatpush.bf16.msrb.mxu2 %v7577_v3  ;;  %v7588_v3 = vld [vmem:[#allocation120_spill] sm:$0xff] }
 0x49b   :  { %2624 = vmatpush.bf16.msra.mxu0 %v7578_v21  ;;  %v7589_v21 = vld [vmem:[#allocation122_spill] sm:$0xff] }
 0x49c   :  { %2642 = vmatpush.bf16.msrb.mxu1 %v7580_v20  ;;  %2668 = vmatpush.bf16.msra.mxu3 %v7581_v9  ;;  %v7591_v20 = vld [vmem:[#allocation134_spill] sm:$0xff]  ;;  %v7592_v9 = vld [vmem:[#allocation135_spill] sm:$0xff] }
 0x49d   :  { %2650 = vmatpush.bf16.msra.mxu2 %v7579_v0  ;;  %v7590_v0 = vld [vmem:[#allocation133_spill] sm:$0xff] }
 0x49f   :  { %2625 = vmatpush.bf16.msra.mxu0 %v7582_v18  ;;  %v7593_v18 = vld [vmem:[#allocation136_spill] sm:$0xff] }
 0x4a0   :  { %2643 = vmatpush.bf16.msrb.mxu1 %v7584_v48  ;;  %2669 = vmatpush.bf16.msra.mxu3 %v7585_v31  ;;  %v7595_v48 = vld [vmem:[#allocation138_spill] sm:$0xff]  ;;  %v7596_v31 = vld [vmem:[#allocation139_spill] sm:$0xff] }
 0x4a1   :  { %2651 = vmatpush.bf16.msra.mxu2 %v7583_v40  ;;  %v7594_v40 = vld [vmem:[#allocation137_spill] sm:$0xff] }
 0x4a3   :  { %2626 = vmatpush.bf16.msra.mxu0 %v7586_v25  ;;  %v7597_v25 = vld [vmem:[#allocation140_spill] sm:$0xff] }
 0x4a4   :  { %2644 = vmatpush.bf16.msrb.mxu1 %v7588_v3  ;;  %2670 = vmatpush.bf16.msra.mxu3 %v7589_v21  ;;  %v7599_v3 = vld [vmem:[#allocation142_spill] sm:$0xff] }
 0x4a5   :  { %2652 = vmatpush.bf16.msra.mxu2 %v7587_v6  ;;  %v7598_v6 = vld [vmem:[#allocation141_spill] sm:$0xff] }
 0x4a7   :  { %2627 = vmatpush.bf16.msra.mxu0 %v7590_v0 }
 0x4a9   :  { %2653 = vmatpush.bf16.msra.mxu2 %v7591_v20 }
 0x4ab   :  { %2628 = vmatpush.bf16.msra.mxu0 %v7592_v9 }
 0x4ad   :  { %2654 = vmatpush.bf16.msra.mxu2 %v7593_v18 }
 0x4af   :  { %2629 = vmatpush.bf16.msra.mxu0 %v7594_v40 }
 0x4b1   :  { %2655 = vmatpush.bf16.msra.mxu2 %v7595_v48 }
 0x4b3   :  { %2630 = vmatpush.bf16.msra.mxu0 %v7596_v31  ;;  %v7601_v31 = vld [vmem:[#allocation32_spill] sm:$0xff] }
 0x4b5   :  { %2656 = vmatpush.bf16.msra.mxu2 %v7597_v25 }
 0x4b7   :  { %2631 = vmatpush.bf16.msra.mxu0 %v7598_v6 }
 0x4b9   :  { %2657 = vmatpush.bf16.msra.mxu2 %v7599_v3 }
 0x4c4   :  { %v2299_v21 = vpop.f32.mrf.mxu1 }
 0x4ca   :  { %v2325_v0 = vpop.f32.mrf.mxu3 }
 0x4cc   :  { %v2301_v32 = vpop.f32.mrf.mxu1 }
 0x4cd   :  { %v287_v32 = vadd.f32 %v7603_v56, %v7602_v12 }
 0x4d2   :  { %v2327_v20 = vpop.f32.mrf.mxu3 }
 0x4d4   :  { %v2351_v22 = vpop.f32.mrf.mxu1 }
 0x4d7   :  { %v2286_v9 = vpop.f32.mrf.mxu0 }
 0x4d8   :  { %v2287_v18 = vadd.f32 %v2286_v9, %v7600_v54 }
 0x4da   :  { %v2300_v13 = vadd.f32 %v2299_v21, %v2287_v18  ;;  %v2377_v40 = vpop.f32.mrf.mxu3 }
 0x4dc   :  { %v4277_v14 = vmul.f32 -1.442695, %v2300_v13  ;;  %v2353_v48 = vpop.f32.mrf.mxu1 }
 0x4dd   :  { %v2312_v61 = vpop.f32.mrf.mxu2 }
 0x4de   :  { %4767 = vpow2.f32 %v4277_v14  ;;  %v2313_v25 = vadd.f32 %v2312_v61, %v7601_v31 }
 0x4df   :  { %v2288_v45 = vpop.f32.mrf.mxu0 }
 0x4e0   :  { %v2326_v6 = vadd.f32 %v2325_v0, %v2313_v25  ;;  %v7604_v25 = vld [vmem:[#allocation65_spill] sm:$0xff] }
 0x4e2   :  { %v4278_v60 = vmul.f32 -1.442695, %v2326_v6  ;;  %v2379_v3 = vpop.f32.mrf.mxu3  ;;  %v7605_v6 = vld [vmem:[#allocation100_spill] sm:$0xff] }
 0x4e3   :  { %v345_v3 = vadd.f32 %v7605_v6, %v7604_v25 }
 0x4e4   :  { %v4768_v20 = vpop.eup %4767  ;;  %4769 = vpow2.f32 %v4278_v60  ;;  %v2474_v33 = vpop.f32.mrf.mxu1 }
 0x4e5   :  { %v6530_v55 = vadd.f32 1.0, %v4768_v20  ;;  %v2505_v21 = vadd.f32 %v2474_v33, %v287_v32  ;;  %v2314_v9 = vpop.f32.mrf.mxu2 }
 0x4e7   :  { %4771 = vrcp.f32 %v6530_v55  ;;  %v4281_v13 = vmul.f32 -1.442695, %v2505_v21  ;;  %v2338_v14 = vpop.f32.mrf.mxu0  ;;  %vm2390_vm15 = vweird.f32 %v6530_v55 }
 0x4e9   :  { %4773 = vpow2.f32 %v4281_v13  ;;  %v2339_v13 = vadd.f32 %v2338_v14, %v7383_v29 }
 0x4ea   :  { %v4770_v18 = vpop.eup %4769 }
 0x4eb   :  { %v2403_v45 = vadd.f32 1.0, %v4770_v18 }
 0x4ec   :  { %v2500_v61 = vpop.f32.mrf.mxu3  ;;  %v2476_v0 = vpop.f32.mrf.mxu1 }
 0x4ed   :  { %v4772_v56 = vpop.eup %4771  ;;  %4775 = vrcp.f32 %v2403_v45  ;;  %v2364_v60 = vpop.f32.mrf.mxu2  ;;  %v2507_v20 = vadd.f32 %v2500_v61, %v345_v3  ;;  %v7607_v61 = vld [vmem:[#allocation88_spill] sm:$0xff]  ;;  %vm2409_vm0 = vweird.f32 %v2403_v45 }
 0x4ee   :  { %v2386_v48 = vmul.f32 %v4772_v56, %v6530_v55  ;;  %v2365_v33 = vadd.f32 %v2364_v60, %v5893_v59  ;;  %v258_v3 = vadd.f32 %v7607_v61, %v7606_v1  ;;  %vm2391_vm13 = vweird.f32 %v4772_v56  ;;  %v7639_v1 = vld [vmem:[#allocation86_spill] sm:$0xff] }
 0x4ef   :  { %v2340_v32 = vpop.f32.mrf.mxu0  ;;  %v4774_v9 = vpop.eup %4773  ;;  %v4282_v18 = vmul.f32 -1.442695, %v2507_v20  ;;  %vm6545_vm1 = vmor %vm2390_vm15, %vm2391_vm13 }
 0x4f0   :  { %v2387_v21 = vsub.f32 1.0, %v2386_v48  ;;  %v2378_v12 = vadd.f32 %v2377_v40, %v2365_v33  ;;  %v6538_v54 = vadd.f32 1.0, %v4774_v9  ;;  %v2352_v32 = vadd.f32 %v2351_v22, %v2339_v13 }
 0x4f1   :  { %v2415_v48 = vand.u32 2147483648, %v2403_v45  ;;  %v2413_v40 = vand.u32 2147483647, %v2403_v45  ;;  %v2394_v22 = vand.u32 2147483647, %v6530_v55 }
 0x4f2   :  { %v4279_v6 = vmul.f32 -1.442695, %v2378_v12  ;;  %v2388_v46 = vmul.f32 %v4772_v56, %v2387_v21  ;;  %vm2536_vm10 = vweird.f32 %v6538_v54 }
 0x4f3   :  { %v4776_v31 = vpop.eup %4775  ;;  %vm2414_vm3 = vcmp.eq.f32.partialorder %v2413_v40, 8.507059e+37  ;;  %vm2395_vm4 = vcmp.eq.f32.partialorder %v2394_v22, 8.507059e+37 }
 0x4f4   :  { %v2502_v0 = vpop.f32.mrf.mxu3  ;;  %v2405_v25 = vmul.f32 %v4776_v31, %v2403_v45  ;;  %4777 = vpow2.f32 %v4279_v6  ;;  %vm2410_vm14 = vweird.f32 %v4776_v31  ;;  %v2389_v12 = vadd.f32 %v4772_v56, %v2388_v46 }
 0x4f5   :  { %v2366_v62 = vpop.f32.mrf.mxu2  ;;  %4779 = vpow2.f32 %v4282_v18  ;;  %vm2411_vm2 = vmor %vm2409_vm0, %vm2410_vm14  ;;  %v2416_v18 = vor.u32 1.1754944e-38, %v2415_v48 }
 0x4f6   :  { %v2406_v60 = vsub.f32 1.0, %v2405_v25  ;;  %4781 = vrcp.f32 %v6538_v54  ;;  %v2396_v62 = vand.u32 2147483648, %v6530_v55  ;;  %v2393_v46 = vsel %vm6545_vm1, %v4772_v56, %v2389_v12 }
 0x4f7   :  { %v2461_v14 = vpop.f32.mrf.mxu0  ;;  %4783 = vtanh.f32 %v2352_v32 }
 0x4f8   :  { %v2407_v20 = vmul.f32 %v4776_v31, %v2406_v60  ;;  %v2504_v33 = vadd.f32 %v2461_v14, %v258_v3  ;;  %v2397_v3 = vor.u32 1.1754944e-38, %v2396_v62 }
 0x4fa   :  { %v2408_v25 = vadd.f32 %v4776_v31, %v2407_v20  ;;  %v4280_v21 = vmul.f32 -1.442695, %v2504_v33  ;;  %v4778_v13 = vpop.eup %4777  ;;  %v2398_v14 = vsel %vm2395_vm4, %v2397_v3, %v2393_v46  ;;  %v7611_v3 = vld [vmem:[#allocation98_spill] sm:$0xff] }
 0x4fb   :  { %v4780_v6 = vpop.eup %4779  ;;  %v2423_v61 = vadd.f32 1.0, %v4778_v13 }
 0x4fc   :  { %v2412_v0 = vsel %vm2411_vm2, %v4776_v31, %v2408_v25  ;;  %v6552_v45 = vpop.eup %4781  ;;  %4785 = vpow2.f32 %v4280_v21  ;;  %v6557_v56 = vadd.f32 1.0, %v4780_v6 }
 0x4fd   :  { %v2417_v60 = vsel %vm2414_vm3, %v2416_v18, %v2412_v0  ;;  %4787 = vrcp.f32 %v2423_v61  ;;  %v2532_v32 = vmul.f32 %v6552_v45, %v6538_v54  ;;  %v4784_v33 = vpop.eup %4783  ;;  %v2433_v46 = vand.u32 2147483647, %v2423_v61  ;;  %v7610_v0 = vld [vmem:[#allocation63_spill] sm:$0xff] }
 0x4fe   :  { %v2439_v48 = vmul.f32 %v2417_v60, %v6397_v15  ;;  %v2440_v31 = vmul.f32 %v4784_v33, %v2398_v14  ;;  %4789 = vrcp.f32 %v6557_v56  ;;  %v2435_v15 = vand.u32 2147483648, %v2423_v61 }
 0x4ff   :  { %v2463_v20 = vpop.f32.mrf.mxu0  ;;  %v2533_v9 = vsub.f32 1.0, %v2532_v32  ;;  %v316_v60 = vadd.f32 %v7611_v3, %v7610_v0  ;;  %vm2429_vm6 = vweird.f32 %v2423_v61  ;;  %vm2537_vm7 = vweird.f32 %v6552_v45 }
 0x500   :  { %v6559_v62 = vadd.f32 %v2440_v31, %v2439_v48  ;;  %v2436_v31 = vor.u32 1.1754944e-38, %v2435_v15  ;;  %vm2434_vm9 = vcmp.eq.f32.partialorder %v2433_v46, 8.507059e+37  ;;  %vm6574_vm11 = vmor %vm2536_vm10, %vm2537_vm7  ;;  %vm2556_vm2 = vweird.f32 %v6557_v56 }
 0x501   :  { %v2487_v55 = vpop.f32.mrf.mxu2  ;;  %v2534_v18 = vmul.f32 %v6552_v45, %v2533_v9 }
 0x502   :  { %v4786_v40 = vpop.eup %4785  ;;  %v2506_v48 = vadd.f32 %v2487_v55, %v316_v60 }
 0x503   :  { %v4788_v12 = vpop.eup %4787  ;;  %v2511_v25 = vadd.f32 1.0, %v4786_v40  ;;  %v2535_v33 = vadd.f32 %v6552_v45, %v2534_v18  ;;  %v2540_v18 = vand.u32 2147483647, %v6538_v54 }
 0x504   :  { %v2425_v22 = vmul.f32 %v4788_v12, %v2423_v61  ;;  %vm2430_vm5 = vweird.f32 %v4788_v12  ;;  %v6566_v14 = vpop.eup %4789 }
 0x505   :  { %4791 = vrcp.f32 %v2511_v25  ;;  %vm2431_vm8 = vmor %vm2429_vm6, %vm2430_vm5  ;;  %v2552_v61 = vmul.f32 %v6566_v14, %v6557_v56  ;;  %v2523_v3 = vand.u32 2147483648, %v2511_v25  ;;  %v2521_v60 = vand.u32 2147483647, %v2511_v25 }
 0x506   :  { %v2426_v13 = vsub.f32 1.0, %v2425_v22  ;;  %4793 = vtanh.f32 %v6559_v62  ;;  %vm2517_vm13 = vweird.f32 %v2511_v25  ;;  %vm2541_vm14 = vcmp.eq.f32.partialorder %v2540_v18, 8.507059e+37 }
 0x507   :  { %4795 = vtanh.f32 %v2506_v48  ;;  %vm2522_vm0 = vcmp.eq.f32.partialorder %v2521_v60, 8.507059e+37  ;;  %vm2557_vm1 = vweird.f32 %v6566_v14  ;;  %v7618_v60 = vld [vmem:[#allocation62_spill] sm:$0xff] }
 0x508   :  { %v2427_v6 = vmul.f32 %v4788_v12, %v2426_v13  ;;  %vm2558_vm3 = vmor %vm2556_vm2, %vm2557_vm1 }
 0x509   :  { %v2489_v21 = vpop.f32.mrf.mxu2 }
 0x50a   :  { %v2428_v20 = vadd.f32 %v4788_v12, %v2427_v6  ;;  %v2542_v21 = vand.u32 2147483648, %v6538_v54  ;;  %v2524_v54 = vor.u32 1.1754944e-38, %v2523_v3 }
 0x50b   :  { %v4792_v32 = vpop.eup %4791 }
 0x50c   :  { %v2513_v40 = vmul.f32 %v4792_v32, %v2511_v25  ;;  %v2432_v9 = vsel %vm2431_vm8, %v4788_v12, %v2428_v20  ;;  %v4794_v22 = vpop.eup %4793  ;;  %v2539_v12 = vsel %vm6574_vm11, %v6552_v45, %v2535_v33  ;;  %vm2518_vm12 = vweird.f32 %v4792_v32 }
 0x50d   :  { %v2437_v13 = vsel %vm2434_vm9, %v2436_v31, %v2432_v9  ;;  %v2543_v0 = vor.u32 1.1754944e-38, %v2542_v21  ;;  %v2553_v31 = vsub.f32 1.0, %v2552_v61  ;;  %vm2519_vm15 = vmor %vm2517_vm13, %vm2518_vm12  ;;  %v4796_v48 = vpop.eup %4795 }
 0x50e   :  { %v2514_v55 = vsub.f32 1.0, %v2513_v40  ;;  %v2443_v15 = vmul.f32 %v4794_v22, %v2437_v13  ;;  %v2560_v13 = vand.u32 2147483647, %v6557_v56 }
 0x50f   :  { %v2544_v40 = vsel %vm2541_vm14, %v2543_v0, %v2539_v12  ;;  %v2554_v33 = vmul.f32 %v6566_v14, %v2553_v31  ;;  %v7616_v12 = vld [vmem:[#allocation42_spill] sm:$0xff]  ;;  %v7620_v31 = vld [vmem:[#allocation44_spill] sm:$0xff] }
 0x510   :  { %v2515_v46 = vmul.f32 %v4792_v32, %v2514_v55  ;;  %v2444_v20 = vpack.c.bf16 %v2443_v15, %v2443_v15  ;;  %v2566_v21 = vmul.f32 %v2544_v40, %v6425_v7  ;;  %vm2561_vm4 = vcmp.eq.f32.partialorder %v2560_v13, 8.507059e+37  ;;  %v7623_v40 = vld [vmem:[#allocation84_spill] sm:$0xff]  ;;  %v7632_v13 = vld [vmem:[#allocation78_spill] sm:$0xff] }
 0x511   :  { %v2555_v0 = vadd.f32 %v6566_v14, %v2554_v33  ;;  %v7626_v33 = vld [vmem:[#allocation91_spill] sm:$0xff] }
 0x512   :  { %v2516_v9 = vadd.f32 %v4792_v32, %v2515_v46  ;;  %2593 = vmatmul.bf16.vlgmr.msra.gmra.mxu1 %v2444_v20  ;;  %2619 = vmatmul.bf16.vlgmr.msrb.gmra.mxu3 %v2444_v20  ;;  %v7617_v46 = vld [vmem:[#allocation43_spill] sm:$0xff] }
 0x513   :  { %2760 = vmatpush.bf16.msra.mxu1 %v7319_v57  ;;  %2786 = vmatpush.bf16.msrb.mxu3 %v7320_v58  ;;  %v2559_v7 = vsel %vm2558_vm3, %v6566_v14, %v2555_v0  ;;  %v7615_v14 = vld [vmem:[#allocation61_spill] sm:$0xff]  ;;  %v7630_v0 = vld [vmem:[#allocation95_spill] sm:$0xff] }
 0x514   :  { %v2520_v45 = vsel %vm2519_vm15, %v4792_v32, %v2516_v9  ;;  %v2562_v32 = vand.u32 2147483648, %v6557_v56  ;;  %v7614_v56 = vld [vmem:[#allocation60_spill] sm:$0xff]  ;;  %v7621_v9 = vld [vmem:[#allocation45_spill] sm:$0xff] }
 0x515   :  { %v2525_v22 = vsel %vm2522_vm0, %v2524_v54, %v2520_v45  ;;  %v7622_v54 = vld [vmem:[#allocation83_spill] sm:$0xff]  ;;  %v7624_v45 = vld [vmem:[#allocation70_spill] sm:$0xff] }
 0x516   :  { %v2567_v61 = vmul.f32 %v4796_v48, %v2525_v22  ;;  %v2563_v6 = vor.u32 1.1754944e-38, %v2562_v32  ;;  %v7625_v48 = vld [vmem:[#allocation71_spill] sm:$0xff]  ;;  %v7627_v22 = vld [vmem:[#allocation92_spill] sm:$0xff] }
 0x517   :  { %2761 = vmatpush.bf16.msra.mxu1 %v5347_v27  ;;  %2787 = vmatpush.bf16.msrb.mxu3 %v7321_v51  ;;  %v7631_v32 = vld [vmem:[#allocation96_spill] sm:$0xff] }
 0x518   :  { %v6588_v25 = vadd.f32 %v2567_v61, %v2566_v21  ;;  %v2564_v18 = vsel %vm2561_vm4, %v2563_v6, %v2559_v7  ;;  %v7628_v21 = vld [vmem:[#allocation72_spill] sm:$0xff]  ;;  %v7629_v61 = vld [vmem:[#allocation73_spill] sm:$0xff] }
 0x519   :  { %v7633_v7 = vld [vmem:[#allocation80_spill] sm:$0xff]  ;;  %v7634_v6 = vld [vmem:[#allocation81_spill] sm:$0xff] }
 0x51a   :  { %4797 = vtanh.f32 %v6588_v25 }
 0x51b   :  { %2762 = vmatpush.bf16.msra.mxu1 %v5359_v39  ;;  %2788 = vmatpush.bf16.msrb.mxu3 %v5367_v50 }
 0x51f   :  { %2763 = vmatpush.bf16.msra.mxu1 %v5371_v53  ;;  %2789 = vmatpush.bf16.msrb.mxu3 %v5384_v63 }
 0x520   :  { %v4798_v55 = vpop.eup %4797 }
 0x521   :  { %v2570_v15 = vmul.f32 %v4798_v55, %v2564_v18  ;;  %v7635_v55 = vld [vmem:[#allocation82_spill] sm:$0xff]  ;;  %v7636_v18 = vld [vmem:[#allocation101_spill] sm:$0xff] }
 0x522   :  { %2645 = vmatmul.bf16.vlgmr.msrb.gmra.mxu1 %v2444_v20  ;;  %2671 = vmatmul.bf16.vlgmr.msra.gmra.mxu3 %v2444_v20  ;;  %v7619_v20 = vld [vmem:[#allocation64_spill] sm:$0xff] }
 0x523   :  { %v2571_v3 = vpack.c.bf16 %v2570_v15, %v2570_v15  ;;  %2764 = vmatpush.bf16.msra.mxu1 %v5410_v16  ;;  %2790 = vmatpush.bf16.msrb.mxu3 %v7322_v47  ;;  %v7637_v15 = vld [vmem:[#allocation103_spill] sm:$0xff] }
 0x525   :  { %2580 = vmatmul.bf16.vlgmr.msrb.gmra.mxu0 %v2571_v3  ;;  %2606 = vmatmul.bf16.vlgmr.msrb.gmra.mxu2 %v2571_v3 }
 0x526   :  { %2747 = vmatpush.bf16.msrb.mxu0 %v5334_v19  ;;  %2773 = vmatpush.bf16.msrb.mxu2 %v5355_v36 }
 0x527   :  { %2765 = vmatpush.bf16.msra.mxu1 %v7323_v11  ;;  %2791 = vmatpush.bf16.msrb.mxu3 %v7324_v10 }
 0x52a   :  { %2748 = vmatpush.bf16.msrb.mxu0 %v5350_v30  ;;  %2774 = vmatpush.bf16.msrb.mxu2 %v5365_v44 }
 0x52b   :  { %2766 = vmatpush.bf16.msra.mxu1 %v7325_v26  ;;  %2792 = vmatpush.bf16.msrb.mxu3 %v5425_v41 }
 0x52e   :  { %2749 = vmatpush.bf16.msrb.mxu0 %v7270_v5  ;;  %2775 = vmatpush.bf16.msrb.mxu2 %v7271_v4 }
 0x52f   :  { %2767 = vmatpush.bf16.msra.mxu1 %v5454_v2  ;;  %2793 = vmatpush.bf16.msrb.mxu3 %v5438_v52 }
 0x532   :  { %2750 = vmatpush.bf16.msrb.mxu0 %v7274_v49  ;;  %2768 = vmatmul.bf16.vlgmr.msra.gmra.mxu1 %v2571_v3 }
 0x533   :  { %2880 = vmatpush.bf16.msrb.mxu1 %v7326_v24  ;;  %2906 = vmatpush.bf16.msra.mxu3 %v7327_v42 }
 0x534   :  { %2776 = vmatpush.bf16.msrb.mxu2 %v7275_v8  ;;  %2794 = vmatmul.bf16.vlgmr.msrb.gmra.mxu3 %v2571_v3 }
 0x535   :  { %2632 = vmatmul.bf16.vlgmr.msra.gmra.mxu0 %v2571_v3  ;;  %2658 = vmatmul.bf16.vlgmr.msra.gmra.mxu2 %v2571_v3 }
 0x536   :  { %2751 = vmatpush.bf16.msrb.mxu0 %v7277_v23 }
 0x537   :  { %2881 = vmatpush.bf16.msrb.mxu1 %v7328_v37  ;;  %2907 = vmatpush.bf16.msra.mxu3 %v7329_v28 }
 0x538   :  { %2777 = vmatpush.bf16.msrb.mxu2 %v7278_v35 }
 0x53a   :  { %2752 = vmatpush.bf16.msrb.mxu0 %v7280_v17 }
 0x53b   :  { %2882 = vmatpush.bf16.msrb.mxu1 %v7330_v34  ;;  %2908 = vmatpush.bf16.msra.mxu3 %v7331_v43 }
 0x53c   :  { %2778 = vmatpush.bf16.msrb.mxu2 %v7281_v38 }
 0x53e   :  { %2753 = vmatpush.bf16.msrb.mxu0 %v7616_v12 }
 0x53f   :  { %2883 = vmatpush.bf16.msrb.mxu1 %v7614_v56  ;;  %2909 = vmatpush.bf16.msra.mxu3 %v7615_v14 }
 0x540   :  { %2779 = vmatpush.bf16.msrb.mxu2 %v7617_v46 }
 0x542   :  { %2754 = vmatpush.bf16.msrb.mxu0 %v7620_v31 }
 0x543   :  { %2884 = vmatpush.bf16.msrb.mxu1 %v7618_v60  ;;  %2910 = vmatpush.bf16.msra.mxu3 %v7619_v20  ;;  %v7678_v20 = vld [vmem:[#allocation124_spill] sm:$0xff] }
 0x544   :  { %2780 = vmatpush.bf16.msrb.mxu2 %v7621_v9 }
 0x545   :  { %2755 = vmatmul.bf16.vlgmr.msrb.gmra.mxu0 %v2571_v3 }
 0x546   :  { %2867 = vmatpush.bf16.msra.mxu0 %v7622_v54 }
 0x547   :  { %2885 = vmatpush.bf16.msrb.mxu1 %v7624_v45  ;;  %2911 = vmatpush.bf16.msra.mxu3 %v7625_v48 }
 0x548   :  { %2893 = vmatpush.bf16.msra.mxu2 %v7623_v40 }
 0x549   :  { %2781 = vmatmul.bf16.vlgmr.msrb.gmra.mxu2 %v2571_v3  ;;  %v7638_v3 = vld [vmem:[#allocation85_spill] sm:$0xff] }
 0x54a   :  { %2868 = vmatpush.bf16.msra.mxu0 %v7626_v33  ;;  %v7676_v33 = vld [vmem:[#allocation31_spill] sm:$0xff] }
 0x54b   :  { %2886 = vmatpush.bf16.msrb.mxu1 %v7628_v21  ;;  %2912 = vmatpush.bf16.msra.mxu3 %v7629_v61  ;;  %v7640_v61 = vld [vmem:[#allocation106_spill] sm:$0xff] }
 0x54c   :  { %2894 = vmatpush.bf16.msra.mxu2 %v7627_v22 }
 0x54e   :  { %2869 = vmatpush.bf16.msra.mxu0 %v7630_v0  ;;  %v7641_v0 = vld [vmem:[#allocation107_spill] sm:$0xff] }
 0x54f   :  { %2887 = vmatpush.bf16.msrb.mxu1 %v7632_v13  ;;  %2913 = vmatpush.bf16.msra.mxu3 %v7633_v7  ;;  %v7643_v13 = vld [vmem:[#allocation94_spill] sm:$0xff]  ;;  %v7644_v7 = vld [vmem:[#allocation113_spill] sm:$0xff] }
 0x550   :  { %2895 = vmatpush.bf16.msra.mxu2 %v7631_v32  ;;  %v7642_v32 = vld [vmem:[#allocation93_spill] sm:$0xff] }
 0x552   :  { %2870 = vmatpush.bf16.msra.mxu0 %v7636_v18  ;;  %v7647_v18 = vld [vmem:[#allocation99_spill] sm:$0xff] }
 0x553   :  { %2932 = vmatpush.bf16.msra.mxu1 %v7634_v6  ;;  %2958 = vmatpush.bf16.msrb.mxu3 %v7635_v55  ;;  %v7645_v6 = vld [vmem:[#allocation114_spill] sm:$0xff]  ;;  %v7646_v55 = vld [vmem:[#allocation97_spill] sm:$0xff] }
 0x554   :  { %2896 = vmatpush.bf16.msra.mxu2 %v7637_v15  ;;  %v7648_v15 = vld [vmem:[#allocation117_spill] sm:$0xff] }
 0x556   :  { %2871 = vmatpush.bf16.msra.mxu0 %v7640_v61  ;;  %v7651_v61 = vld [vmem:[#allocation105_spill] sm:$0xff] }
 0x557   :  { %2933 = vmatpush.bf16.msra.mxu1 %v7638_v3  ;;  %2959 = vmatpush.bf16.msrb.mxu3 %v7639_v1  ;;  %v7649_v3 = vld [vmem:[#allocation119_spill] sm:$0xff]  ;;  %v7650_v1 = vld [vmem:[#allocation104_spill] sm:$0xff] }
 0x558   :  { %2897 = vmatpush.bf16.msra.mxu2 %v7641_v0  ;;  %v7652_v0 = vld [vmem:[#allocation123_spill] sm:$0xff] }
 0x55a   :  { %2872 = vmatpush.bf16.msra.mxu0 %v7644_v7  ;;  %v7655_v7 = vld [vmem:[#allocation127_spill] sm:$0xff] }
 0x55b   :  { %2934 = vmatpush.bf16.msra.mxu1 %v7642_v32  ;;  %2960 = vmatpush.bf16.msrb.mxu3 %v7643_v13  ;;  %v7653_v32 = vld [vmem:[#allocation125_spill] sm:$0xff]  ;;  %v7654_v13 = vld [vmem:[#allocation126_spill] sm:$0xff] }
 0x55c   :  { %2898 = vmatpush.bf16.msra.mxu2 %v7645_v6  ;;  %v7656_v6 = vld [vmem:[#allocation108_spill] sm:$0xff] }
 0x55e   :  { %2873 = vmatpush.bf16.msra.mxu0 %v7648_v15  ;;  %v7659_v15 = vld [vmem:[#allocation129_spill] sm:$0xff] }
 0x55f   :  { %2935 = vmatpush.bf16.msra.mxu1 %v7646_v55  ;;  %2961 = vmatpush.bf16.msrb.mxu3 %v7647_v18  ;;  %v7657_v55 = vld [vmem:[#allocation109_spill] sm:$0xff]  ;;  %v7658_v18 = vld [vmem:[#allocation128_spill] sm:$0xff] }
 0x560   :  { %2899 = vmatpush.bf16.msra.mxu2 %v7649_v3  ;;  %v7660_v3 = vld [vmem:[#allocation115_spill] sm:$0xff] }
 0x562   :  { %2874 = vmatpush.bf16.msra.mxu0 %v7652_v0  ;;  %v7663_v0 = vld [vmem:[#allocation132_spill] sm:$0xff] }
 0x563   :  { %2936 = vmatpush.bf16.msra.mxu1 %v7650_v1  ;;  %2962 = vmatpush.bf16.msrb.mxu3 %v7651_v61  ;;  %v7661_v1 = vld [vmem:[#allocation116_spill] sm:$0xff]  ;;  %v7662_v61 = vld [vmem:[#allocation131_spill] sm:$0xff] }
 0x564   :  { %2900 = vmatpush.bf16.msra.mxu2 %v7653_v32  ;;  %v7664_v32 = vld [vmem:[#allocation120_spill] sm:$0xff] }
 0x566   :  { %2919 = vmatpush.bf16.msrb.mxu0 %v7654_v13  ;;  %v7665_v13 = vld [vmem:[#allocation122_spill] sm:$0xff] }
 0x567   :  { %2937 = vmatpush.bf16.msra.mxu1 %v7656_v6  ;;  %2963 = vmatpush.bf16.msrb.mxu3 %v7657_v55  ;;  %v7667_v6 = vld [vmem:[#allocation134_spill] sm:$0xff]  ;;  %v7668_v55 = vld [vmem:[#allocation135_spill] sm:$0xff] }
 0x568   :  { %2945 = vmatpush.bf16.msrb.mxu2 %v7655_v7  ;;  %v7666_v7 = vld [vmem:[#allocation133_spill] sm:$0xff] }
 0x56a   :  { %2920 = vmatpush.bf16.msrb.mxu0 %v7658_v18  ;;  %v7669_v18 = vld [vmem:[#allocation136_spill] sm:$0xff] }
 0x56b   :  { %2938 = vmatpush.bf16.msra.mxu1 %v7660_v3  ;;  %2964 = vmatpush.bf16.msrb.mxu3 %v7661_v1  ;;  %v7671_v3 = vld [vmem:[#allocation138_spill] sm:$0xff]  ;;  %v7672_v1 = vld [vmem:[#allocation139_spill] sm:$0xff] }
 0x56c   :  { %2946 = vmatpush.bf16.msrb.mxu2 %v7659_v15  ;;  %v7670_v15 = vld [vmem:[#allocation137_spill] sm:$0xff] }
 0x56e   :  { %2921 = vmatpush.bf16.msrb.mxu0 %v7662_v61  ;;  %v7673_v61 = vld [vmem:[#allocation140_spill] sm:$0xff] }
 0x56f   :  { %2939 = vmatpush.bf16.msra.mxu1 %v7664_v32  ;;  %2965 = vmatpush.bf16.msrb.mxu3 %v7665_v13  ;;  %v7675_v32 = vld [vmem:[#allocation142_spill] sm:$0xff] }
 0x570   :  { %2947 = vmatpush.bf16.msrb.mxu2 %v7663_v0  ;;  %v7674_v0 = vld [vmem:[#allocation141_spill] sm:$0xff] }
 0x572   :  { %2922 = vmatpush.bf16.msrb.mxu0 %v7666_v7 }
 0x574   :  { %2948 = vmatpush.bf16.msrb.mxu2 %v7667_v6 }
 0x576   :  { %2923 = vmatpush.bf16.msrb.mxu0 %v7668_v55 }
 0x578   :  { %2949 = vmatpush.bf16.msrb.mxu2 %v7669_v18 }
 0x57a   :  { %2924 = vmatpush.bf16.msrb.mxu0 %v7670_v15 }
 0x57c   :  { %2950 = vmatpush.bf16.msrb.mxu2 %v7671_v3 }
 0x57e   :  { %2925 = vmatpush.bf16.msrb.mxu0 %v7672_v1  ;;  %v7677_v1 = vld [vmem:[#allocation32_spill] sm:$0xff] }
 0x580   :  { %2951 = vmatpush.bf16.msrb.mxu2 %v7673_v61 }
 0x582   :  { %2926 = vmatpush.bf16.msrb.mxu0 %v7674_v0 }
 0x584   :  { %2952 = vmatpush.bf16.msrb.mxu2 %v7675_v32 }
 0x58f   :  { %v2594_v13 = vpop.f32.mrf.mxu1 }
 0x595   :  { %v2620_v7 = vpop.f32.mrf.mxu3 }
 0x597   :  { %v2596_v22 = vpop.f32.mrf.mxu1 }
 0x59d   :  { %v2622_v6 = vpop.f32.mrf.mxu3 }
 0x59f   :  { %v2646_v21 = vpop.f32.mrf.mxu1 }
 0x5a2   :  { %v2581_v55 = vpop.f32.mrf.mxu0 }
 0x5a3   :  { %v2582_v18 = vadd.f32 %v2581_v55, %v7676_v33 }
 0x5a5   :  { %v2595_v48 = vadd.f32 %v2594_v13, %v2582_v18  ;;  %v2672_v15 = vpop.f32.mrf.mxu3 }
 0x5a7   :  { %v4283_v40 = vmul.f32 -1.442695, %v2595_v48  ;;  %v2648_v3 = vpop.f32.mrf.mxu1 }
 0x5a8   :  { %v2607_v45 = vpop.f32.mrf.mxu2 }
 0x5a9   :  { %4799 = vpow2.f32 %v4283_v40  ;;  %v2608_v61 = vadd.f32 %v2607_v45, %v7677_v1 }
 0x5aa   :  { %v2583_v54 = vpop.f32.mrf.mxu0 }
 0x5ab   :  { %v2621_v0 = vadd.f32 %v2620_v7, %v2608_v61 }
 0x5ad   :  { %v4284_v9 = vmul.f32 -1.442695, %v2621_v0  ;;  %v2674_v32 = vpop.f32.mrf.mxu3 }
 0x5ae   :  { %v7679_v32 = vld [vmem:[#allocation111_spill] sm:$0xff] }
 0x5af   :  { %v4800_v31 = vpop.eup %4799  ;;  %4801 = vpow2.f32 %v4284_v9  ;;  %v2769_v22 = vpop.f32.mrf.mxu1 }
 0x5b0   :  { %v6691_v6 = vadd.f32 1.0, %v4800_v31  ;;  %v2800_v60 = vadd.f32 %v2769_v22, %v7678_v20  ;;  %v2609_v55 = vpop.f32.mrf.mxu2 }
 0x5b2   :  { %4803 = vrcp.f32 %v6691_v6  ;;  %v4287_v48 = vmul.f32 -1.442695, %v2800_v60  ;;  %v2633_v13 = vpop.f32.mrf.mxu0  ;;  %vm2685_vm7 = vweird.f32 %v6691_v6 }
 0x5b3   :  { %v2634_v60 = vadd.f32 %v2633_v13, %v7383_v29 }
 0x5b4   :  { %4805 = vpow2.f32 %v4287_v48 }
 0x5b5   :  { %v4802_v18 = vpop.eup %4801 }
 0x5b6   :  { %v2698_v40 = vadd.f32 1.0, %v4802_v18 }
 0x5b7   :  { %v2795_v45 = vpop.f32.mrf.mxu3  ;;  %v2771_v54 = vpop.f32.mrf.mxu1 }
 0x5b8   :  { %v4804_v61 = vpop.eup %4803  ;;  %4807 = vrcp.f32 %v2698_v40  ;;  %v2659_v0 = vpop.f32.mrf.mxu2  ;;  %v2802_v31 = vadd.f32 %v2795_v45, %v7679_v32  ;;  %v2647_v45 = vadd.f32 %v2646_v21, %v2634_v60  ;;  %vm2704_vm8 = vweird.f32 %v2698_v40 }
 0x5b9   :  { %v2681_v9 = vmul.f32 %v4804_v61, %v6691_v6  ;;  %v2660_v7 = vadd.f32 %v2659_v0, %v5893_v59  ;;  %v2710_v0 = vand.u32 2147483648, %v2698_v40  ;;  %vm2686_vm5 = vweird.f32 %v4804_v61 }
 0x5ba   :  { %v2635_v20 = vpop.f32.mrf.mxu0  ;;  %v4806_v3 = vpop.eup %4805  ;;  %v4288_v1 = vmul.f32 -1.442695, %v2802_v31  ;;  %v7680_v31 = vld [vmem:[#allocation48_spill] sm:$0xff]  ;;  %vm6705_vm9 = vmor %vm2685_vm7, %vm2686_vm5 }
 0x5bb   :  { %v2682_v22 = vsub.f32 1.0, %v2681_v9  ;;  %v2673_v55 = vadd.f32 %v2672_v15, %v2660_v7  ;;  %v6699_v18 = vadd.f32 1.0, %v4806_v3  ;;  %v2708_v15 = vand.u32 2147483647, %v2698_v40 }
 0x5bd   :  { %v4285_v54 = vmul.f32 -1.442695, %v2673_v55  ;;  %v2683_v12 = vmul.f32 %v4804_v61, %v2682_v22  ;;  %vm2709_vm11 = vcmp.eq.f32.partialorder %v2708_v15, 8.507059e+37  ;;  %vm2831_vm2 = vweird.f32 %v6699_v18 }
 0x5be   :  { %v4808_v48 = vpop.eup %4807 }
 0x5bf   :  { %v2797_v33 = vpop.f32.mrf.mxu3  ;;  %v2700_v46 = vmul.f32 %v4808_v48, %v2698_v40  ;;  %4809 = vpow2.f32 %v4285_v54  ;;  %vm2705_vm6 = vweird.f32 %v4808_v48  ;;  %v2684_v32 = vadd.f32 %v4804_v61, %v2683_v12 }
 0x5c0   :  { %v2661_v14 = vpop.f32.mrf.mxu2  ;;  %4811 = vpow2.f32 %v4288_v1  ;;  %v2691_v33 = vand.u32 2147483648, %v6691_v6  ;;  %v2689_v1 = vand.u32 2147483647, %v6691_v6  ;;  %vm2706_vm10 = vmor %vm2704_vm8, %vm2705_vm6 }
 0x5c1   :  { %v2701_v56 = vsub.f32 1.0, %v2700_v46  ;;  %4813 = vrcp.f32 %v6699_v18  ;;  %v2688_v3 = vsel %vm6705_vm9, %v4804_v61, %v2684_v32 }
 0x5c2   :  { %v2756_v9 = vpop.f32.mrf.mxu0  ;;  %4815 = vtanh.f32 %v2647_v45  ;;  %v2692_v60 = vor.u32 1.1754944e-38, %v2691_v33  ;;  %vm2690_vm12 = vcmp.eq.f32.partialorder %v2689_v1, 8.507059e+37 }
 0x5c3   :  { %v2702_v13 = vmul.f32 %v4808_v48, %v2701_v56  ;;  %v2799_v7 = vadd.f32 %v2756_v9, %v7680_v31  ;;  %v2711_v56 = vor.u32 1.1754944e-38, %v2710_v0 }
 0x5c4   :  { %v2693_v9 = vsel %vm2690_vm12, %v2692_v60, %v2688_v3 }
 0x5c5   :  { %v2703_v46 = vadd.f32 %v4808_v48, %v2702_v13  ;;  %v4286_v21 = vmul.f32 -1.442695, %v2799_v7  ;;  %v4810_v20 = vpop.eup %4809 }
 0x5c6   :  { %v4812_v12 = vpop.eup %4811  ;;  %v2718_v55 = vadd.f32 1.0, %v4810_v20 }
 0x5c7   :  { %v2707_v22 = vsel %vm2706_vm10, %v4808_v48, %v2703_v46  ;;  %v6712_v40 = vpop.eup %4813  ;;  %4817 = vpow2.f32 %v4286_v21  ;;  %v6717_v61 = vadd.f32 1.0, %v4812_v12 }
 0x5c8   :  { %v2712_v54 = vsel %vm2709_vm11, %v2711_v56, %v2707_v22  ;;  %4819 = vrcp.f32 %v2718_v55  ;;  %v2827_v45 = vmul.f32 %v6712_v40, %v6699_v18  ;;  %v4816_v31 = vpop.eup %4815  ;;  %v2728_v12 = vand.u32 2147483647, %v2718_v55 }
 0x5c9   :  { %v2734_v0 = vmul.f32 %v2712_v54, %v6559_v62  ;;  %v2735_v48 = vmul.f32 %v4816_v31, %v2693_v9  ;;  %4821 = vrcp.f32 %v6717_v61  ;;  %v2730_v62 = vand.u32 2147483648, %v2718_v55  ;;  %v7683_v54 = vld [vmem:[#allocation110_spill] sm:$0xff] }
 0x5ca   :  { %v2758_v13 = vpop.f32.mrf.mxu0  ;;  %v2828_v7 = vsub.f32 1.0, %v2827_v45  ;;  %vm2724_vm14 = vweird.f32 %v2718_v55  ;;  %vm2832_vm15 = vweird.f32 %v6712_v40  ;;  %vm2729_vm1 = vcmp.eq.f32.partialorder %v2728_v12, 8.507059e+37 }
 0x5cb   :  { %v6719_v33 = vadd.f32 %v2735_v48, %v2734_v0  ;;  %v2731_v45 = vor.u32 1.1754944e-38, %v2730_v62  ;;  %vm6733_vm3 = vmor %vm2831_vm2, %vm2832_vm15  ;;  %vm2851_vm10 = vweird.f32 %v6717_v61 }
 0x5cc   :  { %v2782_v6 = vpop.f32.mrf.mxu2  ;;  %v2829_v20 = vmul.f32 %v6712_v40, %v2828_v7 }
 0x5cd   :  { %v4818_v15 = vpop.eup %4817  ;;  %v2801_v9 = vadd.f32 %v2782_v6, %v7683_v54 }
 0x5ce   :  { %v4820_v32 = vpop.eup %4819  ;;  %v2806_v14 = vadd.f32 1.0, %v4818_v15  ;;  %v2830_v13 = vadd.f32 %v6712_v40, %v2829_v20  ;;  %v2837_v15 = vand.u32 2147483648, %v6699_v18 }
 0x5cf   :  { %v2720_v1 = vmul.f32 %v4820_v32, %v2718_v55  ;;  %vm2725_vm13 = vweird.f32 %v4820_v32  ;;  %v6724_v3 = vpop.eup %4821 }
 0x5d0   :  { %4823 = vrcp.f32 %v2806_v14  ;;  %vm2726_vm0 = vmor %vm2724_vm14, %vm2725_vm13  ;;  %v2847_v55 = vmul.f32 %v6724_v3, %v6717_v61  ;;  %v2818_v20 = vand.u32 2147483648, %v2806_v14  ;;  %vm2812_vm5 = vweird.f32 %v2806_v14 }
 0x5d1   :  { %v2721_v21 = vsub.f32 1.0, %v2720_v1  ;;  %4825 = vtanh.f32 %v6719_v33  ;;  %vm2852_vm9 = vweird.f32 %v6724_v3 }
 0x5d2   :  { %4827 = vtanh.f32 %v2801_v9  ;;  %v2848_v54 = vsub.f32 1.0, %v2847_v55  ;;  %vm2853_vm11 = vmor %vm2851_vm10, %vm2852_vm9 }
 0x5d3   :  { %v2722_v56 = vmul.f32 %v4820_v32, %v2721_v21 }
 0x5d4   :  { %v2784_v46 = vpop.f32.mrf.mxu2 }
 0x5d5   :  { %v2723_v22 = vadd.f32 %v4820_v32, %v2722_v56  ;;  %v2835_v46 = vand.u32 2147483647, %v6699_v18  ;;  %v2816_v56 = vand.u32 2147483647, %v2806_v14  ;;  %v2819_v18 = vor.u32 1.1754944e-38, %v2818_v20  ;;  %v7721_v20 = vld [vmem:[#allocation119_spill] sm:$0xff] }
 0x5d6   :  { %v4824_v60 = vpop.eup %4823 }
 0x5d7   :  { %v2808_v0 = vmul.f32 %v4824_v60, %v2806_v14  ;;  %v2727_v31 = vsel %vm2726_vm0, %v4820_v32, %v2723_v22  ;;  %v4826_v48 = vpop.eup %4825  ;;  %v2834_v32 = vsel %vm6733_vm3, %v6712_v40, %v2830_v13  ;;  %vm2813_vm4 = vweird.f32 %v4824_v60 }
 0x5d8   :  { %v2732_v7 = vsel %vm2729_vm1, %v2731_v45, %v2727_v31  ;;  %v2838_v22 = vor.u32 1.1754944e-38, %v2837_v15  ;;  %vm2836_vm6 = vcmp.eq.f32.partialorder %v2835_v46, 8.507059e+37  ;;  %vm2814_vm7 = vmor %vm2812_vm5, %vm2813_vm4  ;;  %vm2817_vm8 = vcmp.eq.f32.partialorder %v2816_v56, 8.507059e+37  ;;  %v4828_v9 = vpop.eup %4827  ;;  %v7719_v46 = vld [vmem:[#allocation99_spill] sm:$0xff] }
 0x5d9   :  { %v2809_v6 = vsub.f32 1.0, %v2808_v0  ;;  %v2738_v21 = vmul.f32 %v4826_v48, %v2732_v7  ;;  %v2849_v13 = vmul.f32 %v6724_v3, %v2848_v54  ;;  %v7724_v56 = vld [vmem:[#allocation123_spill] sm:$0xff]  ;;  %v7727_v54 = vld [vmem:[#allocation108_spill] sm:$0xff] }
 0x5da   :  { %v2839_v0 = vsel %vm2836_vm6, %v2838_v22, %v2834_v32  ;;  %v7722_v32 = vld [vmem:[#allocation104_spill] sm:$0xff]  ;;  %v7726_v22 = vld [vmem:[#allocation125_spill] sm:$0xff] }
 0x5db   :  { %v2810_v62 = vmul.f32 %v4824_v60, %v2809_v6  ;;  %v2739_v12 = vpack.c.bf16 %v2738_v21, %v2738_v21  ;;  %v2861_v48 = vmul.f32 %v2839_v0, %v6588_v25  ;;  %v2850_v55 = vadd.f32 %v6724_v3, %v2849_v13  ;;  %v7718_v6 = vld [vmem:[#allocation97_spill] sm:$0xff]  ;;  %v7730_v0 = vld [vmem:[#allocation128_spill] sm:$0xff] }
 0x5dc   :  { %v7720_v21 = vld [vmem:[#allocation117_spill] sm:$0xff]  ;;  %v7733_v13 = vld [vmem:[#allocation116_spill] sm:$0xff] }
 0x5dd   :  { %v2811_v45 = vadd.f32 %v4824_v60, %v2810_v62  ;;  %2888 = vmatmul.bf16.vlgmr.msrb.gmra.mxu1 %v2739_v12  ;;  %2914 = vmatmul.bf16.vlgmr.msra.gmra.mxu3 %v2739_v12  ;;  %v7723_v62 = vld [vmem:[#allocation105_spill] sm:$0xff] }
 0x5de   :  { %3055 = vmatpush.bf16.msrb.mxu1 %v7319_v57  ;;  %3081 = vmatpush.bf16.msra.mxu3 %v7320_v58  ;;  %v2857_v57 = vand.u32 2147483648, %v6717_v61  ;;  %v2855_v58 = vand.u32 2147483647, %v6717_v61  ;;  %v7716_v61 = vld [vmem:[#allocation113_spill] sm:$0xff] }
 0x5df   :  { %v2815_v40 = vsel %vm2814_vm7, %v4824_v60, %v2811_v45  ;;  %v7728_v45 = vld [vmem:[#allocation127_spill] sm:$0xff] }
 0x5e0   :  { %v2820_v31 = vsel %vm2817_vm8, %v2819_v18, %v2815_v40  ;;  %vm2856_vm12 = vcmp.eq.f32.partialorder %v2855_v58, 8.507059e+37  ;;  %v7729_v18 = vld [vmem:[#allocation109_spill] sm:$0xff]  ;;  %v7731_v40 = vld [vmem:[#allocation115_spill] sm:$0xff]  ;;  %v7739_v58 = vld [vmem:[#allocation134_spill] sm:$0xff] }
 0x5e1   :  { %v2862_v15 = vmul.f32 %v4828_v9, %v2820_v31  ;;  %v7732_v9 = vld [vmem:[#allocation129_spill] sm:$0xff]  ;;  %v7734_v31 = vld [vmem:[#allocation131_spill] sm:$0xff] }
 0x5e2   :  { %3056 = vmatpush.bf16.msrb.mxu1 %v5347_v27  ;;  %3082 = vmatpush.bf16.msra.mxu3 %v7321_v51  ;;  %v2854_v27 = vsel %vm2853_vm11, %v6724_v3, %v2850_v55  ;;  %v2858_v51 = vor.u32 1.1754944e-38, %v2857_v57  ;;  %v7717_v3 = vld [vmem:[#allocation114_spill] sm:$0xff]  ;;  %v7738_v57 = vld [vmem:[#allocation133_spill] sm:$0xff] }
 0x5e3   :  { %v6747_v14 = vadd.f32 %v2862_v15, %v2861_v48  ;;  %v7735_v48 = vld [vmem:[#allocation120_spill] sm:$0xff]  ;;  %v7737_v55 = vld [vmem:[#allocation122_spill] sm:$0xff] }
 0x5e4   :  { %v2859_v60 = vsel %vm2856_vm12, %v2858_v51, %v2854_v27  ;;  %v7736_v15 = vld [vmem:[#allocation132_spill] sm:$0xff]  ;;  %v7740_v27 = vld [vmem:[#allocation135_spill] sm:$0xff] }
 0x5e5   :  { %4829 = vtanh.f32 %v6747_v14  ;;  %v7741_v51 = vld [vmem:[#allocation136_spill] sm:$0xff] }
 0x5e6   :  { %3057 = vmatpush.bf16.msrb.mxu1 %v5359_v39  ;;  %3083 = vmatpush.bf16.msra.mxu3 %v5367_v50  ;;  %v7689_v39 = vld [vmem:[#allocation43_spill] sm:$0xff]  ;;  %v7691_v50 = vld [vmem:[#allocation64_spill] sm:$0xff] }
 0x5ea   :  { %3058 = vmatpush.bf16.msrb.mxu1 %v5371_v53  ;;  %3084 = vmatpush.bf16.msra.mxu3 %v5384_v63  ;;  %v7692_v53 = vld [vmem:[#allocation44_spill] sm:$0xff]  ;;  %v7693_v63 = vld [vmem:[#allocation45_spill] sm:$0xff] }
 0x5eb   :  { %v4830_v25 = vpop.eup %4829 }
 0x5ec   :  { %v2865_v7 = vmul.f32 %v4830_v25, %v2859_v60  ;;  %v7742_v25 = vld [vmem:[#allocation137_spill] sm:$0xff]  ;;  %v7743_v60 = vld [vmem:[#allocation138_spill] sm:$0xff] }
 0x5ed   :  { %2940 = vmatmul.bf16.vlgmr.msra.gmra.mxu1 %v2739_v12  ;;  %2966 = vmatmul.bf16.vlgmr.msrb.gmra.mxu3 %v2739_v12  ;;  %v7725_v12 = vld [vmem:[#allocation126_spill] sm:$0xff] }
 0x5ee   :  { %v2866_v1 = vpack.c.bf16 %v2865_v7, %v2865_v7  ;;  %3059 = vmatpush.bf16.msrb.mxu1 %v5410_v16  ;;  %3085 = vmatpush.bf16.msra.mxu3 %v7322_v47  ;;  %v7694_v16 = vld [vmem:[#allocation83_spill] sm:$0xff]  ;;  %v7706_v47 = vld [vmem:[#allocation80_spill] sm:$0xff] }
 0x5ef   :  { %v7744_v7 = vld [vmem:[#allocation139_spill] sm:$0xff] }
 0x5f0   :  { %2875 = vmatmul.bf16.vlgmr.msra.gmra.mxu0 %v2866_v1  ;;  %2901 = vmatmul.bf16.vlgmr.msra.gmra.mxu2 %v2866_v1 }
 0x5f1   :  { %3042 = vmatpush.bf16.msra.mxu0 %v5334_v19  ;;  %3068 = vmatpush.bf16.msra.mxu2 %v5355_v36  ;;  %v7686_v19 = vld [vmem:[#allocation60_spill] sm:$0xff]  ;;  %v7688_v36 = vld [vmem:[#allocation42_spill] sm:$0xff] }
 0x5f2   :  { %3060 = vmatpush.bf16.msrb.mxu1 %v7323_v11  ;;  %3086 = vmatpush.bf16.msra.mxu3 %v7324_v10  ;;  %v7707_v11 = vld [vmem:[#allocation82_spill] sm:$0xff]  ;;  %v7708_v10 = vld [vmem:[#allocation101_spill] sm:$0xff] }
 0x5f5   :  { %3043 = vmatpush.bf16.msra.mxu0 %v5350_v30  ;;  %3069 = vmatpush.bf16.msra.mxu2 %v5365_v44  ;;  %v7687_v30 = vld [vmem:[#allocation61_spill] sm:$0xff]  ;;  %v7690_v44 = vld [vmem:[#allocation62_spill] sm:$0xff] }
 0x5f6   :  { %3061 = vmatpush.bf16.msrb.mxu1 %v7325_v26  ;;  %3087 = vmatpush.bf16.msra.mxu3 %v5425_v41  ;;  %v7695_v41 = vld [vmem:[#allocation70_spill] sm:$0xff]  ;;  %v7709_v26 = vld [vmem:[#allocation103_spill] sm:$0xff] }
 0x5f9   :  { %3044 = vmatpush.bf16.msra.mxu0 %v7270_v5  ;;  %3070 = vmatpush.bf16.msra.mxu2 %v7271_v4  ;;  %v7698_v5 = vld [vmem:[#allocation91_spill] sm:$0xff]  ;;  %v7699_v4 = vld [vmem:[#allocation72_spill] sm:$0xff] }
 0x5fa   :  { %3062 = vmatpush.bf16.msrb.mxu1 %v5454_v2  ;;  %3088 = vmatpush.bf16.msra.mxu3 %v5438_v52  ;;  %v7696_v52 = vld [vmem:[#allocation84_spill] sm:$0xff]  ;;  %v7697_v2 = vld [vmem:[#allocation71_spill] sm:$0xff] }
 0x5fd   :  { %3045 = vmatpush.bf16.msra.mxu0 %v7274_v49  ;;  %3063 = vmatmul.bf16.vlgmr.msrb.gmra.mxu1 %v2866_v1  ;;  %v7700_v49 = vld [vmem:[#allocation92_spill] sm:$0xff] }
 0x5fe   :  { %3175 = vmatpush.bf16.msra.mxu1 %v7326_v24  ;;  %3201 = vmatpush.bf16.msrb.mxu3 %v7327_v42  ;;  %v7710_v24 = vld [vmem:[#allocation85_spill] sm:$0xff]  ;;  %v7711_v42 = vld [vmem:[#allocation86_spill] sm:$0xff] }
 0x5ff   :  { %3071 = vmatpush.bf16.msra.mxu2 %v7275_v8  ;;  %3089 = vmatmul.bf16.vlgmr.msra.gmra.mxu3 %v2866_v1  ;;  %v7701_v8 = vld [vmem:[#allocation73_spill] sm:$0xff] }
 0x600   :  { %2927 = vmatmul.bf16.vlgmr.msrb.gmra.mxu0 %v2866_v1  ;;  %2953 = vmatmul.bf16.vlgmr.msrb.gmra.mxu2 %v2866_v1 }
 0x601   :  { %3046 = vmatpush.bf16.msra.mxu0 %v7277_v23  ;;  %v7702_v23 = vld [vmem:[#allocation95_spill] sm:$0xff] }
 0x602   :  { %3176 = vmatpush.bf16.msra.mxu1 %v7328_v37  ;;  %3202 = vmatpush.bf16.msrb.mxu3 %v7329_v28  ;;  %v7712_v37 = vld [vmem:[#allocation106_spill] sm:$0xff]  ;;  %v7713_v28 = vld [vmem:[#allocation107_spill] sm:$0xff] }
 0x603   :  { %3072 = vmatpush.bf16.msra.mxu2 %v7278_v35  ;;  %v7703_v35 = vld [vmem:[#allocation78_spill] sm:$0xff] }
 0x605   :  { %3047 = vmatpush.bf16.msra.mxu0 %v7280_v17  ;;  %v7704_v17 = vld [vmem:[#allocation96_spill] sm:$0xff] }
 0x606   :  { %3177 = vmatpush.bf16.msra.mxu1 %v7330_v34  ;;  %3203 = vmatpush.bf16.msrb.mxu3 %v7331_v43  ;;  %v7714_v34 = vld [vmem:[#allocation93_spill] sm:$0xff]  ;;  %v7715_v43 = vld [vmem:[#allocation94_spill] sm:$0xff] }
 0x607   :  { %3073 = vmatpush.bf16.msra.mxu2 %v7281_v38  ;;  %v7705_v38 = vld [vmem:[#allocation81_spill] sm:$0xff] }
 0x609   :  { %3048 = vmatpush.bf16.msra.mxu0 %v7688_v36 }
 0x60a   :  { %3178 = vmatpush.bf16.msra.mxu1 %v7686_v19  ;;  %3204 = vmatpush.bf16.msrb.mxu3 %v7687_v30  ;;  %v7746_v19 = vld [vmem:[#allocation141_spill] sm:$0xff]  ;;  %v7747_v30 = vld [vmem:[#allocation142_spill] sm:$0xff] }
 0x60b   :  { %3074 = vmatpush.bf16.msra.mxu2 %v7689_v39 }
 0x60d   :  { %3049 = vmatpush.bf16.msra.mxu0 %v7692_v53 }
 0x60e   :  { %3179 = vmatpush.bf16.msra.mxu1 %v7690_v44  ;;  %3205 = vmatpush.bf16.msrb.mxu3 %v7691_v50 }
 0x60f   :  { %3075 = vmatpush.bf16.msra.mxu2 %v7693_v63 }
 0x610   :  { %3050 = vmatmul.bf16.vlgmr.msra.gmra.mxu0 %v2866_v1 }
 0x611   :  { %3162 = vmatpush.bf16.msrb.mxu0 %v7694_v16  ;;  %v7748_v16 = vld [vmem:[#allocation31_spill] sm:$0xff] }
 0x612   :  { %3180 = vmatpush.bf16.msra.mxu1 %v7695_v41  ;;  %3206 = vmatpush.bf16.msrb.mxu3 %v7697_v2 }
 0x613   :  { %3188 = vmatpush.bf16.msrb.mxu2 %v7696_v52 }
 0x614   :  { %3076 = vmatmul.bf16.vlgmr.msra.gmra.mxu2 %v2866_v1  ;;  %v7745_v1 = vld [vmem:[#allocation140_spill] sm:$0xff] }
 0x615   :  { %3163 = vmatpush.bf16.msrb.mxu0 %v7698_v5 }
 0x616   :  { %3181 = vmatpush.bf16.msra.mxu1 %v7699_v4  ;;  %3207 = vmatpush.bf16.msrb.mxu3 %v7701_v8  ;;  %v7749_v8 = vld [vmem:[#allocation32_spill] sm:$0xff] }
 0x617   :  { %3189 = vmatpush.bf16.msrb.mxu2 %v7700_v49 }
 0x619   :  { %3164 = vmatpush.bf16.msrb.mxu0 %v7702_v23 }
 0x61a   :  { %3182 = vmatpush.bf16.msra.mxu1 %v7703_v35  ;;  %3208 = vmatpush.bf16.msrb.mxu3 %v7706_v47 }
 0x61b   :  { %3190 = vmatpush.bf16.msrb.mxu2 %v7704_v17 }
 0x61d   :  { %3165 = vmatpush.bf16.msrb.mxu0 %v7708_v10  ;;  %v7751_v10 = vld [vmem:[#allocation130_spill] sm:$0xff] }
 0x61e   :  { %3227 = vmatpush.bf16.msrb.mxu1 %v7705_v38  ;;  %3253 = vmatpush.bf16.msra.mxu3 %v7707_v11  ;;  %v7750_v11 = vld [vmem:[#allocation74_spill] sm:$0xff] }
 0x61f   :  { %3191 = vmatpush.bf16.msrb.mxu2 %v7709_v26  ;;  %v292_v26 = vadd.f32 %v7751_v10, %v7750_v11 }
 0x621   :  { %3166 = vmatpush.bf16.msrb.mxu0 %v7712_v37 }
 0x622   :  { %3228 = vmatpush.bf16.msrb.mxu1 %v7710_v24  ;;  %3254 = vmatpush.bf16.msra.mxu3 %v7711_v42 }
 0x623   :  { %3192 = vmatpush.bf16.msrb.mxu2 %v7713_v28 }
 0x625   :  { %3167 = vmatpush.bf16.msrb.mxu0 %v7716_v61 }
 0x626   :  { %3229 = vmatpush.bf16.msrb.mxu1 %v7714_v34  ;;  %3255 = vmatpush.bf16.msra.mxu3 %v7715_v43 }
 0x627   :  { %3193 = vmatpush.bf16.msrb.mxu2 %v7717_v3 }
 0x629   :  { %3168 = vmatpush.bf16.msrb.mxu0 %v7720_v21  ;;  %v7752_v21 = vld [vmem:[#allocation65_spill] sm:$0xff] }
 0x62a   :  { %3230 = vmatpush.bf16.msrb.mxu1 %v7718_v6  ;;  %3256 = vmatpush.bf16.msra.mxu3 %v7719_v46 }
 0x62b   :  { %3194 = vmatpush.bf16.msrb.mxu2 %v7721_v20  ;;  %v7753_v20 = vld [vmem:[#allocation121_spill] sm:$0xff] }
 0x62d   :  { %3169 = vmatpush.bf16.msrb.mxu0 %v7724_v56 }
 0x62e   :  { %3231 = vmatpush.bf16.msrb.mxu1 %v7722_v32  ;;  %3257 = vmatpush.bf16.msra.mxu3 %v7723_v62  ;;  %v350_v32 = vadd.f32 %v7753_v20, %v7752_v21 }
 0x62f   :  { %3195 = vmatpush.bf16.msrb.mxu2 %v7726_v22 }
 0x631   :  { %3214 = vmatpush.bf16.msra.mxu0 %v7725_v12 }
 0x632   :  { %3232 = vmatpush.bf16.msrb.mxu1 %v7727_v54  ;;  %3258 = vmatpush.bf16.msra.mxu3 %v7729_v18 }
 0x633   :  { %3240 = vmatpush.bf16.msra.mxu2 %v7728_v45 }
 0x635   :  { %3215 = vmatpush.bf16.msra.mxu0 %v7730_v0 }
 0x636   :  { %3233 = vmatpush.bf16.msrb.mxu1 %v7731_v40  ;;  %3259 = vmatpush.bf16.msra.mxu3 %v7733_v13 }
 0x637   :  { %3241 = vmatpush.bf16.msra.mxu2 %v7732_v9 }
 0x639   :  { %3216 = vmatpush.bf16.msra.mxu0 %v7734_v31 }
 0x63a   :  { %3234 = vmatpush.bf16.msrb.mxu1 %v7735_v48  ;;  %3260 = vmatpush.bf16.msra.mxu3 %v7737_v55 }
 0x63b   :  { %3242 = vmatpush.bf16.msra.mxu2 %v7736_v15 }
 0x63d   :  { %3217 = vmatpush.bf16.msra.mxu0 %v7738_v57 }
 0x63f   :  { %3243 = vmatpush.bf16.msra.mxu2 %v7739_v58 }
 0x641   :  { %3218 = vmatpush.bf16.msra.mxu0 %v7740_v27 }
 0x643   :  { %3244 = vmatpush.bf16.msra.mxu2 %v7741_v51 }
 0x645   :  { %3219 = vmatpush.bf16.msra.mxu0 %v7742_v25  ;;  %v7754_v25 = vld [vmem:[#allocation47_spill] sm:$0xff] }
 0x647   :  { %3245 = vmatpush.bf16.msra.mxu2 %v7743_v60  ;;  %v7755_v60 = vld [vmem:[#allocation52_spill] sm:$0xff] }
 0x649   :  { %3220 = vmatpush.bf16.msra.mxu0 %v7744_v7  ;;  %v263_v7 = vadd.f32 %v7755_v60, %v7754_v25 }
 0x64b   :  { %3246 = vmatpush.bf16.msra.mxu2 %v7745_v1 }
 0x64d   :  { %3221 = vmatpush.bf16.msra.mxu0 %v7746_v19 }
 0x64f   :  { %3247 = vmatpush.bf16.msra.mxu2 %v7747_v30 }
 0x65a   :  { %v2889_v36 = vpop.f32.mrf.mxu1 }
 0x660   :  { %v2915_v39 = vpop.f32.mrf.mxu3 }
 0x662   :  { %v2891_v44 = vpop.f32.mrf.mxu1 }
 0x668   :  { %v2917_v50 = vpop.f32.mrf.mxu3 }
 0x66a   :  { %v2941_v53 = vpop.f32.mrf.mxu1 }
 0x66d   :  { %v2876_v63 = vpop.f32.mrf.mxu0 }
 0x66e   :  { %v2877_v41 = vadd.f32 %v2876_v63, %v7748_v16 }
 0x670   :  { %v2890_v52 = vadd.f32 %v2889_v36, %v2877_v41  ;;  %v2967_v2 = vpop.f32.mrf.mxu3 }
 0x672   :  { %v4289_v5 = vmul.f32 -1.442695, %v2890_v52  ;;  %v2943_v4 = vpop.f32.mrf.mxu1 }
 0x673   :  { %v2902_v49 = vpop.f32.mrf.mxu2 }
 0x674   :  { %4831 = vpow2.f32 %v4289_v5  ;;  %v2903_v23 = vadd.f32 %v2902_v49, %v7749_v8 }
 0x675   :  { %v2878_v35 = vpop.f32.mrf.mxu0 }
 0x676   :  { %v2916_v17 = vadd.f32 %v2915_v39, %v2903_v23 }
 0x678   :  { %v4290_v38 = vmul.f32 -1.442695, %v2916_v17  ;;  %v2969_v47 = vpop.f32.mrf.mxu3 }
 0x67a   :  { %v4832_v24 = vpop.eup %4831  ;;  %4833 = vpow2.f32 %v4290_v38  ;;  %v3064_v42 = vpop.f32.mrf.mxu1 }
 0x67b   :  { %v6852_v37 = vadd.f32 1.0, %v4832_v24  ;;  %v3095_v28 = vadd.f32 %v3064_v42, %v292_v26  ;;  %v2904_v34 = vpop.f32.mrf.mxu2 }
 0x67d   :  { %4835 = vrcp.f32 %v6852_v37  ;;  %v4293_v43 = vmul.f32 -1.442695, %v3095_v28  ;;  %v2928_v61 = vpop.f32.mrf.mxu0  ;;  %vm2980_vm15 = vweird.f32 %v6852_v37  ;;  %v2986_v41 = vand.u32 2147483648, %v6852_v37 }
 0x67e   :  { %v2929_v13 = vadd.f32 %v2928_v61, %v7383_v29 }
 0x67f   :  { %4837 = vpow2.f32 %v4293_v43  ;;  %v2987_v11 = vor.u32 1.1754944e-38, %v2986_v41 }
 0x680   :  { %v4834_v3 = vpop.eup %4833  ;;  %v2942_v19 = vadd.f32 %v2941_v53, %v2929_v13  ;;  %v2984_v53 = vand.u32 2147483647, %v6852_v37 }
 0x681   :  { %v2993_v6 = vadd.f32 1.0, %v4834_v3 }
 0x682   :  { %v3090_v46 = vpop.f32.mrf.mxu3  ;;  %v3066_v62 = vpop.f32.mrf.mxu1  ;;  %vm2985_vm4 = vcmp.eq.f32.partialorder %v2984_v53, 8.507059e+37 }
 0x683   :  { %v4836_v56 = vpop.eup %4835  ;;  %4839 = vrcp.f32 %v2993_v6  ;;  %v2954_v12 = vpop.f32.mrf.mxu2  ;;  %v3097_v54 = vadd.f32 %v3090_v46, %v350_v32  ;;  %v3005_v30 = vand.u32 2147483648, %v2993_v6  ;;  %v3003_v36 = vand.u32 2147483647, %v2993_v6 }
 0x684   :  { %v2976_v22 = vmul.f32 %v4836_v56, %v6852_v37  ;;  %v2955_v45 = vadd.f32 %v2954_v12, %v5893_v59  ;;  %vm2981_vm13 = vweird.f32 %v4836_v56  ;;  %vm2999_vm0 = vweird.f32 %v2993_v6 }
 0x685   :  { %v2930_v18 = vpop.f32.mrf.mxu0  ;;  %v4838_v0 = vpop.eup %4837  ;;  %v4294_v31 = vmul.f32 -1.442695, %v3097_v54  ;;  %vm6867_vm1 = vmor %vm2980_vm15, %vm2981_vm13  ;;  %v3006_v49 = vor.u32 1.1754944e-38, %v3005_v30  ;;  %vm3004_vm3 = vcmp.eq.f32.partialorder %v3003_v36, 8.507059e+37 }
 0x686   :  { %v2977_v40 = vsub.f32 1.0, %v2976_v22  ;;  %v2968_v9 = vadd.f32 %v2967_v2, %v2955_v45  ;;  %v6860_v15 = vadd.f32 1.0, %v4838_v0  ;;  %v7758_v45 = vld [vmem:[#allocation63_spill] sm:$0xff]  ;;  %v7759_v18 = vld [vmem:[#allocation118_spill] sm:$0xff] }
 0x687   :  { %v321_v0 = vadd.f32 %v7759_v18, %v7758_v45  ;;  %v4572_v45 = vld [vmem:[#allocation9 + $0x10] sm:$0xff]  ;;  %v4571_v18 = vld [vmem:[#allocation9 + $0x8] sm:$0xff] }
 0x688   :  { %v4291_v55 = vmul.f32 -1.442695, %v2968_v9  ;;  %v2978_v27 = vmul.f32 %v4836_v56, %v2977_v40  ;;  %vm3126_vm10 = vweird.f32 %v6860_v15 }
 0x689   :  { %v4840_v48 = vpop.eup %4839 }
 0x68a   :  { %v3092_v57 = vpop.f32.mrf.mxu3  ;;  %v2995_v58 = vmul.f32 %v4840_v48, %v2993_v6  ;;  %4841 = vpow2.f32 %v4291_v55  ;;  %vm3000_vm14 = vweird.f32 %v4840_v48  ;;  %v2979_v50 = vadd.f32 %v4836_v56, %v2978_v27 }
 0x68b   :  { %v2956_v51 = vpop.f32.mrf.mxu2  ;;  %4843 = vpow2.f32 %v4294_v31  ;;  %vm3001_vm2 = vmor %vm2999_vm0, %vm3000_vm14 }
 0x68c   :  { %v2996_v1 = vsub.f32 1.0, %v2995_v58  ;;  %4845 = vrcp.f32 %v6860_v15  ;;  %v2983_v35 = vsel %vm6867_vm1, %v4836_v56, %v2979_v50  ;;  %v3132_v51 = vand.u32 2147483648, %v6860_v15 }
 0x68d   :  { %v3051_v39 = vpop.f32.mrf.mxu0  ;;  %4847 = vtanh.f32 %v2942_v19  ;;  %v2988_v24 = vsel %vm2985_vm4, %v2987_v11, %v2983_v35  ;;  %v3130_v19 = vand.u32 2147483647, %v6860_v15  ;;  %v4567_v11 = vld [vmem:[#allocation8 + $0x28] sm:$0xff] }
 0x68e   :  { %v2997_v44 = vmul.f32 %v4840_v48, %v2996_v1  ;;  %v3094_v63 = vadd.f32 %v3051_v39, %v263_v7  ;;  %v3133_v52 = vor.u32 1.1754944e-38, %v3132_v51  ;;  %v4585_v51 = vld [vmem:[#allocation11 + $0x38] sm:$0xff]  ;;  %v4584_v7 = vld [vmem:[#allocation11 + $0x30] sm:$0xff] }
 0x68f   :  { %vm3131_vm14 = vcmp.eq.f32.partialorder %v3130_v19, 8.507059e+37 }
 0x690   :  { %v2998_v2 = vadd.f32 %v4840_v48, %v2997_v44  ;;  %v4292_v5 = vmul.f32 -1.442695, %v3094_v63  ;;  %v4842_v4 = vpop.eup %4841  ;;  %v4569_v44 = vld [vmem:[#allocation8 + $0x38] sm:$0xff] }
 0x691   :  { %v4844_v23 = vpop.eup %4843  ;;  %v3013_v38 = vadd.f32 1.0, %v4842_v4  ;;  %v4568_v4 = vld [vmem:[#allocation8 + $0x30] sm:$0xff] }
 0x692   :  { %v3002_v17 = vsel %vm3001_vm2, %v4840_v48, %v2998_v2  ;;  %v6874_v47 = vpop.eup %4845  ;;  %4849 = vpow2.f32 %v4292_v5  ;;  %v6879_v43 = vadd.f32 1.0, %v4844_v23 }
 0x693   :  { %v3007_v10 = vsel %vm3004_vm3, %v3006_v49, %v3002_v17  ;;  %4851 = vrcp.f32 %v3013_v38  ;;  %v3122_v37 = vmul.f32 %v6874_v47, %v6860_v15  ;;  %v4848_v34 = vpop.eup %4847  ;;  %v3023_v54 = vand.u32 2147483647, %v3013_v38 }
 0x694   :  { %v3029_v28 = vmul.f32 %v3007_v10, %v6719_v33  ;;  %v3030_v61 = vmul.f32 %v4848_v34, %v2988_v24  ;;  %4853 = vrcp.f32 %v6879_v43  ;;  %v3025_v33 = vand.u32 2147483648, %v3013_v38  ;;  %v4565_v34 = vld [vmem:[#allocation8 + $0x18] sm:$0xff] }
 0x695   :  { %v3053_v42 = vpop.f32.mrf.mxu0  ;;  %v3123_v46 = vsub.f32 1.0, %v3122_v37  ;;  %vm3019_vm6 = vweird.f32 %v3013_v38  ;;  %vm3127_vm7 = vweird.f32 %v6874_v47  ;;  %vm3024_vm9 = vcmp.eq.f32.partialorder %v3023_v54, 8.507059e+37  ;;  %v4566_v37 = vld [vmem:[#allocation8 + $0x20] sm:$0xff]  ;;  %v4573_v54 = vld [vmem:[#allocation9 + $0x18] sm:$0xff] }
 0x696   :  { %v6881_v21 = vadd.f32 %v3030_v61, %v3029_v28  ;;  %v3026_v55 = vor.u32 1.1754944e-38, %v3025_v33  ;;  %vm6896_vm11 = vmor %vm3126_vm10, %vm3127_vm7  ;;  %v3152_v24 = vand.u32 2147483648, %v6879_v43  ;;  %vm3146_vm2 = vweird.f32 %v6879_v43  ;;  %v4562_v33 = vld [vmem:[#allocation8] sm:$0xff] }
 0x697   :  { %v3077_v26 = vpop.f32.mrf.mxu2  ;;  %v3124_v12 = vmul.f32 %v6874_v47, %v3123_v46  ;;  %v3150_v42 = vand.u32 2147483647, %v6879_v43  ;;  %v4577_v46 = vld [vmem:[#allocation9 + $0x38] sm:$0xff] }
 0x698   :  { %v4850_v3 = vpop.eup %4849  ;;  %v3096_v31 = vadd.f32 %v3077_v26, %v321_v0  ;;  %v3153_v28 = vor.u32 1.1754944e-38, %v3152_v24  ;;  %v4570_v0 = vld [vmem:[#allocation9] sm:$0xff] }
 0x699   :  { %v4852_v6 = vpop.eup %4851  ;;  %v3101_v20 = vadd.f32 1.0, %v4850_v3  ;;  %v3125_v48 = vadd.f32 %v6874_v47, %v3124_v12  ;;  %vm3151_vm4 = vcmp.eq.f32.partialorder %v3150_v42, 8.507059e+37  ;;  %v4575_v12 = vld [vmem:[#allocation9 + $0x28] sm:$0xff] }
 0x69a   :  { %v3015_v32 = vmul.f32 %v4852_v6, %v3013_v38  ;;  %vm3020_vm5 = vweird.f32 %v4852_v6  ;;  %v6888_v40 = vpop.eup %4853 }
 0x69b   :  { %4855 = vrcp.f32 %v3101_v20  ;;  %vm3021_vm8 = vmor %vm3019_vm6, %vm3020_vm5  ;;  %v3142_v25 = vmul.f32 %v6888_v40, %v6879_v43  ;;  %v3113_v36 = vand.u32 2147483648, %v3101_v20  ;;  %v3129_v39 = vsel %vm6896_vm11, %v6874_v47, %v3125_v48 }
 0x69c   :  { %v3016_v56 = vsub.f32 1.0, %v3015_v32  ;;  %4857 = vtanh.f32 %v6881_v21  ;;  %v3111_v63 = vand.u32 2147483647, %v3101_v20  ;;  %vm3107_vm13 = vweird.f32 %v3101_v20  ;;  %v4564_v32 = vld [vmem:[#allocation8 + $0x10] sm:$0xff] }
 0x69d   :  { %4859 = vtanh.f32 %v3096_v31  ;;  %v3143_v53 = vsub.f32 1.0, %v3142_v25  ;;  %v3114_v15 = vor.u32 1.1754944e-38, %v3113_v36  ;;  %v3134_v5 = vsel %vm3131_vm14, %v3133_v52, %v3129_v39  ;;  %v4592_v31 = vld [vmem:[#allocation12 + $0x30] sm:$0xff] }
 0x69e   :  { %v3017_v22 = vmul.f32 %v4852_v6, %v3016_v56  ;;  %vm3112_vm0 = vcmp.eq.f32.partialorder %v3111_v63, 8.507059e+37  ;;  %v3156_v38 = vmul.f32 %v3134_v5, %v6747_v14  ;;  %vm3147_vm1 = vweird.f32 %v6888_v40  ;;  %v4563_v56 = vld [vmem:[#allocation8 + $0x8] sm:$0xff] }
 0x69f   :  { %v3079_v62 = vpop.f32.mrf.mxu2  ;;  %v3144_v35 = vmul.f32 %v6888_v40, %v3143_v53  ;;  %vm3148_vm3 = vmor %vm3146_vm2, %vm3147_vm1 }
 0x6a0   :  { %v3018_v9 = vadd.f32 %v4852_v6, %v3017_v22  ;;  %v4576_v62 = vld [vmem:[#allocation9 + $0x30] sm:$0xff]  ;;  %v4574_v22 = vld [vmem:[#allocation9 + $0x20] sm:$0xff] }
 0x6a1   :  { %v4856_v13 = vpop.eup %4855  ;;  %v3145_v26 = vadd.f32 %v6888_v40, %v3144_v35 }
 0x6a2   :  { %v3103_v57 = vmul.f32 %v4856_v13, %v3101_v20  ;;  %v3022_v58 = vsel %vm3021_vm8, %v4852_v6, %v3018_v9  ;;  %v4858_v27 = vpop.eup %4857  ;;  %vm3108_vm12 = vweird.f32 %v4856_v13 }
 0x6a3   :  { %v3027_v60 = vsel %vm3024_vm9, %v3026_v55, %v3022_v58  ;;  %vm3109_vm15 = vmor %vm3107_vm13, %vm3108_vm12  ;;  %v4860_v23 = vpop.eup %4859  ;;  %v3149_v14 = vsel %vm3148_vm3, %v6888_v40, %v3145_v26  ;;  %v4590_v58 = vld [vmem:[#allocation12 + $0x20] sm:$0xff] }
 0x6a4   :  { %v3104_v1 = vsub.f32 1.0, %v3103_v57  ;;  %v3033_v30 = vmul.f32 %v4858_v27, %v3027_v60  ;;  %v3154_v3 = vsel %vm3151_vm4, %v3153_v28, %v3149_v14  ;;  %v4591_v57 = vld [vmem:[#allocation12 + $0x28] sm:$0xff]  ;;  %v4589_v60 = vld [vmem:[#allocation12 + $0x18] sm:$0xff] }
 0x6a6   :  { %v3105_v50 = vmul.f32 %v4856_v13, %v3104_v1  ;;  %v3034_v41 = vpack.c.bf16 %v3033_v30, %v3033_v30  ;;  %v4588_v30 = vld [vmem:[#allocation12 + $0x10] sm:$0xff] }
 0x6a8   :  { %v3106_v2 = vadd.f32 %v4856_v13, %v3105_v50  ;;  %3183 = vmatmul.bf16.vlgmr.msra.gmra.mxu1 %v3034_v41  ;;  %3209 = vmatmul.bf16.vlgmr.msrb.gmra.mxu3 %v3034_v41 }
 0x6a9   :  { %3480 = vmatpush.bf16.msra.mxu1 %v4569_v44  ;;  %v4583_v44 = vld [vmem:[#allocation11 + $0x28] sm:$0xff] }
 0x6aa   :  { %v3110_v49 = vsel %vm3109_vm15, %v4856_v13, %v3106_v2  ;;  %v4593_v13 = vld [vmem:[#allocation12 + $0x38] sm:$0xff]  ;;  %v4582_v2 = vld [vmem:[#allocation11 + $0x20] sm:$0xff] }
 0x6ab   :  { %v3115_v17 = vsel %vm3112_vm0, %v3114_v15, %v3110_v49  ;;  %3636 = vmatpush.bf16.msrb.mxu3 %v4593_v13 }
 0x6ac   :  { %v3157_v47 = vmul.f32 %v4860_v23, %v3115_v17  ;;  %v4581_v23 = vld [vmem:[#allocation11 + $0x18] sm:$0xff] }
 0x6ad   :  { %3481 = vmatpush.bf16.msra.mxu1 %v4568_v4 }
 0x6ae   :  { %v3158_v10 = vadd.f32 %v3157_v47, %v3156_v38 }
 0x6af   :  { %3637 = vmatpush.bf16.msrb.mxu3 %v4592_v31 }
 0x6b0   :  { %4861 = vtanh.f32 %v3158_v10  ;;  %3335 = vst [vmem:[#allocation16] sm:$0xff] %v3158_v10  ;;  %v3354_v40 = vpack.c.bf16 %v3158_v10, %v3158_v10 }
 0x6b1   :  { %3482 = vmatpush.bf16.msra.mxu1 %v4567_v11  ;;  %v4580_v11 = vld [vmem:[#allocation11 + $0x10] sm:$0xff] }
 0x6b3   :  { %3638 = vmatpush.bf16.msrb.mxu3 %v4591_v57 }
 0x6b5   :  { %3483 = vmatpush.bf16.msra.mxu1 %v4566_v37  ;;  %v4578_v37 = vld [vmem:[#allocation11] sm:$0xff] }
 0x6b6   :  { %v4862_v61 = vpop.eup %4861 }
 0x6b7   :  { %v3160_v6 = vmul.f32 %v4862_v61, %v3154_v3  ;;  %3639 = vmatpush.bf16.msrb.mxu3 %v4590_v58 }
 0x6b8   :  { %3235 = vmatmul.bf16.vlgmr.msrb.gmra.mxu1 %v3034_v41  ;;  %3261 = vmatmul.bf16.vlgmr.msra.gmra.mxu3 %v3034_v41  ;;  %v4587_v41 = vld [vmem:[#allocation12 + $0x8] sm:$0xff] }
 0x6b9   :  { %3484 = vmatpush.bf16.msra.mxu1 %v4565_v34  ;;  %v3161_v20 = vpack.c.bf16 %v3160_v6, %v3160_v6 }
 0x6bb   :  { %3170 = vmatmul.bf16.vlgmr.msrb.gmra.mxu0 %v3161_v20  ;;  %3196 = vmatmul.bf16.vlgmr.msrb.gmra.mxu2 %v3161_v20  ;;  %v3330_v43 = vunpack.c.l.bf16 %v3161_v20 }
 0x6bc   :  { %3419 = vmatpush.bf16.msrb.mxu0 %v4577_v46  ;;  %3557 = vmatpush.bf16.msrb.mxu2 %v4585_v51 }
 0x6bd   :  { %3485 = vmatpush.bf16.msra.mxu1 %v4564_v32  ;;  %3331 = vst [vmem:[#allocation15] sm:$0xff] %v3330_v43  ;;  %3640 = vmatpush.bf16.msrb.mxu3 %v4589_v60 }
 0x6c0   :  { %3420 = vmatpush.bf16.msrb.mxu0 %v4576_v62  ;;  %3558 = vmatpush.bf16.msrb.mxu2 %v4584_v7  ;;  %v4601_v62 = vld [vmem:[#allocation14 + $0x38] sm:$0xff] }
 0x6c1   :  { %3486 = vmatpush.bf16.msra.mxu1 %v4563_v56  ;;  %3641 = vmatpush.bf16.msrb.mxu3 %v4588_v30 }
 0x6c4   :  { %3421 = vmatpush.bf16.msrb.mxu0 %v4575_v12  ;;  %3559 = vmatpush.bf16.msrb.mxu2 %v4583_v44 }
 0x6c5   :  { %3487 = vmatpush.bf16.msra.mxu1 %v4562_v33  ;;  %3642 = vmatpush.bf16.msrb.mxu3 %v4587_v41 }
 0x6c8   :  { %3422 = vmatpush.bf16.msrb.mxu0 %v4574_v22  ;;  %3488 = vmatmul.bf16.vlgmr.msra.gmra.mxu1 %v3161_v20 }
 0x6c9   :  { %3560 = vmatpush.bf16.msrb.mxu2 %v4582_v2 }
 0x6cb   :  { %3222 = vmatmul.bf16.vlgmr.msra.gmra.mxu0 %v3161_v20  ;;  %3248 = vmatmul.bf16.vlgmr.msra.gmra.mxu2 %v3161_v20 }
 0x6cc   :  { %3423 = vmatpush.bf16.msrb.mxu0 %v4573_v54 }
 0x6cd   :  { %3561 = vmatpush.bf16.msrb.mxu2 %v4581_v23 }
 0x6d0   :  { %3424 = vmatpush.bf16.msrb.mxu0 %v4572_v45 }
 0x6d1   :  { %3562 = vmatpush.bf16.msrb.mxu2 %v4580_v11  ;;  %v4597_v11 = vld [vmem:[#allocation14 + $0x18] sm:$0xff] }
 0x6d4   :  { %3425 = vmatpush.bf16.msrb.mxu0 %v4571_v18 }
 0x6d8   :  { %3426 = vmatpush.bf16.msrb.mxu0 %v4570_v0 }
 0x6db   :  { %3427 = vmatmul.bf16.vlgmr.msrb.gmra.mxu0 %v3354_v40 }
 0x6dc   :  { %3726 = vmatpush.bf16.msra.mxu0 %v4601_v62 }
 0x725   :  { %v3184_v9 = vpop.f32.mrf.mxu1 }
 0x72b   :  { %v3210_v48 = vpop.f32.mrf.mxu3 }
 0x72d   :  { %v3186_v55 = vpop.f32.mrf.mxu1 }
 0x733   :  { %v3212_v27 = vpop.f32.mrf.mxu3 }
 0x735   :  { %v3236_v25 = vpop.f32.mrf.mxu1 }
 0x738   :  { %v3171_v1 = vpop.f32.mrf.mxu0 }
 0x739   :  { %v3172_v19 = vadd.f32 %v3171_v1, %v7748_v16  ;;  %v4586_v16 = vld [vmem:[#allocation12] sm:$0xff] }
 0x73a   :  { %3643 = vmatpush.bf16.msrb.mxu3 %v4586_v16 }
 0x73b   :  { %v3185_v36 = vadd.f32 %v3184_v9, %v3172_v19  ;;  %v3262_v39 = vpop.f32.mrf.mxu3 }
 0x73d   :  { %v4295_v50 = vmul.f32 -1.442695, %v3185_v36  ;;  %v3238_v63 = vpop.f32.mrf.mxu1 }
 0x73e   :  { %v3197_v52 = vpop.f32.mrf.mxu2 }
 0x73f   :  { %4863 = vpow2.f32 %v4295_v50  ;;  %v3198_v53 = vadd.f32 %v3197_v52, %v7749_v8  ;;  %v4579_v8 = vld [vmem:[#allocation11 + $0x8] sm:$0xff] }
 0x740   :  { %v3173_v15 = vpop.f32.mrf.mxu0  ;;  %3563 = vmatpush.bf16.msrb.mxu2 %v4579_v8  ;;  %v4595_v8 = vld [vmem:[#allocation14 + $0x8] sm:$0xff] }
 0x741   :  { %v3211_v5 = vadd.f32 %v3210_v48, %v3198_v53 }
 0x743   :  { %v4296_v4 = vmul.f32 -1.442695, %v3211_v5  ;;  %v3264_v49 = vpop.f32.mrf.mxu3 }
 0x744   :  { %3564 = vmatpush.bf16.msrb.mxu2 %v4578_v37 }
 0x745   :  { %v4864_v35 = vpop.eup %4863  ;;  %4865 = vpow2.f32 %v4296_v4  ;;  %v3489_v17 = vpop.f32.mrf.mxu1 }
 0x746   :  { %v3269_v38 = vadd.f32 1.0, %v4864_v35  ;;  %v3199_v47 = vpop.f32.mrf.mxu2 }
 0x747   :  { %v4598_v47 = vld [vmem:[#allocation14 + $0x20] sm:$0xff] }
 0x748   :  { %4867 = vrcp.f32 %v3269_v38  ;;  %v3223_v10 = vpop.f32.mrf.mxu0  ;;  %v3281_v54 = vand.u32 2147483648, %v3269_v38  ;;  %vm3275_vm6 = vweird.f32 %v3269_v38 }
 0x749   :  { %v3224_v3 = vadd.f32 %v3223_v10, %v7383_v29  ;;  %v4596_v10 = vld [vmem:[#allocation14 + $0x10] sm:$0xff] }
 0x74a   :  { %v3282_v55 = vor.u32 1.1754944e-38, %v3281_v54 }
 0x74b   :  { %v4866_v26 = vpop.eup %4865  ;;  %v3237_v12 = vadd.f32 %v3236_v25, %v3224_v3 }
 0x74c   :  { %v3288_v24 = vadd.f32 1.0, %v4866_v26  ;;  %v4594_v26 = vld [vmem:[#allocation14] sm:$0xff] }
 0x74d   :  { %v3491_v42 = vpop.f32.mrf.mxu1 }
 0x74e   :  { %v4868_v14 = vpop.eup %4867  ;;  %4869 = vrcp.f32 %v3288_v24  ;;  %v3249_v28 = vpop.f32.mrf.mxu2  ;;  %v3300_v29 = vand.u32 2147483648, %v3288_v24  ;;  %v3298_v40 = vand.u32 2147483647, %v3288_v24  ;;  %vm3294_vm9 = vweird.f32 %v3288_v24 }
 0x74f   :  { %v3271_v34 = vmul.f32 %v4868_v14, %v3269_v38  ;;  %v3250_v61 = vadd.f32 %v3249_v28, %v5893_v59  ;;  %vm3276_vm5 = vweird.f32 %v4868_v14  ;;  %v3279_v59 = vand.u32 2147483647, %v3269_v38  ;;  %v4599_v38 = vld [vmem:[#allocation14 + $0x28] sm:$0xff]  ;;  %v4621_v28 = vld [vmem:[%s6951_s10] ss:$0 sm:$0xff]  ;;  %s5174_s10 = smov [#allocation15]  }
 0x750   :  { %v3225_v6 = vpop.f32.mrf.mxu0  ;;  %vm6916_vm7 = vmor %vm3275_vm6, %vm3276_vm5  ;;  %v3301_v27 = vor.u32 1.1754944e-38, %v3300_v29  ;;  %vm3299_vm12 = vcmp.eq.f32.partialorder %v3298_v40, 8.507059e+37  ;;  %s3744_s19 = sshll.u32 %s5174_s10, 4  ;;  %s3745_s19 = int_to_ptr.vmem [resolvable:$true] %s3744_s19 }
 0x751   :  { %v3272_v46 = vsub.f32 1.0, %v3271_v34  ;;  %v3263_v20 = vadd.f32 %v3262_v39, %v3250_v61  ;;  %vm3280_vm10 = vcmp.eq.f32.partialorder %v3279_v59, 8.507059e+37 }
 0x753   :  { %v3273_v32 = vmul.f32 %v4868_v14, %v3272_v46  ;;  %v4297_v43 = vmul.f32 -1.442695, %v3263_v20  ;;  %v4622_v20 = vld [vmem:[%s6953_s12] ss:$0 sm:$0xff] }
 0x754   :  { %v4870_v56 = vpop.eup %4869 }
 0x755   :  { %v3290_v33 = vmul.f32 %v4870_v56, %v3288_v24  ;;  %v3274_v22 = vadd.f32 %v4868_v14, %v3273_v32  ;;  %4871 = vpow2.f32 %v4297_v43  ;;  %vm3295_vm8 = vweird.f32 %v4870_v56 }
 0x756   :  { %v3251_v45 = vpop.f32.mrf.mxu2  ;;  %4873 = vtanh.f32 %v3237_v12  ;;  %vm3296_vm11 = vmor %vm3294_vm9, %vm3295_vm8 }
 0x757   :  { %v3291_v18 = vsub.f32 1.0, %v3290_v33  ;;  %v3278_v31 = vsel %vm6916_vm7, %v4868_v14, %v3274_v22 }
 0x758   :  { %v3428_v9 = vpop.f32.mrf.mxu0  ;;  %v3283_v51 = vsel %vm3280_vm10, %v3282_v55, %v3278_v31 }
 0x759   :  { %v3292_v13 = vmul.f32 %v4870_v56, %v3291_v18  ;;  %v3490_v48 = vadd.f32 %v3489_v17, %v3428_v9  ;;  %v4600_v17 = vld [vmem:[#allocation14 + $0x30] sm:$0xff] }
 0x75a   :  { %3727 = vmatpush.bf16.msra.mxu0 %v4600_v17 }
 0x75b   :  { %v4872_v57 = vpop.eup %4871  ;;  %v3293_v58 = vadd.f32 %v4870_v56, %v3292_v13 }
 0x75c   :  { %v3308_v25 = vadd.f32 1.0, %v4872_v57  ;;  %v4874_v7 = vpop.eup %4873 }
 0x75d   :  { %v3297_v60 = vsel %vm3296_vm11, %v4870_v56, %v3293_v58  ;;  %v3325_v30 = vmul.f32 %v4874_v7, %v3283_v51 }
 0x75e   :  { %v3302_v1 = vsel %vm3299_vm12, %v3301_v27, %v3297_v60  ;;  %4875 = vrcp.f32 %v3308_v25  ;;  %v3320_v52 = vand.u32 2147483648, %v3308_v25  ;;  %v3318_v2 = vand.u32 2147483647, %v3308_v25  ;;  %3728 = vmatpush.bf16.msra.mxu0 %v4599_v38 }
 0x75f   :  { %v3324_v19 = vmul.f32 %v3302_v1, %v6881_v21  ;;  %vm3314_vm14 = vweird.f32 %v3308_v25 }
 0x760   :  { %v3430_v36 = vpop.f32.mrf.mxu0  ;;  %v3321_v5 = vor.u32 1.1754944e-38, %v3320_v52  ;;  %vm3319_vm0 = vcmp.eq.f32.partialorder %v3318_v2, 8.507059e+37 }
 0x761   :  { %v3326_v39 = vadd.f32 %v3325_v30, %v3324_v19 }
 0x762   :  { %3729 = vmatpush.bf16.msra.mxu0 %v4598_v47 }
 0x763   :  { %3337 = vst [vmem:[#allocation16 + $0x8] sm:$0xff] %v3326_v39  ;;  %v3571_v44 = vpack.c.bf16 %v3326_v39, %v3326_v39  ;;  %4877 = vtanh.f32 %v3326_v39 }
 0x764   :  { %v4876_v50 = vpop.eup %4875  ;;  %3765 = dma.vmem_to_hbm [thread:$0]  %s3758_s30, 256, %s3760_s0, [#allocation17], %s5172_s17, %s5172_s17, %s5173_s2  }
 0x765   :  { %v3310_v63 = vmul.f32 %v4876_v50, %v3308_v25  ;;  %3644 = vmatmul.bf16.vlgmr.msrb.gmra.mxu3 %v3571_v44  ;;  %vm3315_vm13 = vweird.f32 %v4876_v50 }
 0x766   :  { %vm3316_vm15 = vmor %vm3314_vm14, %vm3315_vm13  ;;  %3730 = vmatpush.bf16.msra.mxu0 %v4597_v11 }
 0x767   :  { %v3311_v41 = vsub.f32 1.0, %v3310_v63 }
 0x769   :  { %v3312_v53 = vmul.f32 %v4876_v50, %v3311_v41  ;;  %v4878_v21 = vpop.eup %4877 }
 0x76a   :  { %3731 = vmatpush.bf16.msra.mxu0 %v4596_v10 }
 0x76b   :  { %v3313_v15 = vadd.f32 %v4876_v50, %v3312_v53 }
 0x76d   :  { %v3317_v16 = vsel %vm3316_vm15, %v4876_v50, %v3313_v15 }
 0x76e   :  { %v3322_v4 = vsel %vm3319_vm0, %v3321_v5, %v3317_v16  ;;  %3732 = vmatpush.bf16.msra.mxu0 %v4595_v8 }
 0x76f   :  { %v3328_v49 = vmul.f32 %v4878_v21, %v3322_v4 }
 0x771   :  { %v3329_v23 = vpack.c.bf16 %v3328_v49, %v3328_v49 }
 0x772   :  { %3733 = vmatpush.bf16.msra.mxu0 %v4594_v26 }
 0x773   :  { %3565 = vmatmul.bf16.vlgmr.msrb.gmra.mxu2 %v3329_v23  ;;  %v3332_v35 = vunpack.c.l.bf16 %v3329_v23 }
 0x775   :  { %3334 = vst [vmem:[#allocation15 + $0x8] sm:$0xff] %v3332_v35 }
 0x776   :  { %3752 = dma.vmem_to_hbm [thread:$0]  %s3745_s19, 256, %s3747_s23, [#allocation5], %s5172_s17, %s5172_s17, %s5173_s2  }
 0x7e8   :  { %v3645_v24 = vpop.f32.mrf.mxu3 }
 0x7f0   :  { %v3647_v42 = vpop.f32.mrf.mxu3 }
 0x7f6   :  { %v3566_v37 = vpop.f32.mrf.mxu2 }
 0x7f7   :  { %v3570_v14 = vadd.f32 %v3566_v37, %v3490_v48 }
 0x7f9   :  { %v3649_v34 = vadd.f32 %v3645_v24, %v3570_v14 }
 0x7fb   :  { %v3654_v61 = vadd.f32 %v4621_v28, %v3649_v34 }
 0x7fd   :  { %4879 = vtanh.f32 %v3654_v61 }
 0x7fe   :  { %v3568_v3 = vpop.f32.mrf.mxu2 }
 0x803   :  { %v4880_v6 = vpop.eup %4879 }
 0x804   :  { %3656 = vst [vmem:[#allocation18] sm:$0xff] %v4880_v6  ;;  %v3657_v46 = vpack.c.bf16 %v4880_v6, %v4880_v6 }
 0x805   :  { %3776 = dma.vmem_to_hbm [thread:$0]  %s3772_s8, 128, %s3774_s14, [#allocation17]  }
 0x806   :  { %3734 = vmatmul.bf16.vlgmr.msra.gmra.mxu0 %v3657_v46 }
 0x883   :  { %v3735_v32 = vpop.f32.mrf.mxu0 }
 0x884   :  { %v3736_v43 = vadd.f32 %v4622_v20, %v3735_v32 }
 0x886   :  { %3739 = vst [vmem:[#allocation19] sm:$0xff] %v3736_v43 }
 0x887   :  { %3787 = dma.vmem_to_hbm [thread:$0]  %s3783_s27, 128, %s3785_s9, [#allocation20]  }
 0x88b   :  { %v3737_v62 = vpop.f32.mrf.mxu0 }
 0x88c   :  { %5153 = dma.done.wait [#allocation5], 256  }
 0x88d   :  { %5154 = vsyncadd [#allocation5], 4294967040 }
 0x88e   :  { %5155 = dma.done.wait [#allocation17], 384  }
 0x88f   :  { %5156 = vsyncadd [#allocation17], 4294966912 }
 0x890   :  { %5157 = dma.done.wait [#allocation20], 128  }
 0x891   :  { %5158 = vsyncadd [#allocation20], 4294967168 }
 0x892   :  { %3804 = vsyncpa [#allocation4], 1 }
 0x893   :  { %3805 = vsyncpa [#allocation7], 1 }
 0x894   :  { %3806 = vsyncpa [#allocation10], 1 }
 0x895   :  { %3807 = vsyncpa [#allocation13], 1 }
 0x896   :  { %3808 = vsyncpa [#allocation5], 1 }
 0x897   :  { %3809 = vsyncpa [#allocation17], 1 }
 0x898   :  { %3810 = vsyncpa [#allocation20], 1 }

</bundles_post_ra>
